<compile_context>
chip_gen: v7x
topology: tpu7x:2x2x1
jax: 0.10.0
libtpu: 0.0.40
codegen_flags: <defaults>
</compile_context>

<pallas_src>
import math

import jax
import jax.numpy as jnp
from jax import lax
from jax.experimental import pallas as pl
from jax.experimental.pallas import tpu as pltpu  # noqa: F401  (kept for scaling path)

# ---- small synthetic BioELECTRA-like config --------------------------------
B = 2               # batch
S = 8               # sequence length
M = B * S           # folded token axis (lanes)
H = 32              # hidden size
NH = 4              # attention heads
DH = H // NH        # head dim
FF = 64             # FFN intermediate size
L = 2               # encoder layers
VOCAB = 100
MAX_POS = 16
N_CLASSES = 2
OUT_PAD = 128       # lane-dense padded output width
LN_EPS = 1e-12

# dot_general dimension numbers (all 2-D, no transposed operands materialized)
DN_STD = (((1,), (0,)), ((), ()))   # (OUT, IN) @ (IN, M)   -> (OUT, M)
DN_CT0 = (((0,), (0,)), ((), ()))   # contract dim 0 of both (q^T k style)
DN_CT1 = (((1,), (1,)), ((), ()))   # contract dim 1 of both (v p^T style)


# ---------------------------- kernel helpers --------------------------------
def _gelu(x):
    # tanh-approximate GELU (keeps the transcendental on the TPU EUP path).
    # TODO(synk): HF ELECTRA "gelu" is erf-based; tanh approximation used here.
    return 0.5 * x * (1.0 + jnp.tanh(0.7978845608028654 * (x + 0.044715 * x * x * x)))


def _layernorm_t(x, g, b):
    # x: (features, tokens); normalize over the feature (sublane) axis.
    mu = jnp.mean(x, axis=0, keepdims=True)
    var = jnp.mean((x - mu) ** 2, axis=0, keepdims=True)
    return (x - mu) * lax.rsqrt(var + LN_EPS) * g + b


# ------------------------------ fused kernel ---------------------------------
def _fused_forward_kernel(x_ref, bias_ref, eg_ref, eb_ref,
                          wqkv_ref, bqkv_ref, wo_ref, bo_ref,
                          ln1g_ref, ln1b_ref, w1_ref, b1_ref,
                          w2_ref, b2_ref, ln2g_ref, ln2b_ref,
                          wout_ref, bout_ref, o_ref):
    x = x_ref[...]                       # (H, M)   feature-major activations
    bias = bias_ref[...]                 # (M, M)   additive attn bias (block-diag + key mask)

    # --- embedding LayerNorm (dropout p=0.1 is identity in eval) ---
    x = _layernorm_t(x, eg_ref[...], eb_ref[...])

    scale = 1.0 / math.sqrt(DH)
    for l in range(L):                   # static layer loop (L=2); fori_loop at real size
        # fused Q/K/V projection: one (3H, H) @ (H, M) matmul
        qkv = (lax.dot_general(wqkv_ref[l], x, DN_STD,
                               preferred_element_type=jnp.float32)
               + bqkv_ref[l])            # (3H, M); rows [Q h0..h3 | K | V]

        ctx_heads = []
        for h in range(NH):              # static head loop; slices are aligned 8-row tiles
            lo = h * DH
            q_h = qkv[lo:lo + DH, :]                     # (DH, M)
            k_h = qkv[H + lo:H + lo + DH, :]             # (DH, M)
            v_h = qkv[2 * H + lo:2 * H + lo + DH, :]     # (DH, M)

            # s[m, n] = (q_m . k_n) / sqrt(DH) + bias[m, n]
            s = lax.dot_general(q_h, k_h, DN_CT0,
                                preferred_element_type=jnp.float32) * scale + bias
            s = s - jnp.max(s, axis=1, keepdims=True)
            p = jnp.exp(s)
            p = p * pl.reciprocal(jnp.sum(p, axis=1, keepdims=True), approx=True)

            # ctx[d, m] = sum_n p[m, n] * v[d, n]
            ctx_heads.append(lax.dot_general(v_h, p, DN_CT1,
                                             preferred_element_type=jnp.float32))
        ctx = jnp.concatenate(ctx_heads, axis=0)          # (H, M), rows h*DH + d

        attn = (lax.dot_general(wo_ref[l], ctx, DN_STD,
                                preferred_element_type=jnp.float32)
                + bo_ref[l])                              # (H, M)
        h1 = _layernorm_t(x + attn, ln1g_ref[l], ln1b_ref[l])

        ff = _gelu(lax.dot_general(w1_ref[l], h1, DN_STD,
                                   preferred_element_type=jnp.float32) + b1_ref[l])
        ff = (lax.dot_general(w2_ref[l], ff, DN_STD,
                              preferred_element_type=jnp.float32) + b2_ref[l])
        x = _layernorm_t(h1 + ff, ln2g_ref[l], ln2b_ref[l])

    # --- per-batch max over sequence + lane-dense padded output projection ---
    for b in range(B):                   # one-time tiny epilogue
        pooled_b = jnp.max(x[:, b * S:(b + 1) * S], axis=1, keepdims=True)   # (H, 1)
        row = (lax.dot_general(pooled_b, wout_ref[...], DN_CT0,
                               preferred_element_type=jnp.float32)
               + bout_ref[...])                                              # (1, OUT_PAD)
        o_ref[b:b + 1, :] = row


# ---------------------------- pallas_call wrapper ----------------------------
def epid_bioelectra_forward(params, input_ids, attention_mask):
    # ELECTRA embeddings: word + position + token-type (gather is JAX glue),
    # everything downstream runs inside one fused Pallas kernel.
    x = (params["word_emb"][input_ids]
         + params["pos_emb"][None, :S, :]
         + params["type_emb"][0][None, None, :])            # (B, S, H)
    x_t = x.reshape(M, H).T                                  # (H, M) feature-major

    # HF-style additive mask (0 attended / -1e9 masked) on KEY positions,
    # plus block-diagonal masking so folded batch elements never attend
    # across each other.
    tok_bias = ((1.0 - attention_mask.astype(jnp.float32)) * -1e9).reshape(M)
    batch_ids = jnp.repeat(jnp.arange(B), S)
    same_batch = batch_ids[:, None] == batch_ids[None, :]
    bias_full = jnp.where(same_batch, tok_bias[None, :],
                          jnp.float32(-1e9))                 # (M, M)

    # lane-dense padded output head
    w_out_pad = jnp.zeros((H, OUT_PAD), jnp.float32).at[:, :N_CLASSES].set(params["w_out"])
    b_out_pad = jnp.zeros((1, OUT_PAD), jnp.float32).at[:, :N_CLASSES].set(params["b_out"])

    args = (x_t, bias_full, params["emb_ln_g"], params["emb_ln_b"],
            params["w_qkv"], params["b_qkv"], params["wo"], params["bo"],
            params["ln1_g"], params["ln1_b"], params["w1"], params["b1"],
            params["w2"], params["b2"], params["ln2_g"], params["ln2_b"],
            w_out_pad, b_out_pad)

    # No grid: one invocation, whole arrays VMEM-resident (single-buffered).
    out_pad = pl.pallas_call(
        _fused_forward_kernel,
        out_shape=jax.ShapeDtypeStruct((B, OUT_PAD), jnp.float32),
    )(*args)

    # torch: Linear(max_pooled.unsqueeze(1)) -> (B, 1, 2)
    return out_pad[:, :N_CLASSES].reshape(B, 1, N_CLASSES)


epid_bioelectra_forward_jit = jax.jit(epid_bioelectra_forward)


# ----------------------------- parameter setup -------------------------------
def init_params(key):
    keys = iter(jax.random.split(key, 16))

    def nrm(shape, scale=0.02):
        return scale * jax.random.normal(next(keys), shape, dtype=jnp.float32)

    return {
        "word_emb": nrm((VOCAB, H)),
        "pos_emb": nrm((MAX_POS, H)),
        "type_emb": nrm((2, H)),
        "emb_ln_g": jnp.ones((H, 1), jnp.float32),
        "emb_ln_b": jnp.zeros((H, 1), jnp.float32),
        # stacked per-layer weights, torch (out, in) orientation so the kernel
        # runs  W @ x  on feature-major activation tiles with no transposes.
        "w_qkv": nrm((L, 3 * H, H)),        # rows [Q h0..h3 | K h0..h3 | V h0..h3]
        "b_qkv": jnp.zeros((L, 3 * H, 1), jnp.float32),
        "wo": nrm((L, H, H)),               # (out, in); in-dim ordered h*DH + d
        "bo": jnp.zeros((L, H, 1), jnp.float32),
        "ln1_g": jnp.ones((L, H, 1), jnp.float32),
        "ln1_b": jnp.zeros((L, H, 1), jnp.float32),
        "w1": nrm((L, FF, H)),
        "b1": jnp.zeros((L, FF, 1), jnp.float32),
        "w2": nrm((L, H, FF)),
        "b2": jnp.zeros((L, H, 1), jnp.float32),
        "ln2_g": jnp.ones((L, H, 1), jnp.float32),
        "ln2_b": jnp.zeros((L, H, 1), jnp.float32),
        # output head Linear(hidden_size, 2), stored (in, out)
        "w_out": nrm((H, N_CLASSES)),
        "b_out": jnp.zeros((1, N_CLASSES), jnp.float32),
    }


# ---------------------------------- main --------------------------------------
if __name__ == "__main__":
    key = jax.random.PRNGKey(0)
    pkey, ikey = jax.random.split(key)
    params = init_params(pkey)

    input_ids = jax.random.randint(ikey, (B, S), 0, VOCAB, dtype=jnp.int32)
    attention_mask = jnp.ones((B, S), dtype=jnp.int32)
    attention_mask = attention_mask.at[1, 6:].set(0)   # exercise the mask path

    out = epid_bioelectra_forward_jit(params, input_ids, attention_mask)
    out = jax.block_until_ready(out)

    assert out.shape == (B, 1, N_CLASSES), out.shape
    assert bool(jnp.all(jnp.isfinite(out)))
    print("KERNEL_OK")
</pallas_src>

<mosaic_0001>
module attributes {stable_mosaic.version = 11 : i64} {
  func.func @_fused_forward_kernel(%arg0: memref<32x16xf32, #tpu.memory_space<vmem>>, %arg1: memref<16x16xf32, #tpu.memory_space<vmem>>, %arg2: memref<32x1xf32, #tpu.memory_space<vmem>>, %arg3: memref<32x1xf32, #tpu.memory_space<vmem>>, %arg4: memref<2x96x32xf32, #tpu.memory_space<vmem>>, %arg5: memref<2x96x1xf32, #tpu.memory_space<vmem>>, %arg6: memref<2x32x32xf32, #tpu.memory_space<vmem>>, %arg7: memref<2x32x1xf32, #tpu.memory_space<vmem>>, %arg8: memref<2x32x1xf32, #tpu.memory_space<vmem>>, %arg9: memref<2x32x1xf32, #tpu.memory_space<vmem>>, %arg10: memref<2x64x32xf32, #tpu.memory_space<vmem>>, %arg11: memref<2x64x1xf32, #tpu.memory_space<vmem>>, %arg12: memref<2x32x64xf32, #tpu.memory_space<vmem>>, %arg13: memref<2x32x1xf32, #tpu.memory_space<vmem>>, %arg14: memref<2x32x1xf32, #tpu.memory_space<vmem>>, %arg15: memref<2x32x1xf32, #tpu.memory_space<vmem>>, %arg16: memref<32x128xf32, #tpu.memory_space<vmem>>, %arg17: memref<1x128xf32, #tpu.memory_space<vmem>>, %arg18: memref<2x128xf32, #tpu.memory_space<vmem>>) attributes {dimension_semantics = [], scalar_prefetch = 0 : i64, scratch_operands = 0 : i64, tpu.core_type = #tpu.core_type<tc>} {
    %c0 = arith.constant 0 : index
    %c0_0 = arith.constant 0 : index
    %0 = vector.load %arg0[%c0, %c0_0] : memref<32x16xf32, #tpu.memory_space<vmem>>, vector<32x16xf32>
    %c0_1 = arith.constant 0 : index
    %c0_2 = arith.constant 0 : index
    %1 = vector.load %arg1[%c0_1, %c0_2] : memref<16x16xf32, #tpu.memory_space<vmem>>, vector<16x16xf32>
    %c0_3 = arith.constant 0 : index
    %c0_4 = arith.constant 0 : index
    %2 = vector.load %arg2[%c0_3, %c0_4] : memref<32x1xf32, #tpu.memory_space<vmem>>, vector<32x1xf32>
    %c0_5 = arith.constant 0 : index
    %c0_6 = arith.constant 0 : index
    %3 = vector.load %arg3[%c0_5, %c0_6] : memref<32x1xf32, #tpu.memory_space<vmem>>, vector<32x1xf32>
    %cst = arith.constant dense<0.000000e+00> : vector<16xf32>
    %4 = vector.multi_reduction <add>, %0, %cst [0] : vector<32x16xf32> to vector<16xf32>
    %5 = vector.shape_cast %4 : vector<16xf32> to vector<1x16xf32>
    %cst_7 = arith.constant 3.200000e+01 : f32
    %6 = vector.broadcast %cst_7 : f32 to vector<1x16xf32>
    %7 = arith.divf %5, %6 : vector<1x16xf32>
    %8 = vector.broadcast %7 : vector<1x16xf32> to vector<32x16xf32>
    %9 = arith.subf %0, %8 : vector<32x16xf32>
    %10 = arith.mulf %9, %9 : vector<32x16xf32>
    %cst_8 = arith.constant dense<0.000000e+00> : vector<16xf32>
    %11 = vector.multi_reduction <add>, %10, %cst_8 [0] : vector<32x16xf32> to vector<16xf32>
    %12 = vector.shape_cast %11 : vector<16xf32> to vector<1x16xf32>
    %cst_9 = arith.constant 3.200000e+01 : f32
    %13 = vector.broadcast %cst_9 : f32 to vector<1x16xf32>
    %14 = arith.divf %12, %13 : vector<1x16xf32>
    %15 = vector.broadcast %7 : vector<1x16xf32> to vector<32x16xf32>
    %16 = arith.subf %0, %15 : vector<32x16xf32>
    %cst_10 = arith.constant 9.99999996E-13 : f32
    %17 = vector.broadcast %cst_10 : f32 to vector<1x16xf32>
    %18 = arith.addf %14, %17 : vector<1x16xf32>
    %19 = math.rsqrt %18 : vector<1x16xf32>
    %20 = vector.broadcast %19 : vector<1x16xf32> to vector<32x16xf32>
    %21 = arith.mulf %16, %20 : vector<32x16xf32>
    %22 = vector.broadcast %2 : vector<32x1xf32> to vector<32x16xf32>
    %23 = arith.mulf %21, %22 : vector<32x16xf32>
    %24 = vector.broadcast %3 : vector<32x1xf32> to vector<32x16xf32>
    %25 = arith.addf %23, %24 : vector<32x16xf32>
    %c0_11 = arith.constant 0 : index
    %c0_12 = arith.constant 0 : index
    %c0_13 = arith.constant 0 : index
    %26 = vector.load %arg4[%c0_11, %c0_12, %c0_13] : memref<2x96x32xf32, #tpu.memory_space<vmem>>, vector<1x96x32xf32>
    %27 = vector.shape_cast %26 : vector<1x96x32xf32> to vector<96x32xf32>
    %cst_14 = arith.constant dense<0.000000e+00> : vector<96x16xf32>
    %28 = tpu.matmul %27, %25, %cst_14 {dimension_numbers = #tpu.dot_dimension_numbers<[1], [0], [0], [1], [0, 0, 1, 1], [], []>} : vector<96x32xf32>, vector<32x16xf32>, vector<96x16xf32> -> vector<96x16xf32>
    %c0_15 = arith.constant 0 : index
    %c0_16 = arith.constant 0 : index
    %c0_17 = arith.constant 0 : index
    %29 = vector.load %arg5[%c0_15, %c0_16, %c0_17] : memref<2x96x1xf32, #tpu.memory_space<vmem>>, vector<1x96x1xf32>
    %30 = vector.shape_cast %29 : vector<1x96x1xf32> to vector<96x1xf32>
    %31 = vector.broadcast %30 : vector<96x1xf32> to vector<96x16xf32>
    %32 = arith.addf %28, %31 : vector<96x16xf32>
    %33 = vector.extract_strided_slice %32 {offsets = [0, 0], sizes = [8, 16], strides = [1, 1]} : vector<96x16xf32> to vector<8x16xf32>
    %34 = vector.extract_strided_slice %32 {offsets = [32, 0], sizes = [8, 16], strides = [1, 1]} : vector<96x16xf32> to vector<8x16xf32>
    %35 = vector.extract_strided_slice %32 {offsets = [64, 0], sizes = [8, 16], strides = [1, 1]} : vector<96x16xf32> to vector<8x16xf32>
    %cst_18 = arith.constant dense<0.000000e+00> : vector<16x16xf32>
    %36 = tpu.matmul %33, %34, %cst_18 {dimension_numbers = #tpu.dot_dimension_numbers<[0], [0], [1], [1], [0, 1, 1, 1], [], []>} : vector<8x16xf32>, vector<8x16xf32>, vector<16x16xf32> -> vector<16x16xf32>
    %cst_19 = arith.constant 0.353553385 : f32
    %37 = vector.broadcast %cst_19 : f32 to vector<16x16xf32>
    %38 = arith.mulf %36, %37 : vector<16x16xf32>
    %39 = arith.addf %38, %1 : vector<16x16xf32>
    %cst_20 = arith.constant dense<0xFF800000> : vector<16xf32>
    %40 = vector.multi_reduction <maximumf>, %39, %cst_20 [1] : vector<16x16xf32> to vector<16xf32>
    %41 = vector.shape_cast %40 : vector<16xf32> to vector<16x1xf32>
    %42 = vector.broadcast %41 : vector<16x1xf32> to vector<16x16xf32>
    %43 = arith.subf %39, %42 : vector<16x16xf32>
    %44 = math.exp %43 : vector<16x16xf32>
    %cst_21 = arith.constant dense<0.000000e+00> : vector<16xf32>
    %45 = vector.multi_reduction <add>, %44, %cst_21 [1] : vector<16x16xf32> to vector<16xf32>
    %46 = vector.shape_cast %45 : vector<16xf32> to vector<16x1xf32>
    %47 = tpu.reciprocal %46 {approx = true} : vector<16x1xf32> -> vector<16x1xf32>
    %48 = vector.broadcast %47 : vector<16x1xf32> to vector<16x16xf32>
    %49 = arith.mulf %44, %48 : vector<16x16xf32>
    %cst_22 = arith.constant dense<0.000000e+00> : vector<8x16xf32>
    %50 = tpu.matmul %35, %49, %cst_22 {dimension_numbers = #tpu.dot_dimension_numbers<[1], [1], [0], [0], [0, 0, 1, 0], [], []>} : vector<8x16xf32>, vector<16x16xf32>, vector<8x16xf32> -> vector<8x16xf32>
    %51 = vector.extract_strided_slice %32 {offsets = [8, 0], sizes = [8, 16], strides = [1, 1]} : vector<96x16xf32> to vector<8x16xf32>
    %52 = vector.extract_strided_slice %32 {offsets = [40, 0], sizes = [8, 16], strides = [1, 1]} : vector<96x16xf32> to vector<8x16xf32>
    %53 = vector.extract_strided_slice %32 {offsets = [72, 0], sizes = [8, 16], strides = [1, 1]} : vector<96x16xf32> to vector<8x16xf32>
    %cst_23 = arith.constant dense<0.000000e+00> : vector<16x16xf32>
    %54 = tpu.matmul %51, %52, %cst_23 {dimension_numbers = #tpu.dot_dimension_numbers<[0], [0], [1], [1], [0, 1, 1, 1], [], []>} : vector<8x16xf32>, vector<8x16xf32>, vector<16x16xf32> -> vector<16x16xf32>
    %cst_24 = arith.constant 0.353553385 : f32
    %55 = vector.broadcast %cst_24 : f32 to vector<16x16xf32>
    %56 = arith.mulf %54, %55 : vector<16x16xf32>
    %57 = arith.addf %56, %1 : vector<16x16xf32>
    %cst_25 = arith.constant dense<0xFF800000> : vector<16xf32>
    %58 = vector.multi_reduction <maximumf>, %57, %cst_25 [1] : vector<16x16xf32> to vector<16xf32>
    %59 = vector.shape_cast %58 : vector<16xf32> to vector<16x1xf32>
    %60 = vector.broadcast %59 : vector<16x1xf32> to vector<16x16xf32>
    %61 = arith.subf %57, %60 : vector<16x16xf32>
    %62 = math.exp %61 : vector<16x16xf32>
    %cst_26 = arith.constant dense<0.000000e+00> : vector<16xf32>
    %63 = vector.multi_reduction <add>, %62, %cst_26 [1] : vector<16x16xf32> to vector<16xf32>
    %64 = vector.shape_cast %63 : vector<16xf32> to vector<16x1xf32>
    %65 = tpu.reciprocal %64 {approx = true} : vector<16x1xf32> -> vector<16x1xf32>
    %66 = vector.broadcast %65 : vector<16x1xf32> to vector<16x16xf32>
    %67 = arith.mulf %62, %66 : vector<16x16xf32>
    %cst_27 = arith.constant dense<0.000000e+00> : vector<8x16xf32>
    %68 = tpu.matmul %53, %67, %cst_27 {dimension_numbers = #tpu.dot_dimension_numbers<[1], [1], [0], [0], [0, 0, 1, 0], [], []>} : vector<8x16xf32>, vector<16x16xf32>, vector<8x16xf32> -> vector<8x16xf32>
    %69 = vector.extract_strided_slice %32 {offsets = [16, 0], sizes = [8, 16], strides = [1, 1]} : vector<96x16xf32> to vector<8x16xf32>
    %70 = vector.extract_strided_slice %32 {offsets = [48, 0], sizes = [8, 16], strides = [1, 1]} : vector<96x16xf32> to vector<8x16xf32>
    %71 = vector.extract_strided_slice %32 {offsets = [80, 0], sizes = [8, 16], strides = [1, 1]} : vector<96x16xf32> to vector<8x16xf32>
    %cst_28 = arith.constant dense<0.000000e+00> : vector<16x16xf32>
    %72 = tpu.matmul %69, %70, %cst_28 {dimension_numbers = #tpu.dot_dimension_numbers<[0], [0], [1], [1], [0, 1, 1, 1], [], []>} : vector<8x16xf32>, vector<8x16xf32>, vector<16x16xf32> -> vector<16x16xf32>
    %cst_29 = arith.constant 0.353553385 : f32
    %73 = vector.broadcast %cst_29 : f32 to vector<16x16xf32>
    %74 = arith.mulf %72, %73 : vector<16x16xf32>
    %75 = arith.addf %74, %1 : vector<16x16xf32>
    %cst_30 = arith.constant dense<0xFF800000> : vector<16xf32>
    %76 = vector.multi_reduction <maximumf>, %75, %cst_30 [1] : vector<16x16xf32> to vector<16xf32>
    %77 = vector.shape_cast %76 : vector<16xf32> to vector<16x1xf32>
    %78 = vector.broadcast %77 : vector<16x1xf32> to vector<16x16xf32>
    %79 = arith.subf %75, %78 : vector<16x16xf32>
    %80 = math.exp %79 : vector<16x16xf32>
    %cst_31 = arith.constant dense<0.000000e+00> : vector<16xf32>
    %81 = vector.multi_reduction <add>, %80, %cst_31 [1] : vector<16x16xf32> to vector<16xf32>
    %82 = vector.shape_cast %81 : vector<16xf32> to vector<16x1xf32>
    %83 = tpu.reciprocal %82 {approx = true} : vector<16x1xf32> -> vector<16x1xf32>
    %84 = vector.broadcast %83 : vector<16x1xf32> to vector<16x16xf32>
    %85 = arith.mulf %80, %84 : vector<16x16xf32>
    %cst_32 = arith.constant dense<0.000000e+00> : vector<8x16xf32>
    %86 = tpu.matmul %71, %85, %cst_32 {dimension_numbers = #tpu.dot_dimension_numbers<[1], [1], [0], [0], [0, 0, 1, 0], [], []>} : vector<8x16xf32>, vector<16x16xf32>, vector<8x16xf32> -> vector<8x16xf32>
    %87 = vector.extract_strided_slice %32 {offsets = [24, 0], sizes = [8, 16], strides = [1, 1]} : vector<96x16xf32> to vector<8x16xf32>
    %88 = vector.extract_strided_slice %32 {offsets = [56, 0], sizes = [8, 16], strides = [1, 1]} : vector<96x16xf32> to vector<8x16xf32>
    %89 = vector.extract_strided_slice %32 {offsets = [88, 0], sizes = [8, 16], strides = [1, 1]} : vector<96x16xf32> to vector<8x16xf32>
    %cst_33 = arith.constant dense<0.000000e+00> : vector<16x16xf32>
    %90 = tpu.matmul %87, %88, %cst_33 {dimension_numbers = #tpu.dot_dimension_numbers<[0], [0], [1], [1], [0, 1, 1, 1], [], []>} : vector<8x16xf32>, vector<8x16xf32>, vector<16x16xf32> -> vector<16x16xf32>
    %cst_34 = arith.constant 0.353553385 : f32
    %91 = vector.broadcast %cst_34 : f32 to vector<16x16xf32>
    %92 = arith.mulf %90, %91 : vector<16x16xf32>
    %93 = arith.addf %92, %1 : vector<16x16xf32>
    %cst_35 = arith.constant dense<0xFF800000> : vector<16xf32>
    %94 = vector.multi_reduction <maximumf>, %93, %cst_35 [1] : vector<16x16xf32> to vector<16xf32>
    %95 = vector.shape_cast %94 : vector<16xf32> to vector<16x1xf32>
    %96 = vector.broadcast %95 : vector<16x1xf32> to vector<16x16xf32>
    %97 = arith.subf %93, %96 : vector<16x16xf32>
    %98 = math.exp %97 : vector<16x16xf32>
    %cst_36 = arith.constant dense<0.000000e+00> : vector<16xf32>
    %99 = vector.multi_reduction <add>, %98, %cst_36 [1] : vector<16x16xf32> to vector<16xf32>
    %100 = vector.shape_cast %99 : vector<16xf32> to vector<16x1xf32>
    %101 = tpu.reciprocal %100 {approx = true} : vector<16x1xf32> -> vector<16x1xf32>
    %102 = vector.broadcast %101 : vector<16x1xf32> to vector<16x16xf32>
    %103 = arith.mulf %98, %102 : vector<16x16xf32>
    %cst_37 = arith.constant dense<0.000000e+00> : vector<8x16xf32>
    %104 = tpu.matmul %89, %103, %cst_37 {dimension_numbers = #tpu.dot_dimension_numbers<[1], [1], [0], [0], [0, 0, 1, 0], [], []>} : vector<8x16xf32>, vector<16x16xf32>, vector<8x16xf32> -> vector<8x16xf32>
    %105 = tpu.concatenate %50, %68, %86, %104 in 0 : vector<8x16xf32>, vector<8x16xf32>, vector<8x16xf32>, vector<8x16xf32> -> vector<32x16xf32>
    %c0_38 = arith.constant 0 : index
    %c0_39 = arith.constant 0 : index
    %c0_40 = arith.constant 0 : index
    %106 = vector.load %arg6[%c0_38, %c0_39, %c0_40] : memref<2x32x32xf32, #tpu.memory_space<vmem>>, vector<1x32x32xf32>
    %107 = vector.shape_cast %106 : vector<1x32x32xf32> to vector<32x32xf32>
    %cst_41 = arith.constant dense<0.000000e+00> : vector<32x16xf32>
    %108 = tpu.matmul %107, %105, %cst_41 {dimension_numbers = #tpu.dot_dimension_numbers<[1], [0], [0], [1], [0, 0, 1, 1], [], []>} : vector<32x32xf32>, vector<32x16xf32>, vector<32x16xf32> -> vector<32x16xf32>
    %c0_42 = arith.constant 0 : index
    %c0_43 = arith.constant 0 : index
    %c0_44 = arith.constant 0 : index
    %109 = vector.load %arg7[%c0_42, %c0_43, %c0_44] : memref<2x32x1xf32, #tpu.memory_space<vmem>>, vector<1x32x1xf32>
    %110 = vector.shape_cast %109 : vector<1x32x1xf32> to vector<32x1xf32>
    %111 = vector.broadcast %110 : vector<32x1xf32> to vector<32x16xf32>
    %112 = arith.addf %108, %111 : vector<32x16xf32>
    %113 = arith.addf %25, %112 : vector<32x16xf32>
    %c0_45 = arith.constant 0 : index
    %c0_46 = arith.constant 0 : index
    %c0_47 = arith.constant 0 : index
    %114 = vector.load %arg8[%c0_45, %c0_46, %c0_47] : memref<2x32x1xf32, #tpu.memory_space<vmem>>, vector<1x32x1xf32>
    %115 = vector.shape_cast %114 : vector<1x32x1xf32> to vector<32x1xf32>
    %c0_48 = arith.constant 0 : index
    %c0_49 = arith.constant 0 : index
    %c0_50 = arith.constant 0 : index
    %116 = vector.load %arg9[%c0_48, %c0_49, %c0_50] : memref<2x32x1xf32, #tpu.memory_space<vmem>>, vector<1x32x1xf32>
    %117 = vector.shape_cast %116 : vector<1x32x1xf32> to vector<32x1xf32>
    %cst_51 = arith.constant dense<0.000000e+00> : vector<16xf32>
    %118 = vector.multi_reduction <add>, %113, %cst_51 [0] : vector<32x16xf32> to vector<16xf32>
    %119 = vector.shape_cast %118 : vector<16xf32> to vector<1x16xf32>
    %cst_52 = arith.constant 3.200000e+01 : f32
    %120 = vector.broadcast %cst_52 : f32 to vector<1x16xf32>
    %121 = arith.divf %119, %120 : vector<1x16xf32>
    %122 = vector.broadcast %121 : vector<1x16xf32> to vector<32x16xf32>
    %123 = arith.subf %113, %122 : vector<32x16xf32>
    %124 = arith.mulf %123, %123 : vector<32x16xf32>
    %cst_53 = arith.constant dense<0.000000e+00> : vector<16xf32>
    %125 = vector.multi_reduction <add>, %124, %cst_53 [0] : vector<32x16xf32> to vector<16xf32>
    %126 = vector.shape_cast %125 : vector<16xf32> to vector<1x16xf32>
    %cst_54 = arith.constant 3.200000e+01 : f32
    %127 = vector.broadcast %cst_54 : f32 to vector<1x16xf32>
    %128 = arith.divf %126, %127 : vector<1x16xf32>
    %129 = vector.broadcast %121 : vector<1x16xf32> to vector<32x16xf32>
    %130 = arith.subf %113, %129 : vector<32x16xf32>
    %cst_55 = arith.constant 9.99999996E-13 : f32
    %131 = vector.broadcast %cst_55 : f32 to vector<1x16xf32>
    %132 = arith.addf %128, %131 : vector<1x16xf32>
    %133 = math.rsqrt %132 : vector<1x16xf32>
    %134 = vector.broadcast %133 : vector<1x16xf32> to vector<32x16xf32>
    %135 = arith.mulf %130, %134 : vector<32x16xf32>
    %136 = vector.broadcast %115 : vector<32x1xf32> to vector<32x16xf32>
    %137 = arith.mulf %135, %136 : vector<32x16xf32>
    %138 = vector.broadcast %117 : vector<32x1xf32> to vector<32x16xf32>
    %139 = arith.addf %137, %138 : vector<32x16xf32>
    %c0_56 = arith.constant 0 : index
    %c0_57 = arith.constant 0 : index
    %c0_58 = arith.constant 0 : index
    %140 = vector.load %arg10[%c0_56, %c0_57, %c0_58] : memref<2x64x32xf32, #tpu.memory_space<vmem>>, vector<1x64x32xf32>
    %141 = vector.shape_cast %140 : vector<1x64x32xf32> to vector<64x32xf32>
    %cst_59 = arith.constant dense<0.000000e+00> : vector<64x16xf32>
    %142 = tpu.matmul %141, %139, %cst_59 {dimension_numbers = #tpu.dot_dimension_numbers<[1], [0], [0], [1], [0, 0, 1, 1], [], []>} : vector<64x32xf32>, vector<32x16xf32>, vector<64x16xf32> -> vector<64x16xf32>
    %c0_60 = arith.constant 0 : index
    %c0_61 = arith.constant 0 : index
    %c0_62 = arith.constant 0 : index
    %143 = vector.load %arg11[%c0_60, %c0_61, %c0_62] : memref<2x64x1xf32, #tpu.memory_space<vmem>>, vector<1x64x1xf32>
    %144 = vector.shape_cast %143 : vector<1x64x1xf32> to vector<64x1xf32>
    %145 = vector.broadcast %144 : vector<64x1xf32> to vector<64x16xf32>
    %146 = arith.addf %142, %145 : vector<64x16xf32>
    %cst_63 = arith.constant 5.000000e-01 : f32
    %147 = vector.broadcast %cst_63 : f32 to vector<64x16xf32>
    %148 = arith.mulf %147, %146 : vector<64x16xf32>
    %cst_64 = arith.constant 4.471500e-02 : f32
    %149 = vector.broadcast %cst_64 : f32 to vector<64x16xf32>
    %150 = arith.mulf %149, %146 : vector<64x16xf32>
    %151 = arith.mulf %150, %146 : vector<64x16xf32>
    %152 = arith.mulf %151, %146 : vector<64x16xf32>
    %153 = arith.addf %146, %152 : vector<64x16xf32>
    %cst_65 = arith.constant 0.797884583 : f32
    %154 = vector.broadcast %cst_65 : f32 to vector<64x16xf32>
    %155 = arith.mulf %154, %153 : vector<64x16xf32>
    %156 = math.tanh %155 : vector<64x16xf32>
    %cst_66 = arith.constant 1.000000e+00 : f32
    %157 = vector.broadcast %cst_66 : f32 to vector<64x16xf32>
    %158 = arith.addf %157, %156 : vector<64x16xf32>
    %159 = arith.mulf %148, %158 : vector<64x16xf32>
    %c0_67 = arith.constant 0 : index
    %c0_68 = arith.constant 0 : index
    %c0_69 = arith.constant 0 : index
    %160 = vector.load %arg12[%c0_67, %c0_68, %c0_69] : memref<2x32x64xf32, #tpu.memory_space<vmem>>, vector<1x32x64xf32>
    %161 = vector.shape_cast %160 : vector<1x32x64xf32> to vector<32x64xf32>
    %cst_70 = arith.constant dense<0.000000e+00> : vector<32x16xf32>
    %162 = tpu.matmul %161, %159, %cst_70 {dimension_numbers = #tpu.dot_dimension_numbers<[1], [0], [0], [1], [0, 0, 1, 1], [], []>} : vector<32x64xf32>, vector<64x16xf32>, vector<32x16xf32> -> vector<32x16xf32>
    %c0_71 = arith.constant 0 : index
    %c0_72 = arith.constant 0 : index
    %c0_73 = arith.constant 0 : index
    %163 = vector.load %arg13[%c0_71, %c0_72, %c0_73] : memref<2x32x1xf32, #tpu.memory_space<vmem>>, vector<1x32x1xf32>
    %164 = vector.shape_cast %163 : vector<1x32x1xf32> to vector<32x1xf32>
    %165 = vector.broadcast %164 : vector<32x1xf32> to vector<32x16xf32>
    %166 = arith.addf %162, %165 : vector<32x16xf32>
    %167 = arith.addf %139, %166 : vector<32x16xf32>
    %c0_74 = arith.constant 0 : index
    %c0_75 = arith.constant 0 : index
    %c0_76 = arith.constant 0 : index
    %168 = vector.load %arg14[%c0_74, %c0_75, %c0_76] : memref<2x32x1xf32, #tpu.memory_space<vmem>>, vector<1x32x1xf32>
    %169 = vector.shape_cast %168 : vector<1x32x1xf32> to vector<32x1xf32>
    %c0_77 = arith.constant 0 : index
    %c0_78 = arith.constant 0 : index
    %c0_79 = arith.constant 0 : index
    %170 = vector.load %arg15[%c0_77, %c0_78, %c0_79] : memref<2x32x1xf32, #tpu.memory_space<vmem>>, vector<1x32x1xf32>
    %171 = vector.shape_cast %170 : vector<1x32x1xf32> to vector<32x1xf32>
    %cst_80 = arith.constant dense<0.000000e+00> : vector<16xf32>
    %172 = vector.multi_reduction <add>, %167, %cst_80 [0] : vector<32x16xf32> to vector<16xf32>
    %173 = vector.shape_cast %172 : vector<16xf32> to vector<1x16xf32>
    %cst_81 = arith.constant 3.200000e+01 : f32
    %174 = vector.broadcast %cst_81 : f32 to vector<1x16xf32>
    %175 = arith.divf %173, %174 : vector<1x16xf32>
    %176 = vector.broadcast %175 : vector<1x16xf32> to vector<32x16xf32>
    %177 = arith.subf %167, %176 : vector<32x16xf32>
    %178 = arith.mulf %177, %177 : vector<32x16xf32>
    %cst_82 = arith.constant dense<0.000000e+00> : vector<16xf32>
    %179 = vector.multi_reduction <add>, %178, %cst_82 [0] : vector<32x16xf32> to vector<16xf32>
    %180 = vector.shape_cast %179 : vector<16xf32> to vector<1x16xf32>
    %cst_83 = arith.constant 3.200000e+01 : f32
    %181 = vector.broadcast %cst_83 : f32 to vector<1x16xf32>
    %182 = arith.divf %180, %181 : vector<1x16xf32>
    %183 = vector.broadcast %175 : vector<1x16xf32> to vector<32x16xf32>
    %184 = arith.subf %167, %183 : vector<32x16xf32>
    %cst_84 = arith.constant 9.99999996E-13 : f32
    %185 = vector.broadcast %cst_84 : f32 to vector<1x16xf32>
    %186 = arith.addf %182, %185 : vector<1x16xf32>
    %187 = math.rsqrt %186 : vector<1x16xf32>
    %188 = vector.broadcast %187 : vector<1x16xf32> to vector<32x16xf32>
    %189 = arith.mulf %184, %188 : vector<32x16xf32>
    %190 = vector.broadcast %169 : vector<32x1xf32> to vector<32x16xf32>
    %191 = arith.mulf %189, %190 : vector<32x16xf32>
    %192 = vector.broadcast %171 : vector<32x1xf32> to vector<32x16xf32>
    %193 = arith.addf %191, %192 : vector<32x16xf32>
    %c1 = arith.constant 1 : index
    %c0_85 = arith.constant 0 : index
    %c0_86 = arith.constant 0 : index
    %194 = vector.load %arg4[%c1, %c0_85, %c0_86] : memref<2x96x32xf32, #tpu.memory_space<vmem>>, vector<1x96x32xf32>
    %195 = vector.shape_cast %194 : vector<1x96x32xf32> to vector<96x32xf32>
    %cst_87 = arith.constant dense<0.000000e+00> : vector<96x16xf32>
    %196 = tpu.matmul %195, %193, %cst_87 {dimension_numbers = #tpu.dot_dimension_numbers<[1], [0], [0], [1], [0, 0, 1, 1], [], []>} : vector<96x32xf32>, vector<32x16xf32>, vector<96x16xf32> -> vector<96x16xf32>
    %c1_88 = arith.constant 1 : index
    %c0_89 = arith.constant 0 : index
    %c0_90 = arith.constant 0 : index
    %197 = vector.load %arg5[%c1_88, %c0_89, %c0_90] : memref<2x96x1xf32, #tpu.memory_space<vmem>>, vector<1x96x1xf32>
    %198 = vector.shape_cast %197 : vector<1x96x1xf32> to vector<96x1xf32>
    %199 = vector.broadcast %198 : vector<96x1xf32> to vector<96x16xf32>
    %200 = arith.addf %196, %199 : vector<96x16xf32>
    %201 = vector.extract_strided_slice %200 {offsets = [0, 0], sizes = [8, 16], strides = [1, 1]} : vector<96x16xf32> to vector<8x16xf32>
    %202 = vector.extract_strided_slice %200 {offsets = [32, 0], sizes = [8, 16], strides = [1, 1]} : vector<96x16xf32> to vector<8x16xf32>
    %203 = vector.extract_strided_slice %200 {offsets = [64, 0], sizes = [8, 16], strides = [1, 1]} : vector<96x16xf32> to vector<8x16xf32>
    %cst_91 = arith.constant dense<0.000000e+00> : vector<16x16xf32>
    %204 = tpu.matmul %201, %202, %cst_91 {dimension_numbers = #tpu.dot_dimension_numbers<[0], [0], [1], [1], [0, 1, 1, 1], [], []>} : vector<8x16xf32>, vector<8x16xf32>, vector<16x16xf32> -> vector<16x16xf32>
    %cst_92 = arith.constant 0.353553385 : f32
    %205 = vector.broadcast %cst_92 : f32 to vector<16x16xf32>
    %206 = arith.mulf %204, %205 : vector<16x16xf32>
    %207 = arith.addf %206, %1 : vector<16x16xf32>
    %cst_93 = arith.constant dense<0xFF800000> : vector<16xf32>
    %208 = vector.multi_reduction <maximumf>, %207, %cst_93 [1] : vector<16x16xf32> to vector<16xf32>
    %209 = vector.shape_cast %208 : vector<16xf32> to vector<16x1xf32>
    %210 = vector.broadcast %209 : vector<16x1xf32> to vector<16x16xf32>
    %211 = arith.subf %207, %210 : vector<16x16xf32>
    %212 = math.exp %211 : vector<16x16xf32>
    %cst_94 = arith.constant dense<0.000000e+00> : vector<16xf32>
    %213 = vector.multi_reduction <add>, %212, %cst_94 [1] : vector<16x16xf32> to vector<16xf32>
    %214 = vector.shape_cast %213 : vector<16xf32> to vector<16x1xf32>
    %215 = tpu.reciprocal %214 {approx = true} : vector<16x1xf32> -> vector<16x1xf32>
    %216 = vector.broadcast %215 : vector<16x1xf32> to vector<16x16xf32>
    %217 = arith.mulf %212, %216 : vector<16x16xf32>
    %cst_95 = arith.constant dense<0.000000e+00> : vector<8x16xf32>
    %218 = tpu.matmul %203, %217, %cst_95 {dimension_numbers = #tpu.dot_dimension_numbers<[1], [1], [0], [0], [0, 0, 1, 0], [], []>} : vector<8x16xf32>, vector<16x16xf32>, vector<8x16xf32> -> vector<8x16xf32>
    %219 = vector.extract_strided_slice %200 {offsets = [8, 0], sizes = [8, 16], strides = [1, 1]} : vector<96x16xf32> to vector<8x16xf32>
    %220 = vector.extract_strided_slice %200 {offsets = [40, 0], sizes = [8, 16], strides = [1, 1]} : vector<96x16xf32> to vector<8x16xf32>
    %221 = vector.extract_strided_slice %200 {offsets = [72, 0], sizes = [8, 16], strides = [1, 1]} : vector<96x16xf32> to vector<8x16xf32>
    %cst_96 = arith.constant dense<0.000000e+00> : vector<16x16xf32>
    %222 = tpu.matmul %219, %220, %cst_96 {dimension_numbers = #tpu.dot_dimension_numbers<[0], [0], [1], [1], [0, 1, 1, 1], [], []>} : vector<8x16xf32>, vector<8x16xf32>, vector<16x16xf32> -> vector<16x16xf32>
    %cst_97 = arith.constant 0.353553385 : f32
    %223 = vector.broadcast %cst_97 : f32 to vector<16x16xf32>
    %224 = arith.mulf %222, %223 : vector<16x16xf32>
    %225 = arith.addf %224, %1 : vector<16x16xf32>
    %cst_98 = arith.constant dense<0xFF800000> : vector<16xf32>
    %226 = vector.multi_reduction <maximumf>, %225, %cst_98 [1] : vector<16x16xf32> to vector<16xf32>
    %227 = vector.shape_cast %226 : vector<16xf32> to vector<16x1xf32>
    %228 = vector.broadcast %227 : vector<16x1xf32> to vector<16x16xf32>
    %229 = arith.subf %225, %228 : vector<16x16xf32>
    %230 = math.exp %229 : vector<16x16xf32>
    %cst_99 = arith.constant dense<0.000000e+00> : vector<16xf32>
    %231 = vector.multi_reduction <add>, %230, %cst_99 [1] : vector<16x16xf32> to vector<16xf32>
    %232 = vector.shape_cast %231 : vector<16xf32> to vector<16x1xf32>
    %233 = tpu.reciprocal %232 {approx = true} : vector<16x1xf32> -> vector<16x1xf32>
    %234 = vector.broadcast %233 : vector<16x1xf32> to vector<16x16xf32>
    %235 = arith.mulf %230, %234 : vector<16x16xf32>
    %cst_100 = arith.constant dense<0.000000e+00> : vector<8x16xf32>
    %236 = tpu.matmul %221, %235, %cst_100 {dimension_numbers = #tpu.dot_dimension_numbers<[1], [1], [0], [0], [0, 0, 1, 0], [], []>} : vector<8x16xf32>, vector<16x16xf32>, vector<8x16xf32> -> vector<8x16xf32>
    %237 = vector.extract_strided_slice %200 {offsets = [16, 0], sizes = [8, 16], strides = [1, 1]} : vector<96x16xf32> to vector<8x16xf32>
    %238 = vector.extract_strided_slice %200 {offsets = [48, 0], sizes = [8, 16], strides = [1, 1]} : vector<96x16xf32> to vector<8x16xf32>
    %239 = vector.extract_strided_slice %200 {offsets = [80, 0], sizes = [8, 16], strides = [1, 1]} : vector<96x16xf32> to vector<8x16xf32>
    %cst_101 = arith.constant dense<0.000000e+00> : vector<16x16xf32>
    %240 = tpu.matmul %237, %238, %cst_101 {dimension_numbers = #tpu.dot_dimension_numbers<[0], [0], [1], [1], [0, 1, 1, 1], [], []>} : vector<8x16xf32>, vector<8x16xf32>, vector<16x16xf32> -> vector<16x16xf32>
    %cst_102 = arith.constant 0.353553385 : f32
    %241 = vector.broadcast %cst_102 : f32 to vector<16x16xf32>
    %242 = arith.mulf %240, %241 : vector<16x16xf32>
    %243 = arith.addf %242, %1 : vector<16x16xf32>
    %cst_103 = arith.constant dense<0xFF800000> : vector<16xf32>
    %244 = vector.multi_reduction <maximumf>, %243, %cst_103 [1] : vector<16x16xf32> to vector<16xf32>
    %245 = vector.shape_cast %244 : vector<16xf32> to vector<16x1xf32>
    %246 = vector.broadcast %245 : vector<16x1xf32> to vector<16x16xf32>
    %247 = arith.subf %243, %246 : vector<16x16xf32>
    %248 = math.exp %247 : vector<16x16xf32>
    %cst_104 = arith.constant dense<0.000000e+00> : vector<16xf32>
    %249 = vector.multi_reduction <add>, %248, %cst_104 [1] : vector<16x16xf32> to vector<16xf32>
    %250 = vector.shape_cast %249 : vector<16xf32> to vector<16x1xf32>
    %251 = tpu.reciprocal %250 {approx = true} : vector<16x1xf32> -> vector<16x1xf32>
    %252 = vector.broadcast %251 : vector<16x1xf32> to vector<16x16xf32>
    %253 = arith.mulf %248, %252 : vector<16x16xf32>
    %cst_105 = arith.constant dense<0.000000e+00> : vector<8x16xf32>
    %254 = tpu.matmul %239, %253, %cst_105 {dimension_numbers = #tpu.dot_dimension_numbers<[1], [1], [0], [0], [0, 0, 1, 0], [], []>} : vector<8x16xf32>, vector<16x16xf32>, vector<8x16xf32> -> vector<8x16xf32>
    %255 = vector.extract_strided_slice %200 {offsets = [24, 0], sizes = [8, 16], strides = [1, 1]} : vector<96x16xf32> to vector<8x16xf32>
    %256 = vector.extract_strided_slice %200 {offsets = [56, 0], sizes = [8, 16], strides = [1, 1]} : vector<96x16xf32> to vector<8x16xf32>
    %257 = vector.extract_strided_slice %200 {offsets = [88, 0], sizes = [8, 16], strides = [1, 1]} : vector<96x16xf32> to vector<8x16xf32>
    %cst_106 = arith.constant dense<0.000000e+00> : vector<16x16xf32>
    %258 = tpu.matmul %255, %256, %cst_106 {dimension_numbers = #tpu.dot_dimension_numbers<[0], [0], [1], [1], [0, 1, 1, 1], [], []>} : vector<8x16xf32>, vector<8x16xf32>, vector<16x16xf32> -> vector<16x16xf32>
    %cst_107 = arith.constant 0.353553385 : f32
    %259 = vector.broadcast %cst_107 : f32 to vector<16x16xf32>
    %260 = arith.mulf %258, %259 : vector<16x16xf32>
    %261 = arith.addf %260, %1 : vector<16x16xf32>
    %cst_108 = arith.constant dense<0xFF800000> : vector<16xf32>
    %262 = vector.multi_reduction <maximumf>, %261, %cst_108 [1] : vector<16x16xf32> to vector<16xf32>
    %263 = vector.shape_cast %262 : vector<16xf32> to vector<16x1xf32>
    %264 = vector.broadcast %263 : vector<16x1xf32> to vector<16x16xf32>
    %265 = arith.subf %261, %264 : vector<16x16xf32>
    %266 = math.exp %265 : vector<16x16xf32>
    %cst_109 = arith.constant dense<0.000000e+00> : vector<16xf32>
    %267 = vector.multi_reduction <add>, %266, %cst_109 [1] : vector<16x16xf32> to vector<16xf32>
    %268 = vector.shape_cast %267 : vector<16xf32> to vector<16x1xf32>
    %269 = tpu.reciprocal %268 {approx = true} : vector<16x1xf32> -> vector<16x1xf32>
    %270 = vector.broadcast %269 : vector<16x1xf32> to vector<16x16xf32>
    %271 = arith.mulf %266, %270 : vector<16x16xf32>
    %cst_110 = arith.constant dense<0.000000e+00> : vector<8x16xf32>
    %272 = tpu.matmul %257, %271, %cst_110 {dimension_numbers = #tpu.dot_dimension_numbers<[1], [1], [0], [0], [0, 0, 1, 0], [], []>} : vector<8x16xf32>, vector<16x16xf32>, vector<8x16xf32> -> vector<8x16xf32>
    %273 = tpu.concatenate %218, %236, %254, %272 in 0 : vector<8x16xf32>, vector<8x16xf32>, vector<8x16xf32>, vector<8x16xf32> -> vector<32x16xf32>
    %c1_111 = arith.constant 1 : index
    %c0_112 = arith.constant 0 : index
    %c0_113 = arith.constant 0 : index
    %274 = vector.load %arg6[%c1_111, %c0_112, %c0_113] : memref<2x32x32xf32, #tpu.memory_space<vmem>>, vector<1x32x32xf32>
    %275 = vector.shape_cast %274 : vector<1x32x32xf32> to vector<32x32xf32>
    %cst_114 = arith.constant dense<0.000000e+00> : vector<32x16xf32>
    %276 = tpu.matmul %275, %273, %cst_114 {dimension_numbers = #tpu.dot_dimension_numbers<[1], [0], [0], [1], [0, 0, 1, 1], [], []>} : vector<32x32xf32>, vector<32x16xf32>, vector<32x16xf32> -> vector<32x16xf32>
    %c1_115 = arith.constant 1 : index
    %c0_116 = arith.constant 0 : index
    %c0_117 = arith.constant 0 : index
    %277 = vector.load %arg7[%c1_115, %c0_116, %c0_117] : memref<2x32x1xf32, #tpu.memory_space<vmem>>, vector<1x32x1xf32>
    %278 = vector.shape_cast %277 : vector<1x32x1xf32> to vector<32x1xf32>
    %279 = vector.broadcast %278 : vector<32x1xf32> to vector<32x16xf32>
    %280 = arith.addf %276, %279 : vector<32x16xf32>
    %281 = arith.addf %193, %280 : vector<32x16xf32>
    %c1_118 = arith.constant 1 : index
    %c0_119 = arith.constant 0 : index
    %c0_120 = arith.constant 0 : index
    %282 = vector.load %arg8[%c1_118, %c0_119, %c0_120] : memref<2x32x1xf32, #tpu.memory_space<vmem>>, vector<1x32x1xf32>
    %283 = vector.shape_cast %282 : vector<1x32x1xf32> to vector<32x1xf32>
    %c1_121 = arith.constant 1 : index
    %c0_122 = arith.constant 0 : index
    %c0_123 = arith.constant 0 : index
    %284 = vector.load %arg9[%c1_121, %c0_122, %c0_123] : memref<2x32x1xf32, #tpu.memory_space<vmem>>, vector<1x32x1xf32>
    %285 = vector.shape_cast %284 : vector<1x32x1xf32> to vector<32x1xf32>
    %cst_124 = arith.constant dense<0.000000e+00> : vector<16xf32>
    %286 = vector.multi_reduction <add>, %281, %cst_124 [0] : vector<32x16xf32> to vector<16xf32>
    %287 = vector.shape_cast %286 : vector<16xf32> to vector<1x16xf32>
    %cst_125 = arith.constant 3.200000e+01 : f32
    %288 = vector.broadcast %cst_125 : f32 to vector<1x16xf32>
    %289 = arith.divf %287, %288 : vector<1x16xf32>
    %290 = vector.broadcast %289 : vector<1x16xf32> to vector<32x16xf32>
    %291 = arith.subf %281, %290 : vector<32x16xf32>
    %292 = arith.mulf %291, %291 : vector<32x16xf32>
    %cst_126 = arith.constant dense<0.000000e+00> : vector<16xf32>
    %293 = vector.multi_reduction <add>, %292, %cst_126 [0] : vector<32x16xf32> to vector<16xf32>
    %294 = vector.shape_cast %293 : vector<16xf32> to vector<1x16xf32>
    %cst_127 = arith.constant 3.200000e+01 : f32
    %295 = vector.broadcast %cst_127 : f32 to vector<1x16xf32>
    %296 = arith.divf %294, %295 : vector<1x16xf32>
    %297 = vector.broadcast %289 : vector<1x16xf32> to vector<32x16xf32>
    %298 = arith.subf %281, %297 : vector<32x16xf32>
    %cst_128 = arith.constant 9.99999996E-13 : f32
    %299 = vector.broadcast %cst_128 : f32 to vector<1x16xf32>
    %300 = arith.addf %296, %299 : vector<1x16xf32>
    %301 = math.rsqrt %300 : vector<1x16xf32>
    %302 = vector.broadcast %301 : vector<1x16xf32> to vector<32x16xf32>
    %303 = arith.mulf %298, %302 : vector<32x16xf32>
    %304 = vector.broadcast %283 : vector<32x1xf32> to vector<32x16xf32>
    %305 = arith.mulf %303, %304 : vector<32x16xf32>
    %306 = vector.broadcast %285 : vector<32x1xf32> to vector<32x16xf32>
    %307 = arith.addf %305, %306 : vector<32x16xf32>
    %c1_129 = arith.constant 1 : index
    %c0_130 = arith.constant 0 : index
    %c0_131 = arith.constant 0 : index
    %308 = vector.load %arg10[%c1_129, %c0_130, %c0_131] : memref<2x64x32xf32, #tpu.memory_space<vmem>>, vector<1x64x32xf32>
    %309 = vector.shape_cast %308 : vector<1x64x32xf32> to vector<64x32xf32>
    %cst_132 = arith.constant dense<0.000000e+00> : vector<64x16xf32>
    %310 = tpu.matmul %309, %307, %cst_132 {dimension_numbers = #tpu.dot_dimension_numbers<[1], [0], [0], [1], [0, 0, 1, 1], [], []>} : vector<64x32xf32>, vector<32x16xf32>, vector<64x16xf32> -> vector<64x16xf32>
    %c1_133 = arith.constant 1 : index
    %c0_134 = arith.constant 0 : index
    %c0_135 = arith.constant 0 : index
    %311 = vector.load %arg11[%c1_133, %c0_134, %c0_135] : memref<2x64x1xf32, #tpu.memory_space<vmem>>, vector<1x64x1xf32>
    %312 = vector.shape_cast %311 : vector<1x64x1xf32> to vector<64x1xf32>
    %313 = vector.broadcast %312 : vector<64x1xf32> to vector<64x16xf32>
    %314 = arith.addf %310, %313 : vector<64x16xf32>
    %cst_136 = arith.constant 5.000000e-01 : f32
    %315 = vector.broadcast %cst_136 : f32 to vector<64x16xf32>
    %316 = arith.mulf %315, %314 : vector<64x16xf32>
    %cst_137 = arith.constant 4.471500e-02 : f32
    %317 = vector.broadcast %cst_137 : f32 to vector<64x16xf32>
    %318 = arith.mulf %317, %314 : vector<64x16xf32>
    %319 = arith.mulf %318, %314 : vector<64x16xf32>
    %320 = arith.mulf %319, %314 : vector<64x16xf32>
    %321 = arith.addf %314, %320 : vector<64x16xf32>
    %cst_138 = arith.constant 0.797884583 : f32
    %322 = vector.broadcast %cst_138 : f32 to vector<64x16xf32>
    %323 = arith.mulf %322, %321 : vector<64x16xf32>
    %324 = math.tanh %323 : vector<64x16xf32>
    %cst_139 = arith.constant 1.000000e+00 : f32
    %325 = vector.broadcast %cst_139 : f32 to vector<64x16xf32>
    %326 = arith.addf %325, %324 : vector<64x16xf32>
    %327 = arith.mulf %316, %326 : vector<64x16xf32>
    %c1_140 = arith.constant 1 : index
    %c0_141 = arith.constant 0 : index
    %c0_142 = arith.constant 0 : index
    %328 = vector.load %arg12[%c1_140, %c0_141, %c0_142] : memref<2x32x64xf32, #tpu.memory_space<vmem>>, vector<1x32x64xf32>
    %329 = vector.shape_cast %328 : vector<1x32x64xf32> to vector<32x64xf32>
    %cst_143 = arith.constant dense<0.000000e+00> : vector<32x16xf32>
    %330 = tpu.matmul %329, %327, %cst_143 {dimension_numbers = #tpu.dot_dimension_numbers<[1], [0], [0], [1], [0, 0, 1, 1], [], []>} : vector<32x64xf32>, vector<64x16xf32>, vector<32x16xf32> -> vector<32x16xf32>
    %c1_144 = arith.constant 1 : index
    %c0_145 = arith.constant 0 : index
    %c0_146 = arith.constant 0 : index
    %331 = vector.load %arg13[%c1_144, %c0_145, %c0_146] : memref<2x32x1xf32, #tpu.memory_space<vmem>>, vector<1x32x1xf32>
    %332 = vector.shape_cast %331 : vector<1x32x1xf32> to vector<32x1xf32>
    %333 = vector.broadcast %332 : vector<32x1xf32> to vector<32x16xf32>
    %334 = arith.addf %330, %333 : vector<32x16xf32>
    %335 = arith.addf %307, %334 : vector<32x16xf32>
    %c1_147 = arith.constant 1 : index
    %c0_148 = arith.constant 0 : index
    %c0_149 = arith.constant 0 : index
    %336 = vector.load %arg14[%c1_147, %c0_148, %c0_149] : memref<2x32x1xf32, #tpu.memory_space<vmem>>, vector<1x32x1xf32>
    %337 = vector.shape_cast %336 : vector<1x32x1xf32> to vector<32x1xf32>
    %c1_150 = arith.constant 1 : index
    %c0_151 = arith.constant 0 : index
    %c0_152 = arith.constant 0 : index
    %338 = vector.load %arg15[%c1_150, %c0_151, %c0_152] : memref<2x32x1xf32, #tpu.memory_space<vmem>>, vector<1x32x1xf32>
    %339 = vector.shape_cast %338 : vector<1x32x1xf32> to vector<32x1xf32>
    %cst_153 = arith.constant dense<0.000000e+00> : vector<16xf32>
    %340 = vector.multi_reduction <add>, %335, %cst_153 [0] : vector<32x16xf32> to vector<16xf32>
    %341 = vector.shape_cast %340 : vector<16xf32> to vector<1x16xf32>
    %cst_154 = arith.constant 3.200000e+01 : f32
    %342 = vector.broadcast %cst_154 : f32 to vector<1x16xf32>
    %343 = arith.divf %341, %342 : vector<1x16xf32>
    %344 = vector.broadcast %343 : vector<1x16xf32> to vector<32x16xf32>
    %345 = arith.subf %335, %344 : vector<32x16xf32>
    %346 = arith.mulf %345, %345 : vector<32x16xf32>
    %cst_155 = arith.constant dense<0.000000e+00> : vector<16xf32>
    %347 = vector.multi_reduction <add>, %346, %cst_155 [0] : vector<32x16xf32> to vector<16xf32>
    %348 = vector.shape_cast %347 : vector<16xf32> to vector<1x16xf32>
    %cst_156 = arith.constant 3.200000e+01 : f32
    %349 = vector.broadcast %cst_156 : f32 to vector<1x16xf32>
    %350 = arith.divf %348, %349 : vector<1x16xf32>
    %351 = vector.broadcast %343 : vector<1x16xf32> to vector<32x16xf32>
    %352 = arith.subf %335, %351 : vector<32x16xf32>
    %cst_157 = arith.constant 9.99999996E-13 : f32
    %353 = vector.broadcast %cst_157 : f32 to vector<1x16xf32>
    %354 = arith.addf %350, %353 : vector<1x16xf32>
    %355 = math.rsqrt %354 : vector<1x16xf32>
    %356 = vector.broadcast %355 : vector<1x16xf32> to vector<32x16xf32>
    %357 = arith.mulf %352, %356 : vector<32x16xf32>
    %358 = vector.broadcast %337 : vector<32x1xf32> to vector<32x16xf32>
    %359 = arith.mulf %357, %358 : vector<32x16xf32>
    %360 = vector.broadcast %339 : vector<32x1xf32> to vector<32x16xf32>
    %361 = arith.addf %359, %360 : vector<32x16xf32>
    %362 = vector.extract_strided_slice %361 {offsets = [0, 0], sizes = [32, 8], strides = [1, 1]} : vector<32x16xf32> to vector<32x8xf32>
    %cst_158 = arith.constant dense<0xFF800000> : vector<32xf32>
    %363 = vector.multi_reduction <maximumf>, %362, %cst_158 [1] : vector<32x8xf32> to vector<32xf32>
    %364 = vector.shape_cast %363 : vector<32xf32> to vector<32x1xf32>
    %c0_159 = arith.constant 0 : index
    %c0_160 = arith.constant 0 : index
    %365 = vector.load %arg16[%c0_159, %c0_160] : memref<32x128xf32, #tpu.memory_space<vmem>>, vector<32x128xf32>
    %cst_161 = arith.constant dense<0.000000e+00> : vector<1x128xf32>
    %366 = tpu.matmul %364, %365, %cst_161 {dimension_numbers = #tpu.dot_dimension_numbers<[0], [0], [1], [1], [0, 1, 1, 1], [], []>} : vector<32x1xf32>, vector<32x128xf32>, vector<1x128xf32> -> vector<1x128xf32>
    %c0_162 = arith.constant 0 : index
    %c0_163 = arith.constant 0 : index
    %367 = vector.load %arg17[%c0_162, %c0_163] : memref<1x128xf32, #tpu.memory_space<vmem>>, vector<1x128xf32>
    %368 = arith.addf %366, %367 : vector<1x128xf32>
    %c0_164 = arith.constant 0 : index
    %c0_165 = arith.constant 0 : index
    %369 = vector.load %arg18[%c0_164, %c0_165] : memref<2x128xf32, #tpu.memory_space<vmem>>, vector<1x128xf32>
    tpu.vector_store %arg18[%c0_164, %c0_165], %368 {strides = array<i32>} : memref<2x128xf32, #tpu.memory_space<vmem>>, vector<1x128xf32>,
    %370 = vector.extract_strided_slice %361 {offsets = [0, 8], sizes = [32, 8], strides = [1, 1]} : vector<32x16xf32> to vector<32x8xf32>
    %cst_166 = arith.constant dense<0xFF800000> : vector<32xf32>
    %371 = vector.multi_reduction <maximumf>, %370, %cst_166 [1] : vector<32x8xf32> to vector<32xf32>
    %372 = vector.shape_cast %371 : vector<32xf32> to vector<32x1xf32>
    %c0_167 = arith.constant 0 : index
    %c0_168 = arith.constant 0 : index
    %373 = vector.load %arg16[%c0_167, %c0_168] : memref<32x128xf32, #tpu.memory_space<vmem>>, vector<32x128xf32>
    %cst_169 = arith.constant dense<0.000000e+00> : vector<1x128xf32>
    %374 = tpu.matmul %372, %373, %cst_169 {dimension_numbers = #tpu.dot_dimension_numbers<[0], [0], [1], [1], [0, 1, 1, 1], [], []>} : vector<32x1xf32>, vector<32x128xf32>, vector<1x128xf32> -> vector<1x128xf32>
    %c0_170 = arith.constant 0 : index
    %c0_171 = arith.constant 0 : index
    %375 = vector.load %arg17[%c0_170, %c0_171] : memref<1x128xf32, #tpu.memory_space<vmem>>, vector<1x128xf32>
    %376 = arith.addf %374, %375 : vector<1x128xf32>
    %c1_172 = arith.constant 1 : index
    %c0_173 = arith.constant 0 : index
    %377 = vector.load %arg18[%c1_172, %c0_173] : memref<2x128xf32, #tpu.memory_space<vmem>>, vector<1x128xf32>
    tpu.vector_store %arg18[%c1_172, %c0_173], %376 {strides = array<i32>} : memref<2x128xf32, #tpu.memory_space<vmem>>, vector<1x128xf32>,
    return
  }
}

</mosaic_0001>

<bundles_post_ra>
// kernel: epid_bioelectra_forward.1
= control target key start
LH: loop header
LB: loop body
LE: loop exit
PB: predicated region body
PF: predicated region fallthrough
CT: control target
= control target key end

     0   :  { %s6077_s0 = inlined_call_operand.vmem [shape: f32[32,16], index: 0, kind: input, shape index: {}]   ;;  %s6078_s1 = inlined_call_operand.vmem [shape: f32[16,16], index: 1, kind: input, shape index: {}]   ;;  %s6079_s2 = inlined_call_operand.vmem [shape: f32[32,1], index: 2, kind: input, shape index: {}]   ;;  %s6080_s3 = inlined_call_operand.vmem [shape: f32[32,1], index: 3, kind: input, shape index: {}]   ;;  %s6081_s4 = inlined_call_operand.vmem [shape: f32[2,96,32], index: 4, kind: input, shape index: {}]   ;;  %s6082_s5 = inlined_call_operand.vmem [shape: f32[2,96,1], index: 5, kind: input, shape index: {}]   ;;  %s6083_s6 = inlined_call_operand.vmem [shape: f32[2,32,32], index: 6, kind: input, shape index: {}]   ;;  %s6084_s7 = inlined_call_operand.vmem [shape: f32[2,32,1], index: 7, kind: input, shape index: {}]   ;;  %s6085_s8 = inlined_call_operand.vmem [shape: f32[2,32,1], index: 8, kind: input, shape index: {}]   ;;  %s6086_s9 = inlined_call_operand.vmem [shape: f32[2,32,1], index: 9, kind: input, shape index: {}]   ;;  %s6087_s10 = inlined_call_operand.vmem [shape: f32[2,64,32], index: 10, kind: input, shape index: {}]   ;;  %s6088_s11 = inlined_call_operand.vmem [shape: f32[2,64,1], index: 11, kind: input, shape index: {}]   ;;  %s6089_s12 = inlined_call_operand.vmem [shape: f32[2,32,64], index: 12, kind: input, shape index: {}]   ;;  %s6090_s13 = inlined_call_operand.vmem [shape: f32[2,32,1], index: 13, kind: input, shape index: {}]   ;;  %s6091_s14 = inlined_call_operand.vmem [shape: f32[2,32,1], index: 14, kind: input, shape index: {}]   ;;  %s6092_s15 = inlined_call_operand.vmem [shape: f32[2,32,1], index: 15, kind: input, shape index: {}]   ;;  %s6093_s16 = inlined_call_operand.vmem [shape: f32[32,128], index: 16, kind: input, shape index: {}]   ;;  %s6094_s17 = inlined_call_operand.vmem [shape: f32[1,128], index: 17, kind: input, shape index: {}]   ;;  %s6095_s18 = inlined_call_operand.hbm [shape: f32[2,128], index: 18, kind: output, shape index: {}]  }
   0x1   :  { %6099 = sst [smem:[#allocation5_spill]] %s6077_s0 }
   0x2   :  { %6100 = sst [smem:[#allocation6_spill]] %s6078_s1 }
   0x3   :  { %6101 = sst [smem:[#allocation7_spill]] %s6079_s2 }
   0x4   :  { %v70_v0 = vld [vmem:[%s6080_s3] sm:$0xff]  ;;  %s6102_s0 = sld [smem:[#allocation7_spill]]  ;;  %v4967_v2 = vmov 0   ;;  %v71_v3 = vld [vmem:[%s6080_s3 + $0x8] sm:$0xff] }
   0x5   :  { %4834 = vset.pattern.permute.xlu1 %v4967_v2  ;;  %4833 = vset.pattern.permute.xlu0 %v4967_v2 }
   0x6   :  { %144 = vperm.xlu1 %4834, %v70_v0  }
   0xa   :  { %v66_v1 = vld [vmem:[%s6102_s0] sm:$0xff]  ;;  %v67_v4 = vld [vmem:[%s6102_s0 + $0x8] sm:$0xff] }
   0xb   :  { %120 = vperm.xlu0 %4833, %v66_v1  }
   0xc   :  { %23 = vsyncpa [#allocation3], 0  ;;  %149 = vperm.xlu1 %4834, %v71_v3   ;;  %v69_v5 = vld [vmem:[%s6102_s0 + $0x18] sm:$0xff]  ;;  %v68_v6 = vld [vmem:[%s6102_s0 + $0x10] sm:$0xff]  ;;  %vm74_vm0 = vcmask 130048   ;;  %s6103_s19 = sld [smem:[#allocation5_spill]] }
   0xd   :  { %v73_v7 = vld [vmem:[%s6080_s3 + $0x18] sm:$0xff]  ;;  %v72_v8 = vld [vmem:[%s6080_s3 + $0x10] sm:$0xff]  ;;  %v182_v11 = vld [vmem:[%s6082_s5 + $0x20] sm:$0xff]  ;;  %vm250_vm1 = vcmask 261120   ;;  %vm444_vm2 = vcmask 64512   ;;  %s6104_s1 = sld [smem:[#allocation6_spill]] }
   0xe   :  { %v178_v12 = vld [vmem:[%s6082_s5] sm:$0xff]  ;;  %vm4969_vm3 = vmmov 0   ;;  %vm5217_vm4 = vmpackc.low %vm74_vm0, %vm74_vm0  ;;  %vm1797_vm5 = vcmask 523264   ;;  %vm3960_vm6 = vcmask 130112   ;;  %s4971_s0 = smov [#allocation2]  }
   0xf   :  { %125 = vperm.xlu0 %4833, %v67_v4   ;;  %v166_v16 = vld [vmem:[%s6081_s4] sm:$0xff] }
  0x10   :  { %135 = vperm.xlu1 %4834, %v69_v5   ;;  %4430 = vmatprep.mubr.msk.f32.mxu0 %vm250_vm1, %v166_v16  ;;  %v171_v16 = vld [vmem:[%s6081_s4 + $0x28] sm:$0xff] }
  0x12   :  { %v60_v9 = vld [vmem:[%s6103_s19] sm:$0xff]  ;;  %v61_v10 = vld [vmem:[%s6103_s19 + $0x8] sm:$0xff]  ;;  %v62_v15 = vld [vmem:[%s6103_s19 + $0x10] sm:$0xff] }
  0x13   :  { %130 = vperm.xlu0 %4833, %v68_v6   ;;  %v75_v13 = vsel %vm74_vm0, %v60_v9, 0.0  ;;  %v76_v14 = vsel %vm74_vm0, %v61_v10, 0.0  ;;  %v78_v18 = vsel %vm74_vm0, %v62_v15, 0.0  ;;  %v63_v19 = vld [vmem:[%s6103_s19 + $0x18] sm:$0xff] }
  0x14   :  { %159 = vperm.xlu1 %4834, %v73_v7   ;;  %v77_v17 = vadd.f32 %v76_v14, %v75_v13  ;;  %v80_v21 = vsel %vm74_vm0, %v63_v19, 0.0  ;;  %v168_v13 = vld [vmem:[%s6081_s4 + $0x10] sm:$0xff]  ;;  %v169_v14 = vld [vmem:[%s6081_s4 + $0x18] sm:$0xff] }
  0x16   :  { %v79_v20 = vadd.f32 %v78_v18, %v77_v17 }
  0x17   :  { %154 = vperm.xlu0 %4833, %v72_v8  }
  0x18   :  { %212 = vperm.xlu1 %4834, %v182_v11   ;;  %v81_v22 = vadd.f32 %v80_v21, %v79_v20 }
  0x1a   :  { %v82_v23 = vrot.slane %v81_v22, 4 }
  0x1b   :  { %192 = vperm.xlu0 %4833, %v178_v12   ;;  %v167_v12 = vld [vmem:[%s6081_s4 + $0x8] sm:$0xff] }
  0x1c   :  { %v83_v24 = vadd.f32 %v82_v23, %v81_v22 }
  0x1e   :  { %v84_v25 = vrot.slane %v83_v24, 2 }
  0x20   :  { %v85_v26 = vadd.f32 %v84_v25, %v83_v24 }
  0x22   :  { %v86_v27 = vrot.slane %v85_v26, 1 }
  0x24   :  { %v87_v28 = vadd.f32 %v86_v27, %v85_v26 }
  0x26   :  { %v89_v29 = vmul.f32 0.03125, %v87_v28 }
  0x28   :  { %v90_v30 = vsub.f32 %v60_v9, %v89_v29  ;;  %v91_v31 = vsub.f32 %v61_v10, %v89_v29  ;;  %v92_v32 = vsub.f32 %v62_v15, %v89_v29  ;;  %v93_v35 = vsub.f32 %v63_v19, %v89_v29  ;;  %v170_v15 = vld [vmem:[%s6081_s4 + $0x20] sm:$0xff]  ;;  %v172_v29 = vld [vmem:[%s6081_s4 + $0x30] sm:$0xff] }
  0x2a   :  { %v94_v33 = vmul.f32 %v90_v30, %v90_v30  ;;  %v95_v34 = vmul.f32 %v91_v31, %v91_v31  ;;  %v96_v36 = vmul.f32 %v92_v32, %v92_v32  ;;  %v97_v40 = vmul.f32 %v93_v35, %v93_v35 }
  0x2c   :  { %v98_v37 = vsel %vm74_vm0, %v94_v33, 0.0  ;;  %v99_v38 = vsel %vm74_vm0, %v95_v34, 0.0  ;;  %v101_v41 = vsel %vm74_vm0, %v96_v36, 0.0  ;;  %v103_v43 = vsel %vm74_vm0, %v97_v40, 0.0  ;;  %v5182_v34 = vld [vmem:[%s6104_s1 + $0x8] sm:$0xff] }
  0x2d   :  { %v100_v39 = vadd.f32 %v99_v38, %v98_v37  ;;  %v5187_v37 = vld [vmem:[%s6104_s1] sm:$0xff] }
  0x2f   :  { %v102_v42 = vadd.f32 %v101_v41, %v100_v39 }
  0x31   :  { %v104_v44 = vadd.f32 %v103_v43, %v102_v42  ;;  %v179_v43 = vld [vmem:[%s6082_s5 + $0x8] sm:$0xff] }
  0x33   :  { %v105_v45 = vrot.slane %v104_v44, 4 }
  0x35   :  { %v106_v46 = vadd.f32 %v105_v45, %v104_v44 }
  0x37   :  { %v107_v47 = vrot.slane %v106_v46, 2 }
  0x39   :  { %v108_v48 = vadd.f32 %v107_v47, %v106_v46 }
  0x3b   :  { %v109_v49 = vrot.slane %v108_v48, 1 }
  0x3d   :  { %v110_v50 = vadd.f32 %v109_v49, %v108_v48 }
  0x3f   :  { %v111_v51 = vmul.f32 0.03125, %v110_v50 }
  0x41   :  { %v112_v52 = vadd.f32 1e-12, %v111_v51 }
  0x43   :  { %4835 = vrsqrt.f32 %v112_v52 }
  0x4d   :  { %v4836_v53 = vpop.eup %4835 }
  0x4e   :  { %v114_v54 = vmul.f32 %v4836_v53, %v90_v30  ;;  %v115_v57 = vmul.f32 %v4836_v53, %v91_v31  ;;  %v117_v63 = vmul.f32 %v4836_v53, %v93_v35  ;;  %v116_v0 = vmul.f32 %v4836_v53, %v92_v32  ;;  %v173_v30 = vld [vmem:[%s6081_s4 + $0x38] sm:$0xff]  ;;  %v174_v31 = vld [vmem:[%s6081_s4 + $0x40] sm:$0xff]  ;;  %v175_v32 = vld [vmem:[%s6081_s4 + $0x48] sm:$0xff] }
  0x85   :  { %v145_v55 = vpop.permute.xlu1 %144 }
  0x8a   :  { %v121_v56 = vpop.permute.xlu0 %120 }
  0x8b   :  { %v138_v58 = vmul.f32 %v121_v56, %v114_v54  ;;  %v150_v59 = vpop.permute.xlu1 %149  ;;  %v183_v54 = vld [vmem:[%s6082_s5 + $0x28] sm:$0xff]  ;;  %v186_v56 = vld [vmem:[%s6082_s5 + $0x40] sm:$0xff] }
  0x8d   :  { %v5121_v62 = vadd.f32 %v145_v55, %v138_v58 }
  0x8e   :  { %v126_v60 = vpop.permute.xlu0 %125 }
  0x8f   :  { %v139_v61 = vmul.f32 %v126_v60, %v115_v57  ;;  %v136_v2 = vpop.permute.xlu1 %135  ;;  %v4968_v60 = vmov 0.0|0.0  }
  0x90   :  { %v141_v5 = vmul.f32 %v136_v2, %v117_v63 }
  0x91   :  { %v5123_v1 = vadd.f32 %v150_v59, %v139_v61  ;;  %v4970_v61 = vmov 0.0  }
  0x92   :  { %v131_v3 = vpop.permute.xlu0 %130 }
  0x93   :  { %v4704_v4 = vpack.c.bf16 %v5123_v1, %v5121_v62  ;;  %v140_v6 = vmul.f32 %v131_v3, %v116_v0  ;;  %v160_v7 = vpop.permute.xlu1 %159 }
  0x94   :  { %v5127_v9 = vadd.f32 %v160_v7, %v141_v5 }
  0x95   :  { %4705 = vmatprep.subr.bf16.mxu0 %v4704_v4 }
  0x96   :  { %v155_v8 = vpop.permute.xlu0 %154  ;;  %4707 = vmatpush3.bf16.msra.mxu0 %v4704_v4 }
  0x97   :  { %v5129_v10 = vadd.f32 %v155_v8, %v140_v6  ;;  %v213_v24 = vpop.permute.xlu1 %212 }
  0x99   :  { %v4708_v11 = vpack.c.bf16 %v5127_v9, %v5129_v10 }
  0x9a   :  { %v193_v18 = vpop.permute.xlu0 %192 }
  0x9b   :  { %4709 = vmatprep.subr.bf16.mxu0 %v4708_v11 }
  0x9c   :  { %4711 = vmatpush3.bf16.msra.mxu0 %v4708_v11 }
  0x9d   :  { %4720 = vmatprep.subr.bf16.mxu0 %v4968_v60 }
  0x9f   :  { %4431 = vmatmul.mubr.msk.f32.vlgmr.msra.gmra.mrb[0].mxu0 %vm250_vm1, %v167_v12 }
  0xa0   :  { %4433 = vmatprep.mubr.msk.f32.mxu0 %vm250_vm1, %v168_v13 }
  0xa3   :  { %4434 = vmatmul.mubr.msk.f32.gmra.mrb[2].mxu0 %vm250_vm1, %v169_v14 }
  0xa4   :  { %4436 = vmatprep.mubr.msk.f32.mxu0 %vm250_vm1, %v170_v15 }
  0xa7   :  { %4437 = vmatmul.mubr.msk.f32.gmra.mrb[4].mxu0 %vm250_vm1, %v171_v16 }
  0xa8   :  { %4439 = vmatprep.mubr.msk.f32.mxu0 %vm250_vm1, %v172_v29 }
  0xab   :  { %4440 = vmatmul.mubr.msk.f32.gmra.mrb[6].mxu0 %vm250_vm1, %v173_v30  ;;  %v180_v30 = vld [vmem:[%s6082_s5 + $0x10] sm:$0xff] }
  0xac   :  { %4442 = vmatprep.mubr.msk.f32.mxu0 %vm250_vm1, %v174_v31  ;;  %v187_v31 = vld [vmem:[%s6082_s5 + $0x48] sm:$0xff] }
  0xaf   :  { %4443 = vmatmul.mubr.msk.f32.gmra.mrb[8].mxu0 %vm250_vm1, %v175_v32  ;;  %v181_v32 = vld [vmem:[%s6082_s5 + $0x18] sm:$0xff] }
 0x172   :  { %v5153_v17 = vpop.f32.mrb[0].mxu0 }
 0x173   :  { %v353_v19 = vpop.f32.mrb[1].mxu0 }
 0x174   :  { %v354_v20 = vadd.f32 %v353_v19, %v193_v18 }
 0x176   :  { %412 = vxpose.xlu0.b32.start.end [1/1] (short) (narrow) %v354_v20, 16  ;;  %v5155_v21 = vpop.f32.mrb[2].mxu0 }
 0x177   :  { %v5157_v22 = vpop.f32.mrb[3].mxu0 }
 0x17a   :  { %v5159_v23 = vpop.f32.mrb[4].mxu0 }
 0x17b   :  { %v373_v25 = vpop.f32.mrb[5].mxu0 }
 0x17c   :  { %v374_v26 = vadd.f32 %v373_v25, %v213_v24 }
 0x17e   :  { %4448 = vmatprep.subr.mxu1 %v374_v26  ;;  %v5201_v55 = vpop.f32.mrb[6].mxu0 }
 0x17f   :  { %4449 = vmatpush3.msra.mxu1 %v374_v26  ;;  %v5206_v57 = vpop.f32.mrb[7].mxu0 }
 0x180   :  { %4712 = vmatprep.subr.bf16.mxu1 %v4968_v60 }
 0x182   :  { %v5208_v58 = vpop.f32.mrb[8].mxu0 }
 0x183   :  { %v393_v59 = vpop.f32.mrb[9].mxu0 }
 0x1f6   :  { %v428_v27 = vpop.trf.xlu0 }
 0x1f7   :  { %4450 = vmatprep.mubr.msk.f32.mxu1 %vm444_vm2, %v428_v27 }
 0x1fa   :  { %v429_v28 = vpop.trf.xlu0 }
 0x1fb   :  { %4451 = vmatmul.mubr.msk.f32.vlgmr.msra.gmra.mrb[0].mxu1 %vm444_vm2, %v429_v28 }
 0x1fc   :  { %4457 = vmatprep.mubr.msk.f32.mxu1 %vm4969_vm3, %v4970_v61 }
 0x2ce   :  { %v4452_v33 = vpop.f32.mrb[0].mxu1 }
 0x2cf   :  { %v527_v35 = vmul.f32 0.35355338, %v4452_v33  ;;  %v517_v36 = vpop.f32.mrb[1].mxu1 }
 0x2d0   :  { %v526_v38 = vmul.f32 0.35355338, %v517_v36 }
 0x2d1   :  { %v529_v39 = vadd.f32 %v527_v35, %v5182_v34 }
 0x2d2   :  { %v528_v40 = vadd.f32 %v526_v38, %v5187_v37 }
 0x2d3   :  { %v533_v41 = vsel %vm74_vm0, %v529_v39, -inf }
 0x2d4   :  { %534 = vmax.xlane.f32.xlu0 %v533_v41  ;;  %v530_v42 = vsel %vm74_vm0, %v528_v40, -inf }
 0x2d5   :  { %531 = vmax.xlane.f32.xlu1 %v530_v42 }
 0x2e6   :  { %197 = vperm.xlu1 %4834, %v179_v43  }
 0x361   :  { %v535_v44 = vpop.xlane.xlu0 %534 }
 0x362   :  { %v537_v45 = vsub.f32 %v529_v39, %v535_v44  ;;  %v532_v46 = vpop.xlane.xlu1 %531 }
 0x363   :  { %v536_v47 = vsub.f32 %v528_v40, %v532_v46  ;;  %v185_v46 = vld [vmem:[%s6082_s5 + $0x38] sm:$0xff] }
 0x364   :  { %v540_v48 = vmul.f32 1.442695, %v537_v45  ;;  %v184_v45 = vld [vmem:[%s6082_s5 + $0x30] sm:$0xff] }
 0x365   :  { %v538_v49 = vmul.f32 1.442695, %v536_v47 }
 0x366   :  { %4837 = vpow2.f32 %v540_v48  ;;  %v198_v63 = vpop.permute.xlu1 %197 }
 0x367   :  { %4839 = vpow2.f32 %v538_v49  ;;  %v359_v0 = vadd.f32 %v5153_v17, %v198_v63 }
 0x370   :  { %v4838_v50 = vpop.eup %4837 }
 0x371   :  { %v4840_v51 = vpop.eup %4839  ;;  %v545_v52 = vsel %vm74_vm0, %v4838_v50, 0.0 }
 0x372   :  { %546 = vadd.xlane.f32.xlu0 %v545_v52  ;;  %v542_v53 = vsel %vm74_vm0, %v4840_v51, 0.0 }
 0x373   :  { %543 = vadd.xlane.f32.xlu1 %v542_v53 }
 0x384   :  { %217 = vperm.xlu1 %4834, %v183_v54  }
 0x388   :  { %232 = vperm.xlu0 %4833, %v186_v56  }
 0x3a6   :  { %631 = vxpose.xlu0.b32.start.end [1/1] (short) (narrow) %v359_v0, 16 }
 0x3ff   :  { %v547_v2 = vpop.xlane.xlu0 %546 }
 0x400   :  { %4841 = vrcp.f32 %v547_v2  ;;  %v544_v3 = vpop.xlane.xlu1 %543 }
 0x401   :  { %4843 = vrcp.f32 %v544_v3 }
 0x404   :  { %v218_v8 = vpop.permute.xlu1 %217 }
 0x405   :  { %v379_v13 = vadd.f32 %v5159_v23, %v218_v8 }
 0x407   :  { %v233_v14 = vpop.permute.xlu0 %232 }
 0x408   :  { %v394_v15 = vadd.f32 %v393_v59, %v233_v14 }
 0x40a   :  { %v4842_v4 = vpop.eup %4841 }
 0x40b   :  { %v4844_v5 = vpop.eup %4843  ;;  %v551_v6 = vmul.f32 %v4842_v4, %v4838_v50 }
 0x40c   :  { %v550_v7 = vmul.f32 %v4844_v5, %v4840_v51 }
 0x40e   :  { %v4713_v12 = vpack.c.bf16 %v551_v6, %v550_v7 }
 0x410   :  { %4715 = vmatpush3.bf16.xpose.msk.msra.mxu1 %vm5217_vm4, %v4713_v12 }
 0x411   :  { %4460 = vmatprep.subr.mxu1 %v379_v13 }
 0x417   :  { %4458 = vmatmul.mubr.msk.f32.vlgmr.msra.gmra.mrb[2].mxu1 %vm74_vm0, %v394_v15 }
 0x418   :  { %4461 = vmatpush3.msra.mxu1 %v379_v13 }
 0x419   :  { %4716 = vmatprep.subr.bf16.mxu1 %v4968_v60 }
 0x426   :  { %v647_v16 = vpop.trf.xlu0 }
 0x427   :  { %4462 = vmatprep.mubr.msk.f32.mxu1 %vm444_vm2, %v647_v16 }
 0x42a   :  { %v648_v17 = vpop.trf.xlu0 }
 0x42b   :  { %4463 = vmatmul.mubr.msk.f32.vlgmr.msra.gmra.mrb[4].mxu1 %vm444_vm2, %v648_v17 }
 0x42c   :  { %4469 = vmatprep.mubr.msk.f32.mxu1 %vm4969_vm3, %v4970_v61 }
 0x4ea   :  { %v5230_v18 = vpop.f32.mrb[2].mxu1 }
 0x4eb   :  { %v4459_v19 = vpop.f32.mrb[3].mxu1 }
 0x4fe   :  { %v4464_v20 = vpop.f32.mrb[4].mxu1 }
 0x4ff   :  { %v745_v23 = vmul.f32 0.35355338, %v4464_v20  ;;  %v735_v24 = vpop.f32.mrb[5].mxu1 }
 0x500   :  { %v744_v25 = vmul.f32 0.35355338, %v735_v24 }
 0x501   :  { %v747_v26 = vadd.f32 %v745_v23, %v5182_v34 }
 0x502   :  { %v746_v27 = vadd.f32 %v744_v25, %v5187_v37 }
 0x503   :  { %v751_v28 = vsel %vm74_vm0, %v747_v26, -inf }
 0x504   :  { %752 = vmax.xlane.f32.xlu0 %v751_v28  ;;  %v748_v29 = vsel %vm74_vm0, %v746_v27, -inf }
 0x505   :  { %749 = vmax.xlane.f32.xlu1 %v748_v29 }
 0x516   :  { %202 = vperm.xlu1 %4834, %v180_v30  }
 0x51a   :  { %237 = vperm.xlu0 %4833, %v187_v31   ;;  %207 = vperm.xlu1 %4834, %v181_v32  }
 0x591   :  { %v753_v33 = vpop.xlane.xlu0 %752 }
 0x592   :  { %v755_v35 = vsub.f32 %v747_v26, %v753_v33  ;;  %v750_v36 = vpop.xlane.xlu1 %749 }
 0x593   :  { %v754_v38 = vsub.f32 %v746_v27, %v750_v36 }
 0x594   :  { %v758_v39 = vmul.f32 1.442695, %v755_v35 }
 0x595   :  { %v756_v40 = vmul.f32 1.442695, %v754_v38 }
 0x596   :  { %4845 = vpow2.f32 %v758_v39  ;;  %v203_v47 = vpop.permute.xlu1 %202 }
 0x597   :  { %4847 = vpow2.f32 %v756_v40  ;;  %v364_v48 = vadd.f32 %v5157_v22, %v203_v47 }
 0x599   :  { %v238_v51 = vpop.permute.xlu0 %237 }
 0x59a   :  { %v208_v49 = vpop.permute.xlu1 %207 }
 0x59b   :  { %v369_v50 = vadd.f32 %v5155_v21, %v208_v49  ;;  %v399_v21 = vadd.f32 %v5208_v58, %v238_v51  ;;  %v177_v58 = vld [vmem:[%s6081_s4 + $0x58] sm:$0xff] }
 0x5a0   :  { %v4846_v41 = vpop.eup %4845 }
 0x5a1   :  { %v4848_v42 = vpop.eup %4847  ;;  %v763_v43 = vsel %vm74_vm0, %v4846_v41, 0.0 }
 0x5a2   :  { %764 = vadd.xlane.f32.xlu0 %v763_v43  ;;  %v760_v44 = vsel %vm74_vm0, %v4848_v42, 0.0 }
 0x5a3   :  { %761 = vadd.xlane.f32.xlu1 %v760_v44 }
 0x5b4   :  { %222 = vperm.xlu1 %4834, %v184_v45  }
 0x5b8   :  { %227 = vperm.xlu0 %4833, %v185_v46  }
 0x5d6   :  { %849 = vxpose.xlu0.b32.start.end [1/1] (short) (narrow) %v364_v48, 16 }
 0x5dd   :  { %1067 = vxpose.xlu1.b32.start.end [1/1] (short) (narrow) %v369_v50, 16 }
 0x62f   :  { %v765_v52 = vpop.xlane.xlu0 %764 }
 0x630   :  { %4849 = vrcp.f32 %v765_v52  ;;  %v762_v53 = vpop.xlane.xlu1 %761  ;;  %v188_v52 = vld [vmem:[%s6082_s5 + $0x50] sm:$0xff] }
 0x631   :  { %4851 = vrcp.f32 %v762_v53 }
 0x634   :  { %v223_v0 = vpop.permute.xlu1 %222 }
 0x635   :  { %v384_v3 = vadd.f32 %v5206_v57, %v223_v0  ;;  %v1292_v0 = vld [vmem:[%s6084_s7 + $0x18] sm:$0xff] }
 0x637   :  { %v228_v22 = vpop.permute.xlu0 %227 }
 0x638   :  { %v389_v4 = vadd.f32 %v5201_v55, %v228_v22  ;;  %v176_v55 = vld [vmem:[%s6081_s4 + $0x50] sm:$0xff]  ;;  %v1414_v22 = vld [vmem:[%s6085_s8] sm:$0xff] }
 0x639   :  { %4445 = vmatprep.mubr.msk.f32.mxu0 %vm250_vm1, %v176_v55  ;;  %v1521_v55 = vld [vmem:[%s6088_s11 + $0x8] sm:$0xff] }
 0x63a   :  { %v4850_v54 = vpop.eup %4849  ;;  %4446 = vmatmul.mubr.msk.f32.gmra.mrb[10].mxu0 %vm250_vm1, %v177_v58  ;;  %v1520_v58 = vld [vmem:[%s6088_s11] sm:$0xff] }
 0x63b   :  { %v4852_v56 = vpop.eup %4851  ;;  %v769_v59 = vmul.f32 %v4850_v54, %v4846_v41  ;;  %4481 = vmatprep.mubr.msk.f32.mxu0 %vm4969_vm3, %v4970_v61  ;;  %v1289_v54 = vld [vmem:[%s6084_s7] sm:$0xff] }
 0x63c   :  { %v768_v63 = vmul.f32 %v4852_v56, %v4848_v42 }
 0x63e   :  { %v4717_v2 = vpack.c.bf16 %v769_v59, %v768_v63  ;;  %v1290_v59 = vld [vmem:[%s6084_s7 + $0x8] sm:$0xff]  ;;  %v189_v63 = vld [vmem:[%s6082_s5 + $0x58] sm:$0xff] }
 0x640   :  { %4719 = vmatpush3.bf16.xpose.msk.msra.mxu1 %vm5217_vm4, %v4717_v2  ;;  %v1291_v2 = vld [vmem:[%s6084_s7 + $0x10] sm:$0xff] }
 0x641   :  { %4472 = vmatprep.subr.mxu1 %v384_v3 }
 0x647   :  { %4470 = vmatmul.mubr.msk.f32.vlgmr.msra.gmra.mrb[6].mxu1 %vm74_vm0, %v399_v21  ;;  %v1419_v21 = vld [vmem:[%s6086_s9 + $0x8] sm:$0xff] }
 0x648   :  { %4473 = vmatpush3.msra.mxu1 %v384_v3  ;;  %v1415_v3 = vld [vmem:[%s6085_s8 + $0x8] sm:$0xff] }
 0x649   :  { %4484 = vmatprep.subr.mxu1 %v389_v4 }
 0x656   :  { %v865_v5 = vpop.trf.xlu0 }
 0x657   :  { %4474 = vmatprep.mubr.msk.f32.mxu1 %vm444_vm2, %v865_v5  ;;  %v1417_v5 = vld [vmem:[%s6085_s8 + $0x18] sm:$0xff] }
 0x65a   :  { %v866_v6 = vpop.trf.xlu0 }
 0x65b   :  { %4475 = vmatmul.mubr.msk.f32.vlgmr.msra.gmra.mrb[8].mxu1 %vm444_vm2, %v866_v6  ;;  %v1416_v6 = vld [vmem:[%s6085_s8 + $0x10] sm:$0xff] }
 0x65c   :  { %4485 = vmatpush3.msra.mxu1 %v389_v4  ;;  %v1418_v4 = vld [vmem:[%s6086_s9] sm:$0xff] }
 0x65d   :  { %v1083_v57 = vpop.trf.xlu1  ;;  %4724 = vmatprep.subr.bf16.mxu1 %v4968_v60 }
 0x65e   :  { %4486 = vmatprep.mubr.msk.f32.mxu1 %vm444_vm2, %v1083_v57  ;;  %v1421_v57 = vld [vmem:[%s6086_s9 + $0x18] sm:$0xff] }
 0x661   :  { %v1084_v7 = vpop.trf.xlu1 }
 0x662   :  { %4487 = vmatmul.mubr.msk.f32.vlgmr.msra.gmra.mrb[10].mxu1 %vm444_vm2, %v1084_v7  ;;  %v1420_v7 = vld [vmem:[%s6086_s9 + $0x10] sm:$0xff] }
 0x663   :  { %4493 = vmatprep.mubr.msk.f32.mxu1 %vm4969_vm3, %v4970_v61 }
 0x70d   :  { %v5308_v53 = vpop.f32.mrb[10].mxu0 }
 0x70e   :  { %v5313_v56 = vpop.f32.mrb[11].mxu0 }
 0x71a   :  { %v845_v8 = vpop.f32.mrb[6].mxu1 }
 0x71b   :  { %v5279_v12 = vpack.c.bf16 %v845_v8, %v5230_v18  ;;  %v4471_v13 = vpop.f32.mrb[7].mxu1  ;;  %v1523_v8 = vld [vmem:[%s6088_s11 + $0x18] sm:$0xff] }
 0x71c   :  { %v1522_v13 = vld [vmem:[%s6088_s11 + $0x10] sm:$0xff] }
 0x72e   :  { %v4476_v14 = vpop.f32.mrb[8].mxu1 }
 0x72f   :  { %v963_v15 = vmul.f32 0.35355338, %v4476_v14  ;;  %v953_v16 = vpop.f32.mrb[9].mxu1  ;;  %v1525_v14 = vld [vmem:[%s6088_s11 + $0x28] sm:$0xff] }
 0x730   :  { %v962_v17 = vmul.f32 0.35355338, %v953_v16  ;;  %v1527_v16 = vld [vmem:[%s6088_s11 + $0x38] sm:$0xff] }
 0x731   :  { %v965_v19 = vadd.f32 %v963_v15, %v5182_v34  ;;  %v1524_v15 = vld [vmem:[%s6088_s11 + $0x20] sm:$0xff] }
 0x732   :  { %v964_v20 = vadd.f32 %v962_v17, %v5187_v37  ;;  %v1526_v17 = vld [vmem:[%s6088_s11 + $0x30] sm:$0xff] }
 0x733   :  { %v969_v23 = vsel %vm74_vm0, %v965_v19, -inf }
 0x734   :  { %970 = vmax.xlane.f32.xlu1 %v969_v23  ;;  %v966_v24 = vsel %vm74_vm0, %v964_v20, -inf  ;;  %v1776_v23 = vld [vmem:[%s6090_s13 + $0x18] sm:$0xff] }
 0x735   :  { %967 = vmax.xlane.f32.xlu0 %v966_v24  ;;  %v4488_v25 = vpop.f32.mrb[10].mxu1  ;;  %v1775_v24 = vld [vmem:[%s6090_s13 + $0x10] sm:$0xff] }
 0x736   :  { %v1171_v26 = vpop.f32.mrb[11].mxu1  ;;  %v1181_v27 = vmul.f32 0.35355338, %v4488_v25  ;;  %v1900_v25 = vld [vmem:[%s6091_s14 + $0x8] sm:$0xff] }
 0x737   :  { %v1180_v18 = vmul.f32 0.35355338, %v1171_v26  ;;  %v1899_v26 = vld [vmem:[%s6091_s14] sm:$0xff] }
 0x738   :  { %v1183_v30 = vadd.f32 %v1181_v27, %v5182_v34  ;;  %v1904_v27 = vld [vmem:[%s6092_s15 + $0x8] sm:$0xff] }
 0x739   :  { %v1182_v28 = vadd.f32 %v1180_v18, %v5187_v37  ;;  %v1903_v18 = vld [vmem:[%s6092_s15] sm:$0xff] }
 0x73a   :  { %v1187_v31 = vsel %vm74_vm0, %v1183_v30, -inf }
 0x73b   :  { %v1184_v29 = vsel %vm74_vm0, %v1182_v28, -inf }
 0x73c   :  { %1185 = vmax.xlane.f32.xlu0 %v1184_v29  ;;  %v1901_v29 = vld [vmem:[%s6091_s14 + $0x10] sm:$0xff] }
 0x740   :  { %1188 = vmax.xlane.f32.xlu0 %v1187_v31  ;;  %v1905_v31 = vld [vmem:[%s6092_s15 + $0x10] sm:$0xff] }
 0x7c1   :  { %v971_v32 = vpop.xlane.xlu1 %970 }
 0x7c2   :  { %v973_v33 = vsub.f32 %v965_v19, %v971_v32  ;;  %v968_v35 = vpop.xlane.xlu0 %967  ;;  %v1774_v19 = vld [vmem:[%s6090_s13 + $0x8] sm:$0xff]  ;;  %v4162_v32 = vld [vmem:[%s6082_s5 + $0x80] sm:$0xff] }
 0x7c3   :  { %v972_v36 = vsub.f32 %v964_v20, %v968_v35  ;;  %v1773_v20 = vld [vmem:[%s6090_s13] sm:$0xff] }
 0x7c4   :  { %v976_v38 = vmul.f32 1.442695, %v973_v33  ;;  %v4158_v33 = vld [vmem:[%s6082_s5 + $0x60] sm:$0xff] }
 0x7c5   :  { %v974_v39 = vmul.f32 1.442695, %v972_v36 }
 0x7c6   :  { %4853 = vpow2.f32 %v976_v38 }
 0x7c7   :  { %4855 = vpow2.f32 %v974_v39 }
 0x7c9   :  { %v1186_v40 = vpop.xlane.xlu0 %1185 }
 0x7ca   :  { %v1190_v41 = vsub.f32 %v1182_v28, %v1186_v40  ;;  %v1902_v28 = vld [vmem:[%s6091_s14 + $0x18] sm:$0xff] }
 0x7cc   :  { %v1192_v42 = vmul.f32 1.442695, %v1190_v41 }
 0x7cd   :  { %v1189_v37 = vpop.xlane.xlu0 %1188 }
 0x7ce   :  { %4857 = vpow2.f32 %v1192_v42  ;;  %v1191_v43 = vsub.f32 %v1183_v30, %v1189_v37  ;;  %v1906_v30 = vld [vmem:[%s6092_s15 + $0x18] sm:$0xff] }
 0x7d0   :  { %v5289_v44 = vpop.eup %4853  ;;  %v1194_v34 = vmul.f32 1.442695, %v1191_v43 }
 0x7d1   :  { %v5291_v45 = vpop.eup %4855  ;;  %v981_v46 = vsel %vm74_vm0, %v5289_v44, 0.0 }
 0x7d2   :  { %4859 = vpow2.f32 %v1194_v34  ;;  %982 = vadd.xlane.f32.xlu0 %v981_v46  ;;  %v978_v47 = vsel %vm74_vm0, %v5291_v45, 0.0 }
 0x7d3   :  { %979 = vadd.xlane.f32.xlu1 %v978_v47 }
 0x7d8   :  { %v5297_v48 = vpop.eup %4857 }
 0x7d9   :  { %v1196_v49 = vsel %vm74_vm0, %v5297_v48, 0.0 }
 0x7da   :  { %1197 = vadd.xlane.f32.xlu1 %v1196_v49 }
 0x7dc   :  { %v5301_v50 = vpop.eup %4859 }
 0x7dd   :  { %v1199_v51 = vsel %vm74_vm0, %v5301_v50, 0.0 }
 0x7de   :  { %1200 = vadd.xlane.f32.xlu0 %v1199_v51 }
 0x7eb   :  { %242 = vperm.xlu1 %4834, %v188_v52  }
 0x7ef   :  { %1295 = vperm.xlu1 %4834, %v1289_v54  }
 0x7f3   :  { %1300 = vperm.xlu1 %4834, %v1290_v59  }
 0x7f4   :  { %247 = vperm.xlu0 %4833, %v189_v63  }
 0x7f7   :  { %1310 = vperm.xlu1 %4834, %v1292_v0   ;;  %v1286_v0 = vld [vmem:[%s6083_s6 + $0x8] sm:$0xff] }
 0x7f8   :  { %1305 = vperm.xlu0 %4833, %v1291_v2   ;;  %v1288_v2 = vld [vmem:[%s6083_s6 + $0x18] sm:$0xff] }
 0x7fb   :  { %1471 = vperm.xlu1 %4834, %v1415_v3   ;;  %v1512_v3 = vld [vmem:[%s6087_s10] sm:$0xff] }
 0x7fc   :  { %1466 = vperm.xlu0 %4833, %v1414_v22  }
 0x7ff   :  { %1495 = vperm.xlu1 %4834, %v1419_v21  }
 0x800   :  { %1490 = vperm.xlu0 %4833, %v1418_v4  }
 0x803   :  { %1481 = vperm.xlu1 %4834, %v1417_v5  }
 0x804   :  { %1476 = vperm.xlu0 %4833, %v1416_v6  }
 0x807   :  { %1505 = vperm.xlu1 %4834, %v1421_v57  }
 0x808   :  { %1500 = vperm.xlu0 %4833, %v1420_v7  }
 0x80b   :  { %1535 = vperm.xlu1 %4834, %v1521_v55  }
 0x80c   :  { %1530 = vperm.xlu0 %4833, %v1520_v58  }
 0x80f   :  { %1545 = vperm.xlu1 %4834, %v1523_v8  }
 0x810   :  { %1540 = vperm.xlu0 %4833, %v1522_v13  }
 0x813   :  { %1555 = vperm.xlu1 %4834, %v1525_v14  }
 0x814   :  { %1550 = vperm.xlu0 %4833, %v1524_v15  }
 0x817   :  { %1565 = vperm.xlu1 %4834, %v1527_v16  }
 0x818   :  { %1560 = vperm.xlu0 %4833, %v1526_v17  }
 0x81b   :  { %1784 = vperm.xlu1 %4834, %v1774_v19  }
 0x81c   :  { %1779 = vperm.xlu0 %4833, %v1773_v20  }
 0x81f   :  { %1794 = vperm.xlu1 %4834, %v1776_v23  }
 0x820   :  { %1789 = vperm.xlu0 %4833, %v1775_v24  }
 0x823   :  { %1956 = vperm.xlu1 %4834, %v1900_v25  }
 0x824   :  { %1951 = vperm.xlu0 %4833, %v1899_v26  }
 0x827   :  { %1980 = vperm.xlu1 %4834, %v1904_v27  }
 0x828   :  { %1975 = vperm.xlu0 %4833, %v1903_v18  }
 0x82b   :  { %1966 = vperm.xlu1 %4834, %v1902_v28  }
 0x82c   :  { %1961 = vperm.xlu0 %4833, %v1901_v29  }
 0x82f   :  { %1990 = vperm.xlu1 %4834, %v1906_v30  }
 0x830   :  { %1985 = vperm.xlu0 %4833, %v1905_v31  }
 0x833   :  { %2045 = vperm.xlu1 %4834, %v4162_v32  }
 0x834   :  { %2025 = vperm.xlu0 %4833, %v4158_v33  }
 0x85f   :  { %v983_v35 = vpop.xlane.xlu0 %982 }
 0x860   :  { %4861 = vrcp.f32 %v983_v35  ;;  %v980_v36 = vpop.xlane.xlu1 %979 }
 0x861   :  { %4863 = vrcp.f32 %v980_v36 }
 0x867   :  { %v1198_v38 = vpop.xlane.xlu1 %1197 }
 0x868   :  { %4865 = vrcp.f32 %v1198_v38 }
 0x86a   :  { %v4862_v39 = vpop.eup %4861 }
 0x86b   :  { %v4864_v40 = vpop.eup %4863  ;;  %v987_v41 = vmul.f32 %v4862_v39, %v5289_v44  ;;  %v1201_v42 = vpop.xlane.xlu0 %1200 }
 0x86c   :  { %v986_v37 = vmul.f32 %v4864_v40, %v5291_v45  ;;  %4867 = vrcp.f32 %v1201_v42  ;;  %v243_v34 = vpop.permute.xlu1 %242 }
 0x86d   :  { %v404_v47 = vadd.f32 %v5313_v56, %v243_v34  ;;  %v1285_v56 = vld [vmem:[%s6083_s6] sm:$0xff] }
 0x86e   :  { %v4721_v43 = vpack.c.bf16 %v987_v41, %v986_v37 }
 0x870   :  { %4723 = vmatpush3.bf16.xpose.msk.msra.mxu0 %vm5217_vm4, %v4721_v43  ;;  %v1296_v22 = vpop.permute.xlu1 %1295 }
 0x871   :  { %4729 = vmatprep.subr.bf16.mxu0 %v5279_v12 }
 0x872   :  { %v4866_v46 = vpop.eup %4865 }
 0x873   :  { %v1204_v51 = vmul.f32 %v4866_v46, %v5297_v48  ;;  %v248_v45 = vpop.permute.xlu0 %247 }
 0x874   :  { %v409_v54 = vadd.f32 %v5308_v53, %v248_v45  ;;  %v1287_v53 = vld [vmem:[%s6083_s6 + $0x10] sm:$0xff]  ;;  %v1301_v21 = vpop.permute.xlu1 %1300 }
 0x876   :  { %v4868_v49 = vpop.eup %4867 }
 0x877   :  { %v1205_v52 = vmul.f32 %v4868_v49, %v5301_v50  ;;  %4482 = vmatmul.mubr.msk.f32.vlgmr.msra.gmra.mrb[12].mxu0 %vm74_vm0, %v404_v47  ;;  %v1306_v13 = vpop.permute.xlu0 %1305 }
 0x878   :  { %4731 = vmatpush3.bf16.msra.mxu0 %v5279_v12  ;;  %4504 = vmatprep.mubr.msk.f32.mxu0 %vm250_vm1, %v1285_v56  ;;  %v1311_v55 = vpop.permute.xlu1 %1310 }
 0x879   :  { %v4725_v44 = vpack.c.bf16 %v1205_v52, %v1204_v51 }
 0x87b   :  { %4727 = vmatpush3.bf16.xpose.msk.msra.mxu1 %vm5217_vm4, %v4725_v44  ;;  %v1467_v56 = vpop.permute.xlu0 %1466 }
 0x882   :  { %4494 = vmatmul.mubr.msk.f32.vlgmr.msra.gmra.mrb[12].mxu1 %vm74_vm0, %v409_v54 }
 0x883   :  { %4518 = vmatprep.mubr.msk.f32.mxu1 %vm250_vm1, %v1512_v3 }
 0x94a   :  { %v1063_v48 = vpop.f32.mrb[12].mxu0 }
 0x94b   :  { %v4483_v50 = vpop.f32.mrb[13].mxu0 }
 0x955   :  { %v1281_v59 = vpop.f32.mrb[12].mxu1 }
 0x956   :  { %v4732_v63 = vpack.c.bf16 %v1281_v59, %v1063_v48  ;;  %v4495_v12 = vpop.f32.mrb[13].mxu1  ;;  %v1472_v48 = vpop.permute.xlu1 %1471 }
 0x958   :  { %4733 = vmatprep.subr.bf16.mxu0 %v4732_v63 }
 0x959   :  { %4735 = vmatpush3.bf16.msra.mxu0 %v4732_v63  ;;  %v1491_v63 = vpop.permute.xlu0 %1490 }
 0x95a   :  { %v1496_v12 = vpop.permute.xlu1 %1495 }
 0x95c   :  { %4505 = vmatmul.mubr.msk.f32.vlgmr.msra.gmra.mrb[14].mxu0 %vm250_vm1, %v1286_v0 }
 0x95d   :  { %4507 = vmatprep.mubr.msk.f32.mxu0 %vm250_vm1, %v1287_v53  ;;  %v1477_v0 = vpop.permute.xlu0 %1476 }
 0x95e   :  { %v1482_v53 = vpop.permute.xlu1 %1481 }
 0x960   :  { %4508 = vmatmul.mubr.msk.f32.gmra.mrb[16].mxu0 %vm250_vm1, %v1288_v2 }
 0xa2f   :  { %v4506_v4 = vpop.f32.mrb[14].mxu0 }
 0xa30   :  { %v1397_v5 = vadd.f32 %v4506_v4, %v1301_v21  ;;  %v1391_v6 = vpop.f32.mrb[15].mxu0 }
 0xa31   :  { %v1392_v57 = vadd.f32 %v1391_v6, %v1296_v22 }
 0xa32   :  { %v1411_v7 = vadd.f32 %v1397_v5, %v5123_v1 }
 0xa33   :  { %v1410_v58 = vadd.f32 %v1392_v57, %v5121_v62  ;;  %v4509_v8 = vpop.f32.mrb[16].mxu0 }
 0xa34   :  { %v1423_v14 = vsel %vm74_vm0, %v1411_v7, 0.0  ;;  %v1407_v15 = vadd.f32 %v4509_v8, %v1311_v55  ;;  %v1401_v16 = vpop.f32.mrb[17].mxu0  ;;  %v1501_v55 = vpop.permute.xlu0 %1500 }
 0xa35   :  { %v1422_v17 = vsel %vm74_vm0, %v1410_v58, 0.0  ;;  %v1402_v19 = vadd.f32 %v1401_v16, %v1306_v13 }
 0xa36   :  { %v1424_v20 = vadd.f32 %v1423_v14, %v1422_v17  ;;  %v1413_v23 = vadd.f32 %v1407_v15, %v5127_v9 }
 0xa37   :  { %v1412_v24 = vadd.f32 %v1402_v19, %v5129_v10  ;;  %v1513_v19 = vld [vmem:[%s6087_s10 + $0x8] sm:$0xff] }
 0xa38   :  { %v1427_v26 = vsel %vm74_vm0, %v1413_v23, 0.0 }
 0xa39   :  { %v1425_v25 = vsel %vm74_vm0, %v1412_v24, 0.0 }
 0xa3a   :  { %v1426_v1 = vadd.f32 %v1425_v25, %v1424_v20  ;;  %v1514_v20 = vld [vmem:[%s6087_s10 + $0x10] sm:$0xff]  ;;  %v1517_v25 = vld [vmem:[%s6087_s10 + $0x28] sm:$0xff] }
 0xa3c   :  { %v1428_v62 = vadd.f32 %v1427_v26, %v1426_v1  ;;  %v1518_v1 = vld [vmem:[%s6087_s10 + $0x30] sm:$0xff]  ;;  %v1519_v26 = vld [vmem:[%s6087_s10 + $0x38] sm:$0xff] }
 0xa3e   :  { %v1429_v27 = vrot.slane %v1428_v62, 4 }
 0xa40   :  { %v1430_v18 = vadd.f32 %v1429_v27, %v1428_v62  ;;  %v1769_v62 = vld [vmem:[%s6089_s12] sm:$0xff] }
 0xa41   :  { %4546 = vmatprep.mubr.msk.f32.mxu0 %vm1797_vm5, %v1769_v62 }
 0xa42   :  { %v1431_v28 = vrot.slane %v1430_v18, 2 }
 0xa44   :  { %v1432_v29 = vadd.f32 %v1431_v28, %v1430_v18  ;;  %v1531_v18 = vpop.permute.xlu0 %1530 }
 0xa46   :  { %v1433_v30 = vrot.slane %v1432_v29, 1 }
 0xa48   :  { %v1434_v31 = vadd.f32 %v1433_v30, %v1432_v29  ;;  %v1541_v30 = vpop.permute.xlu0 %1540 }
 0xa4a   :  { %v1435_v32 = vmul.f32 0.03125, %v1434_v31 }
 0xa4c   :  { %v1436_v33 = vsub.f32 %v1410_v58, %v1435_v32  ;;  %v1437_v35 = vsub.f32 %v1411_v7, %v1435_v32  ;;  %v1438_v36 = vsub.f32 %v1412_v24, %v1435_v32  ;;  %v1439_v38 = vsub.f32 %v1413_v23, %v1435_v32  ;;  %v1506_v58 = vpop.permute.xlu1 %1505  ;;  %v1515_v23 = vld [vmem:[%s6087_s10 + $0x18] sm:$0xff]  ;;  %v1516_v24 = vld [vmem:[%s6087_s10 + $0x20] sm:$0xff] }
 0xa4e   :  { %v1440_v9 = vmul.f32 %v1436_v33, %v1436_v33  ;;  %v1441_v39 = vmul.f32 %v1437_v35, %v1437_v35  ;;  %v1442_v10 = vmul.f32 %v1438_v36, %v1438_v36  ;;  %v1443_v40 = vmul.f32 %v1439_v38, %v1439_v38 }
 0xa50   :  { %v1444_v41 = vsel %vm74_vm0, %v1440_v9, 0.0  ;;  %v1445_v42 = vsel %vm74_vm0, %v1441_v39, 0.0  ;;  %v1447_v43 = vsel %vm74_vm0, %v1442_v10, 0.0  ;;  %v1449_v46 = vsel %vm74_vm0, %v1443_v40, 0.0  ;;  %v1536_v27 = vpop.permute.xlu1 %1535 }
 0xa51   :  { %v1446_v37 = vadd.f32 %v1445_v42, %v1444_v41 }
 0xa53   :  { %v1448_v34 = vadd.f32 %v1447_v43, %v1446_v37  ;;  %v1551_v37 = vpop.permute.xlu0 %1550 }
 0xa54   :  { %v1546_v28 = vpop.permute.xlu1 %1545 }
 0xa55   :  { %v1450_v47 = vadd.f32 %v1449_v46, %v1448_v34 }
 0xa57   :  { %v1451_v49 = vrot.slane %v1450_v47, 4 }
 0xa58   :  { %v1556_v40 = vpop.permute.xlu1 %1555 }
 0xa59   :  { %v1452_v51 = vadd.f32 %v1451_v49, %v1450_v47 }
 0xa5b   :  { %v1453_v52 = vrot.slane %v1452_v51, 2 }
 0xa5d   :  { %v1454_v44 = vadd.f32 %v1453_v52, %v1452_v51 }
 0xa5f   :  { %v1455_v45 = vrot.slane %v1454_v44, 1 }
 0xa61   :  { %v1456_v54 = vadd.f32 %v1455_v45, %v1454_v44 }
 0xa63   :  { %v1457_v50 = vmul.f32 0.03125, %v1456_v54 }
 0xa65   :  { %v1458_v59 = vadd.f32 1e-12, %v1457_v50 }
 0xa67   :  { %4869 = vrsqrt.f32 %v1458_v59 }
 0xa71   :  { %v4870_v2 = vpop.eup %4869 }
 0xa72   :  { %v1462_v3 = vmul.f32 %v4870_v2, %v1438_v36  ;;  %v1460_v22 = vmul.f32 %v4870_v2, %v1436_v33  ;;  %v1461_v21 = vmul.f32 %v4870_v2, %v1437_v35  ;;  %v1463_v4 = vmul.f32 %v4870_v2, %v1439_v38 }
 0xa74   :  { %v1484_v5 = vmul.f32 %v1467_v56, %v1460_v22  ;;  %v1485_v6 = vmul.f32 %v1472_v48, %v1461_v21  ;;  %v1486_v57 = vmul.f32 %v1477_v0, %v1462_v3  ;;  %v1487_v7 = vmul.f32 %v1482_v53, %v1463_v4  ;;  %v1561_v22 = vpop.permute.xlu0 %1560 }
 0xa76   :  { %v5463_v8 = vadd.f32 %v1491_v63, %v1484_v5  ;;  %v5465_v13 = vadd.f32 %v1496_v12, %v1485_v6  ;;  %v5467_v14 = vadd.f32 %v1501_v55, %v1486_v57  ;;  %v5469_v15 = vadd.f32 %v1506_v58, %v1487_v7  ;;  %v1566_v12 = vpop.permute.xlu1 %1565 }
 0xa78   :  { %v4736_v16 = vpack.c.bf16 %v5465_v13, %v5463_v8  ;;  %v4740_v17 = vpack.c.bf16 %v5469_v15, %v5467_v14 }
 0xa7a   :  { %4737 = vmatprep.subr.bf16.mxu1 %v4736_v16 }
 0xa7b   :  { %4739 = vmatpush3.bf16.msra.mxu1 %v4736_v16 }
 0xa7c   :  { %4741 = vmatprep.subr.bf16.mxu1 %v4740_v17 }
 0xa7f   :  { %4743 = vmatpush3.bf16.msra.mxu1 %v4740_v17 }
 0xa82   :  { %4519 = vmatmul.mubr.msk.f32.vlgmr.msra.gmra.mrb[14].mxu1 %vm250_vm1, %v1513_v19 }
 0xa83   :  { %4521 = vmatprep.mubr.msk.f32.mxu1 %vm250_vm1, %v1514_v20 }
 0xa86   :  { %4522 = vmatmul.mubr.msk.f32.gmra.mrb[16].mxu1 %vm250_vm1, %v1515_v23 }
 0xa87   :  { %4524 = vmatprep.mubr.msk.f32.mxu1 %vm250_vm1, %v1516_v24 }
 0xa8a   :  { %4525 = vmatmul.mubr.msk.f32.gmra.mrb[18].mxu1 %vm250_vm1, %v1517_v25 }
 0xa8b   :  { %4527 = vmatprep.mubr.msk.f32.mxu1 %vm250_vm1, %v1518_v1 }
 0xa8e   :  { %4528 = vmatmul.mubr.msk.f32.gmra.mrb[20].mxu1 %vm250_vm1, %v1519_v26 }
 0xb55   :  { %v4520_v29 = vpop.f32.mrb[14].mxu1 }
 0xb56   :  { %v5507_v31 = vadd.f32 %v4520_v29, %v1536_v27  ;;  %v1658_v32 = vpop.f32.mrb[15].mxu1 }
 0xb57   :  { %v5509_v33 = vadd.f32 %v1658_v32, %v1531_v18 }
 0xb58   :  { %v1706_v35 = vmul.f32 0.044715, %v5507_v31 }
 0xb59   :  { %v1705_v36 = vmul.f32 0.044715, %v5509_v33  ;;  %v4523_v38 = vpop.f32.mrb[16].mxu1 }
 0xb5a   :  { %v1714_v9 = vmul.f32 %v1706_v35, %v5507_v31  ;;  %v5514_v39 = vadd.f32 %v4523_v38, %v1546_v28  ;;  %v1668_v10 = vpop.f32.mrb[17].mxu1  ;;  %v1698_v38 = vmul.f32 0.5, %v5507_v31 }
 0xb5b   :  { %v1713_v41 = vmul.f32 %v1705_v36, %v5509_v33  ;;  %v5517_v42 = vadd.f32 %v1668_v10, %v1541_v30 }
 0xb5c   :  { %v1722_v43 = vmul.f32 %v1714_v9, %v5507_v31  ;;  %v1708_v34 = vmul.f32 0.044715, %v5514_v39 }
 0xb5d   :  { %v1721_v46 = vmul.f32 %v1713_v41, %v5509_v33  ;;  %v1707_v47 = vmul.f32 0.044715, %v5517_v42  ;;  %v4526_v49 = vpop.f32.mrb[18].mxu1 }
 0xb5e   :  { %v1716_v51 = vmul.f32 %v1708_v34, %v5514_v39  ;;  %v5524_v52 = vadd.f32 %v4526_v49, %v1556_v40  ;;  %v1678_v44 = vpop.f32.mrb[19].mxu1  ;;  %v1730_v45 = vadd.f32 %v1722_v43, %v5507_v31  ;;  %v1697_v40 = vmul.f32 0.5, %v5509_v33 }
 0xb5f   :  { %v1715_v54 = vmul.f32 %v1707_v47, %v5517_v42  ;;  %v5528_v56 = vadd.f32 %v1678_v44, %v1551_v37  ;;  %v1729_v48 = vadd.f32 %v1721_v46, %v5509_v33  ;;  %v1700_v47 = vmul.f32 0.5, %v5514_v39 }
 0xb60   :  { %v1724_v50 = vmul.f32 %v1716_v51, %v5514_v39  ;;  %v1710_v59 = vmul.f32 0.044715, %v5524_v52  ;;  %v1738_v63 = vmul.f32 0.7978846, %v1730_v45  ;;  %v1699_v44 = vmul.f32 0.5, %v5517_v42 }
 0xb61   :  { %v1723_v0 = vmul.f32 %v1715_v54, %v5517_v42  ;;  %v1709_v53 = vmul.f32 0.044715, %v5528_v56  ;;  %v4529_v2 = vpop.f32.mrb[20].mxu1  ;;  %v1737_v3 = vmul.f32 0.7978846, %v1729_v48  ;;  %v1702_v33 = vmul.f32 0.5, %v5524_v52 }
 0xb62   :  { %v1718_v21 = vmul.f32 %v1710_v59, %v5524_v52  ;;  %v5536_v4 = vadd.f32 %v4529_v2, %v1566_v12  ;;  %v1688_v5 = vpop.f32.mrb[21].mxu1  ;;  %4871 = vtanh.f32 %v1738_v63  ;;  %v1732_v6 = vadd.f32 %v1724_v50, %v5514_v39 }
 0xb63   :  { %v1717_v57 = vmul.f32 %v1709_v53, %v5528_v56  ;;  %v1689_v7 = vadd.f32 %v1688_v5, %v1561_v22  ;;  %4873 = vtanh.f32 %v1737_v3  ;;  %v1731_v55 = vadd.f32 %v1723_v0, %v5517_v42 }
 0xb64   :  { %v1726_v58 = vmul.f32 %v1718_v21, %v5524_v52  ;;  %v1712_v16 = vmul.f32 0.044715, %v5536_v4  ;;  %v1740_v17 = vmul.f32 0.7978846, %v1732_v6  ;;  %v1701_v12 = vmul.f32 0.5, %v5528_v56 }
 0xb65   :  { %v1725_v19 = vmul.f32 %v1717_v57, %v5528_v56  ;;  %v1711_v20 = vmul.f32 0.044715, %v1689_v7  ;;  %v1739_v23 = vmul.f32 0.7978846, %v1731_v55  ;;  %v1704_v42 = vmul.f32 0.5, %v5536_v4 }
 0xb66   :  { %v1720_v24 = vmul.f32 %v1712_v16, %v5536_v4  ;;  %4875 = vtanh.f32 %v1740_v17  ;;  %v1734_v25 = vadd.f32 %v1726_v58, %v5524_v52  ;;  %v1703_v5 = vmul.f32 0.5, %v1689_v7  ;;  %v1771_v58 = vld [vmem:[%s6089_s12 + $0x10] sm:$0xff]  ;;  %v1785_v16 = vpop.permute.xlu1 %1784  ;;  %v1780_v17 = vpop.permute.xlu0 %1779 }
 0xb67   :  { %v1719_v1 = vmul.f32 %v1711_v20, %v1689_v7  ;;  %4877 = vtanh.f32 %v1739_v23  ;;  %v1733_v26 = vadd.f32 %v1725_v19, %v5528_v56  ;;  %v1770_v56 = vld [vmem:[%s6089_s12 + $0x8] sm:$0xff] }
 0xb68   :  { %v1728_v62 = vmul.f32 %v1720_v24, %v5536_v4  ;;  %v1742_v27 = vmul.f32 0.7978846, %v1734_v25 }
 0xb69   :  { %v1727_v18 = vmul.f32 %v1719_v1, %v1689_v7  ;;  %v1741_v28 = vmul.f32 0.7978846, %v1733_v26 }
 0xb6a   :  { %4879 = vtanh.f32 %v1742_v27  ;;  %v1736_v29 = vadd.f32 %v1728_v62, %v5536_v4  ;;  %v1772_v4 = vld [vmem:[%s6089_s12 + $0x18] sm:$0xff]  ;;  %v1795_v1 = vpop.permute.xlu1 %1794  ;;  %v1790_v27 = vpop.permute.xlu0 %1789 }
 0xb6b   :  { %4881 = vtanh.f32 %v1741_v28  ;;  %v1735_v30 = vadd.f32 %v1727_v18, %v1689_v7  ;;  %v4146_v7 = vld [vmem:[%s6081_s4 + $0x60] sm:$0xff] }
 0xb6c   :  { %v4872_v32 = vpop.eup %4871  ;;  %v1744_v35 = vmul.f32 0.7978846, %v1736_v29  ;;  %4560 = vmatprep.mubr.msk.f32.mxu1 %vm250_vm1, %v4146_v7 }
 0xb6d   :  { %v4874_v36 = vpop.eup %4873  ;;  %v1754_v9 = vadd.f32 1.0, %v4872_v32  ;;  %v1743_v10 = vmul.f32 0.7978846, %v1735_v30 }
 0xb6e   :  { %v1753_v41 = vadd.f32 1.0, %v4874_v36  ;;  %4883 = vtanh.f32 %v1744_v35 }
 0xb6f   :  { %v1762_v37 = vmul.f32 %v1754_v9, %v1698_v38  ;;  %4885 = vtanh.f32 %v1743_v10 }
 0xb70   :  { %v4876_v43 = vpop.eup %4875  ;;  %v1761_v34 = vmul.f32 %v1753_v41, %v1697_v40 }
 0xb71   :  { %v4878_v46 = vpop.eup %4877  ;;  %v1756_v49 = vadd.f32 1.0, %v4876_v43 }
 0xb72   :  { %v4744_v51 = vpack.c.bf16 %v1762_v37, %v1761_v34  ;;  %v1755_v45 = vadd.f32 1.0, %v4878_v46 }
 0xb73   :  { %v1764_v54 = vmul.f32 %v1756_v49, %v1700_v47 }
 0xb74   :  { %v4880_v31 = vpop.eup %4879  ;;  %4745 = vmatprep.subr.bf16.mxu0 %v4744_v51  ;;  %v1763_v48 = vmul.f32 %v1755_v45, %v1699_v44 }
 0xb75   :  { %v4882_v50 = vpop.eup %4881  ;;  %4747 = vmatpush3.bf16.msra.mxu0 %v4744_v51  ;;  %v1758_v59 = vadd.f32 1.0, %v4880_v31 }
 0xb76   :  { %v4748_v63 = vpack.c.bf16 %v1764_v54, %v1763_v48  ;;  %v1757_v0 = vadd.f32 1.0, %v4882_v50 }
 0xb77   :  { %v1766_v53 = vmul.f32 %v1758_v59, %v1702_v33 }
 0xb78   :  { %v4884_v39 = vpop.eup %4883  ;;  %4749 = vmatprep.subr.bf16.mxu0 %v4748_v63  ;;  %v1765_v2 = vmul.f32 %v1757_v0, %v1701_v12 }
 0xb79   :  { %v4886_v3 = vpop.eup %4885  ;;  %4751 = vmatpush3.bf16.msra.mxu0 %v4748_v63  ;;  %v1760_v22 = vadd.f32 1.0, %v4884_v39 }
 0xb7a   :  { %v4752_v21 = vpack.c.bf16 %v1766_v53, %v1765_v2  ;;  %v1759_v6 = vadd.f32 1.0, %v4886_v3 }
 0xb7b   :  { %v1768_v57 = vmul.f32 %v1760_v22, %v1704_v42 }
 0xb7c   :  { %4753 = vmatprep.subr.bf16.mxu0 %v4752_v21  ;;  %v1767_v52 = vmul.f32 %v1759_v6, %v1703_v5  ;;  %v1957_v5 = vpop.permute.xlu1 %1956 }
 0xb7d   :  { %4755 = vmatpush3.bf16.msra.mxu0 %v4752_v21  ;;  %v1952_v21 = vpop.permute.xlu0 %1951 }
 0xb7e   :  { %v4756_v55 = vpack.c.bf16 %v1768_v57, %v1767_v52 }
 0xb80   :  { %4757 = vmatprep.subr.bf16.mxu0 %v4756_v55 }
 0xb81   :  { %4759 = vmatpush3.bf16.msra.mxu0 %v4756_v55  ;;  %v1976_v52 = vpop.permute.xlu0 %1975  ;;  %v1981_v55 = vpop.permute.xlu1 %1980 }
 0xb84   :  { %4547 = vmatmul.mubr.msk.f32.vlgmr.msra.gmra.mrb[18].mxu0 %vm1797_vm5, %v1770_v56 }
 0xb85   :  { %4549 = vmatprep.mubr.msk.f32.mxu0 %vm1797_vm5, %v1771_v58  ;;  %v1962_v56 = vpop.permute.xlu0 %1961  ;;  %v1967_v58 = vpop.permute.xlu1 %1966 }
 0xb88   :  { %4550 = vmatmul.mubr.msk.f32.gmra.mrb[20].mxu0 %vm1797_vm5, %v1772_v4 }
 0xc57   :  { %v4548_v19 = vpop.f32.mrb[18].mxu0 }
 0xc58   :  { %v1882_v20 = vadd.f32 %v4548_v19, %v1785_v16  ;;  %v1876_v23 = vpop.f32.mrb[19].mxu0 }
 0xc59   :  { %v1877_v24 = vadd.f32 %v1876_v23, %v1780_v17 }
 0xc5a   :  { %v1896_v25 = vadd.f32 %v1882_v20, %v5465_v13 }
 0xc5b   :  { %v1895_v26 = vadd.f32 %v1877_v24, %v5463_v8  ;;  %v4551_v62 = vpop.f32.mrb[20].mxu0 }
 0xc5c   :  { %v1908_v18 = vsel %vm74_vm0, %v1896_v25, 0.0  ;;  %v1892_v28 = vadd.f32 %v4551_v62, %v1795_v1  ;;  %v1886_v29 = vpop.f32.mrb[21].mxu0  ;;  %v1986_v1 = vpop.permute.xlu0 %1985 }
 0xc5d   :  { %v1907_v30 = vsel %vm74_vm0, %v1895_v26, 0.0  ;;  %v1887_v32 = vadd.f32 %v1886_v29, %v1790_v27 }
 0xc5e   :  { %v1909_v35 = vadd.f32 %v1908_v18, %v1907_v30  ;;  %v1898_v36 = vadd.f32 %v1892_v28, %v5469_v15 }
 0xc5f   :  { %v1897_v38 = vadd.f32 %v1887_v32, %v5467_v14  ;;  %v4147_v32 = vld [vmem:[%s6081_s4 + $0x68] sm:$0xff] }
 0xc60   :  { %v1912_v10 = vsel %vm74_vm0, %v1898_v36, 0.0 }
 0xc61   :  { %v1910_v9 = vsel %vm74_vm0, %v1897_v38, 0.0 }
 0xc62   :  { %v1911_v13 = vadd.f32 %v1910_v9, %v1909_v35  ;;  %v4148_v35 = vld [vmem:[%s6081_s4 + $0x70] sm:$0xff]  ;;  %v4151_v9 = vld [vmem:[%s6081_s4 + $0x88] sm:$0xff] }
 0xc64   :  { %v1913_v8 = vadd.f32 %v1912_v10, %v1911_v13  ;;  %v2026_v10 = vpop.permute.xlu0 %2025 }
 0xc66   :  { %v1914_v40 = vrot.slane %v1913_v8, 4 }
 0xc68   :  { %v1915_v41 = vadd.f32 %v1914_v40, %v1913_v8 }
 0xc6a   :  { %v1916_v37 = vrot.slane %v1915_v41, 2 }
 0xc6c   :  { %v1917_v43 = vadd.f32 %v1916_v37, %v1915_v41 }
 0xc6e   :  { %v1918_v34 = vrot.slane %v1917_v43, 1 }
 0xc70   :  { %v1919_v46 = vadd.f32 %v1918_v34, %v1917_v43 }
 0xc72   :  { %v1920_v47 = vmul.f32 0.03125, %v1919_v46 }
 0xc74   :  { %v1921_v49 = vsub.f32 %v1895_v26, %v1920_v47  ;;  %v1922_v51 = vsub.f32 %v1896_v25, %v1920_v47  ;;  %v1923_v44 = vsub.f32 %v1897_v38, %v1920_v47  ;;  %v1924_v45 = vsub.f32 %v1898_v36, %v1920_v47  ;;  %v1991_v26 = vpop.permute.xlu1 %1990  ;;  %v4149_v36 = vld [vmem:[%s6081_s4 + $0x78] sm:$0xff]  ;;  %v4150_v38 = vld [vmem:[%s6081_s4 + $0x80] sm:$0xff]  ;;  %v4152_v47 = vld [vmem:[%s6081_s4 + $0x90] sm:$0xff] }
 0xc76   :  { %v1925_v15 = vmul.f32 %v1921_v49, %v1921_v49  ;;  %v1926_v54 = vmul.f32 %v1922_v51, %v1922_v51  ;;  %v1927_v14 = vmul.f32 %v1923_v44, %v1923_v44  ;;  %v1928_v31 = vmul.f32 %v1924_v45, %v1924_v45 }
 0xc78   :  { %v1929_v48 = vsel %vm74_vm0, %v1925_v15, 0.0  ;;  %v1930_v50 = vsel %vm74_vm0, %v1926_v54, 0.0  ;;  %v1932_v59 = vsel %vm74_vm0, %v1927_v14, 0.0  ;;  %v1934_v12 = vsel %vm74_vm0, %v1928_v31, 0.0  ;;  %v2046_v34 = vpop.permute.xlu1 %2045 }
 0xc79   :  { %v1931_v33 = vadd.f32 %v1930_v50, %v1929_v48 }
 0xc7b   :  { %v1933_v63 = vadd.f32 %v1932_v59, %v1931_v33  ;;  %v5648_v33 = vld [vmem:[%s6104_s1 + $0x8] sm:$0xff] }
 0xc7d   :  { %v1935_v0 = vadd.f32 %v1934_v12, %v1933_v63  ;;  %v5654_v63 = vld [vmem:[%s6104_s1] sm:$0xff] }
 0xc7f   :  { %v1936_v53 = vrot.slane %v1935_v0, 4 }
 0xc81   :  { %v1937_v39 = vadd.f32 %v1936_v53, %v1935_v0 }
 0xc83   :  { %v1938_v2 = vrot.slane %v1937_v39, 2 }
 0xc85   :  { %v1939_v3 = vadd.f32 %v1938_v2, %v1937_v39  ;;  %v4159_v39 = vld [vmem:[%s6082_s5 + $0x68] sm:$0xff]  ;;  %v4161_v2 = vld [vmem:[%s6082_s5 + $0x78] sm:$0xff] }
 0xc87   :  { %v1940_v42 = vrot.slane %v1939_v3, 1 }
 0xc89   :  { %v1941_v22 = vadd.f32 %v1940_v42, %v1939_v3  ;;  %v4160_v3 = vld [vmem:[%s6082_s5 + $0x70] sm:$0xff]  ;;  %v4163_v42 = vld [vmem:[%s6082_s5 + $0x88] sm:$0xff] }
 0xc8b   :  { %v1942_v6 = vmul.f32 0.03125, %v1941_v22  ;;  %v4166_v22 = vld [vmem:[%s6082_s5 + $0xa0] sm:$0xff] }
 0xc8d   :  { %v1943_v57 = vadd.f32 1e-12, %v1942_v6 }
 0xc8f   :  { %4887 = vrsqrt.f32 %v1943_v57 }
 0xc99   :  { %v4888_v4 = vpop.eup %4887 }
 0xc9a   :  { %v1947_v7 = vmul.f32 %v4888_v4, %v1923_v44  ;;  %v1945_v16 = vmul.f32 %v4888_v4, %v1921_v49  ;;  %v1946_v17 = vmul.f32 %v4888_v4, %v1922_v51  ;;  %v1948_v19 = vmul.f32 %v4888_v4, %v1924_v45  ;;  %v4153_v49 = vld [vmem:[%s6081_s4 + $0x98] sm:$0xff]  ;;  %v4154_v51 = vld [vmem:[%s6081_s4 + $0xa0] sm:$0xff]  ;;  %v4155_v45 = vld [vmem:[%s6081_s4 + $0xa8] sm:$0xff] }
 0xc9c   :  { %v1969_v20 = vmul.f32 %v1952_v21, %v1945_v16  ;;  %v1970_v23 = vmul.f32 %v1957_v5, %v1946_v17  ;;  %v1971_v24 = vmul.f32 %v1962_v56, %v1947_v7  ;;  %v1972_v25 = vmul.f32 %v1967_v58, %v1948_v19 }
 0xc9e   :  { %v5584_v62 = vadd.f32 %v1976_v52, %v1969_v20  ;;  %v5586_v27 = vadd.f32 %v1981_v55, %v1970_v23  ;;  %v5588_v18 = vadd.f32 %v1986_v1, %v1971_v24  ;;  %v5590_v28 = vadd.f32 %v1991_v26, %v1972_v25  ;;  %v4165_v23 = vld [vmem:[%s6082_s5 + $0x98] sm:$0xff]  ;;  %v4164_v24 = vld [vmem:[%s6082_s5 + $0x90] sm:$0xff] }
 0xca0   :  { %v4760_v29 = vpack.c.bf16 %v5586_v27, %v5584_v62  ;;  %v4764_v30 = vpack.c.bf16 %v5590_v28, %v5588_v18 }
 0xca2   :  { %4761 = vmatprep.subr.bf16.mxu1 %v4760_v29 }
 0xca3   :  { %4763 = vmatpush3.bf16.msra.mxu1 %v4760_v29 }
 0xca4   :  { %4765 = vmatprep.subr.bf16.mxu1 %v4764_v30 }
 0xca7   :  { %4767 = vmatpush3.bf16.msra.mxu1 %v4764_v30 }
 0xcaa   :  { %4561 = vmatmul.mubr.msk.f32.vlgmr.msra.gmra.mrb[22].mxu1 %vm250_vm1, %v4147_v32 }
 0xcab   :  { %4563 = vmatprep.mubr.msk.f32.mxu1 %vm250_vm1, %v4148_v35  ;;  %v4156_v35 = vld [vmem:[%s6081_s4 + $0xb0] sm:$0xff] }
 0xcae   :  { %4564 = vmatmul.mubr.msk.f32.gmra.mrb[24].mxu1 %vm250_vm1, %v4149_v36  ;;  %v4157_v36 = vld [vmem:[%s6081_s4 + $0xb8] sm:$0xff] }
 0xcaf   :  { %4566 = vmatprep.mubr.msk.f32.mxu1 %vm250_vm1, %v4150_v38 }
 0xcb2   :  { %4567 = vmatmul.mubr.msk.f32.gmra.mrb[26].mxu1 %vm250_vm1, %v4151_v9 }
 0xcb3   :  { %4569 = vmatprep.mubr.msk.f32.mxu1 %vm250_vm1, %v4152_v47 }
 0xcb6   :  { %4570 = vmatmul.mubr.msk.f32.gmra.mrb[28].mxu1 %vm250_vm1, %v4153_v49 }
 0xcb7   :  { %4572 = vmatprep.mubr.msk.f32.mxu1 %vm250_vm1, %v4154_v51 }
 0xcba   :  { %4573 = vmatmul.mubr.msk.f32.gmra.mrb[30].mxu1 %vm250_vm1, %v4155_v45 }
 0xcbb   :  { %4575 = vmatprep.mubr.msk.f32.mxu1 %vm250_vm1, %v4156_v35 }
 0xcbe   :  { %4576 = vmatmul.mubr.msk.f32.gmra.mrb[32].mxu1 %vm250_vm1, %v4157_v36 }
 0xd7d   :  { %v5616_v13 = vpop.f32.mrb[22].mxu1 }
 0xd7e   :  { %v2185_v8 = vpop.f32.mrb[23].mxu1 }
 0xd7f   :  { %v2186_v40 = vadd.f32 %v2185_v8, %v2026_v10 }
 0xd81   :  { %2244 = vxpose.xlu0.b32.start.end [1/1] (short) (narrow) %v2186_v40, 16  ;;  %v5618_v41 = vpop.f32.mrb[24].mxu1 }
 0xd82   :  { %v5620_v37 = vpop.f32.mrb[25].mxu1 }
 0xd85   :  { %v5622_v43 = vpop.f32.mrb[26].mxu1 }
 0xd86   :  { %v2205_v46 = vpop.f32.mrb[27].mxu1 }
 0xd87   :  { %v2206_v44 = vadd.f32 %v2205_v46, %v2046_v34 }
 0xd89   :  { %4578 = vmatprep.subr.mxu0 %v2206_v44  ;;  %v4571_v21 = vpop.f32.mrb[28].mxu1 }
 0xd8a   :  { %4579 = vmatpush3.msra.mxu0 %v2206_v44  ;;  %v2215_v5 = vpop.f32.mrb[29].mxu1 }
 0xd8b   :  { %4768 = vmatprep.subr.bf16.mxu0 %v4968_v60 }
 0xd8d   :  { %v5674_v6 = vpop.f32.mrb[30].mxu1 }
 0xd8e   :  { %v2225_v57 = vpop.f32.mrb[31].mxu1 }
 0xe01   :  { %v2260_v15 = vpop.trf.xlu0 }
 0xe02   :  { %4580 = vmatprep.mubr.msk.f32.mxu0 %vm444_vm2, %v2260_v15 }
 0xe05   :  { %v2261_v54 = vpop.trf.xlu0 }
 0xe06   :  { %4581 = vmatmul.mubr.msk.f32.vlgmr.msra.gmra.mrb[22].mxu0 %vm444_vm2, %v2261_v54 }
 0xe07   :  { %4587 = vmatprep.mubr.msk.f32.mxu0 %vm4969_vm3, %v4970_v61 }
 0xed9   :  { %v4582_v14 = vpop.f32.mrb[22].mxu0 }
 0xeda   :  { %v2358_v31 = vmul.f32 0.35355338, %v4582_v14  ;;  %v2348_v48 = vpop.f32.mrb[23].mxu0 }
 0xedb   :  { %v2357_v50 = vmul.f32 0.35355338, %v2348_v48 }
 0xedc   :  { %v2360_v59 = vadd.f32 %v5648_v33, %v2358_v31 }
 0xedd   :  { %v2359_v12 = vadd.f32 %v5654_v63, %v2357_v50  ;;  %v5711_v50 = vpop.f32.mrb[32].mxu1 }
 0xede   :  { %v2364_v0 = vsel %vm74_vm0, %v2360_v59, -inf }
 0xedf   :  { %2365 = vmax.xlane.f32.xlu0 %v2364_v0  ;;  %v2361_v53 = vsel %vm74_vm0, %v2359_v12, -inf }
 0xee0   :  { %2362 = vmax.xlane.f32.xlu1 %v2361_v53 }
 0xef1   :  { %2030 = vperm.xlu1 %4834, %v4159_v39  }
 0xef5   :  { %2040 = vperm.xlu0 %4833, %v4161_v2   ;;  %2035 = vperm.xlu1 %4834, %v4160_v3  }
 0xef9   :  { %2050 = vperm.xlu0 %4833, %v4163_v42   ;;  %2065 = vperm.xlu1 %4834, %v4166_v22  }
 0xf6c   :  { %v2366_v52 = vpop.xlane.xlu0 %2365 }
 0xf6d   :  { %v2368_v55 = vsub.f32 %v2360_v59, %v2366_v52  ;;  %v2363_v56 = vpop.xlane.xlu1 %2362  ;;  %v5713_v59 = vpop.f32.mrb[33].mxu1 }
 0xf6e   :  { %v2367_v58 = vsub.f32 %v2359_v12, %v2363_v56 }
 0xf6f   :  { %v2371_v4 = vmul.f32 1.442695, %v2368_v55 }
 0xf70   :  { %v2369_v7 = vmul.f32 1.442695, %v2367_v58 }
 0xf71   :  { %4889 = vpow2.f32 %v2371_v4  ;;  %v2031_v25 = vpop.permute.xlu1 %2030 }
 0xf72   :  { %4891 = vpow2.f32 %v2369_v7  ;;  %v2191_v1 = vadd.f32 %v5616_v13, %v2031_v25 }
 0xf74   :  { %v2041_v26 = vpop.permute.xlu0 %2040 }
 0xf75   :  { %v2036_v29 = vpop.permute.xlu1 %2035  ;;  %v2201_v30 = vadd.f32 %v5618_v41, %v2041_v26 }
 0xf76   :  { %v2196_v32 = vadd.f32 %v5620_v37, %v2036_v29 }
 0xf78   :  { %v2051_v38 = vpop.permute.xlu0 %2050 }
 0xf79   :  { %v2066_v9 = vpop.permute.xlu1 %2065  ;;  %v2211_v44 = vadd.f32 %v5622_v43, %v2051_v38 }
 0xf7a   :  { %v2226_v45 = vadd.f32 %v2225_v57, %v2066_v9 }
 0xf7b   :  { %v4890_v16 = vpop.eup %4889 }
 0xf7c   :  { %v4892_v17 = vpop.eup %4891  ;;  %v2376_v19 = vsel %vm74_vm0, %v4890_v16, 0.0 }
 0xf7d   :  { %2377 = vadd.xlane.f32.xlu0 %v2376_v19  ;;  %v2373_v20 = vsel %vm74_vm0, %v4892_v17, 0.0 }
 0xf7e   :  { %2374 = vadd.xlane.f32.xlu1 %v2373_v20 }
 0xf8f   :  { %2060 = vperm.xlu1 %4834, %v4165_v23  }
 0xf93   :  { %2055 = vperm.xlu0 %4833, %v4164_v24  }
 0xfb1   :  { %2462 = vxpose.xlu0.b32.start.end [1/1] (short) (narrow) %v2191_v1, 16 }
 0xfb6   :  { %2898 = vxpose.xlu0.b32.start.end [1/1] (short) (narrow) %v2201_v30, 16 }
 0xfb8   :  { %2680 = vxpose.xlu1.b32.start.end [1/1] (short) (narrow) %v2196_v32, 16 }
0x100a   :  { %v2378_v13 = vpop.xlane.xlu0 %2377 }
0x100b   :  { %4893 = vrcp.f32 %v2378_v13  ;;  %v2375_v10 = vpop.xlane.xlu1 %2374 }
0x100c   :  { %4895 = vrcp.f32 %v2375_v10 }
0x100f   :  { %v2061_v8 = vpop.permute.xlu1 %2060 }
0x1010   :  { %v2221_v34 = vadd.f32 %v4571_v21, %v2061_v8 }
0x1012   :  { %v2056_v40 = vpop.permute.xlu0 %2055 }
0x1013   :  { %v2216_v41 = vadd.f32 %v2215_v5, %v2056_v40 }
0x1015   :  { %v4894_v37 = vpop.eup %4893  ;;  %4602 = vmatprep.subr.mxu1 %v2216_v41 }
0x1016   :  { %v4896_v46 = vpop.eup %4895  ;;  %v2382_v47 = vmul.f32 %v4894_v37, %v4890_v16  ;;  %4603 = vmatpush3.msra.mxu1 %v2216_v41 }
0x1017   :  { %v2381_v49 = vmul.f32 %v4896_v46, %v4892_v17  ;;  %4614 = vmatprep.subr.mxu1 %v2221_v34 }
0x1019   :  { %v4769_v51 = vpack.c.bf16 %v2382_v47, %v2381_v49 }
0x101b   :  { %4771 = vmatpush3.bf16.xpose.msk.msra.mxu0 %vm5217_vm4, %v4769_v51 }
0x101c   :  { %4590 = vmatprep.subr.mxu0 %v2211_v44 }
0x1022   :  { %4588 = vmatmul.mubr.msk.f32.vlgmr.msra.gmra.mrb[24].mxu0 %vm74_vm0, %v2226_v45 }
0x1023   :  { %4591 = vmatpush3.msra.mxu0 %v2211_v44 }
0x1024   :  { %4772 = vmatprep.subr.bf16.mxu0 %v4968_v60 }
0x1031   :  { %v2478_v15 = vpop.trf.xlu0 }
0x1032   :  { %4592 = vmatprep.mubr.msk.f32.mxu0 %vm444_vm2, %v2478_v15 }
0x1035   :  { %v2479_v54 = vpop.trf.xlu0 }
0x1036   :  { %4593 = vmatmul.mubr.msk.f32.vlgmr.msra.gmra.mrb[26].mxu0 %vm444_vm2, %v2479_v54 }
0x1037   :  { %4599 = vmatprep.mubr.msk.f32.mxu0 %vm4969_vm3, %v4970_v61 }
0x1038   :  { %v2696_v43 = vpop.trf.xlu1 }
0x1039   :  { %v2914_v14 = vpop.trf.xlu0  ;;  %4604 = vmatprep.mubr.msk.f32.mxu1 %vm444_vm2, %v2696_v43 }
0x103c   :  { %v2697_v31 = vpop.trf.xlu1 }
0x103d   :  { %4605 = vmatmul.mubr.msk.f32.vlgmr.msra.gmra.mrb[34].mxu1 %vm444_vm2, %v2697_v31  ;;  %v2915_v48 = vpop.trf.xlu0 }
0x103e   :  { %4615 = vmatpush3.msra.mxu1 %v2221_v34  ;;  %4616 = vmatprep.mubr.msk.f32.mxu1 %vm444_vm2, %v2914_v14 }
0x103f   :  { %4780 = vmatprep.subr.bf16.mxu1 %v4968_v60 }
0x1041   :  { %4617 = vmatmul.mubr.msk.f32.vlgmr.msra.gmra.mrb[36].mxu1 %vm444_vm2, %v2915_v48 }
0x1042   :  { %4623 = vmatprep.mubr.msk.f32.mxu1 %vm4969_vm3, %v4970_v61 }
0x10f5   :  { %v5715_v12 = vpop.f32.mrb[24].mxu0 }
0x10f6   :  { %v4589_v0 = vpop.f32.mrb[25].mxu0 }
0x1109   :  { %v4594_v53 = vpop.f32.mrb[26].mxu0 }
0x110a   :  { %v2576_v39 = vmul.f32 0.35355338, %v4594_v53  ;;  %v2566_v2 = vpop.f32.mrb[27].mxu0 }
0x110b   :  { %v2575_v3 = vmul.f32 0.35355338, %v2566_v2  ;;  %v4169_v2 = vld [vmem:[%s6082_s5 + $0xb8] sm:$0xff] }
0x110c   :  { %v2578_v42 = vadd.f32 %v5648_v33, %v2576_v39  ;;  %v4168_v39 = vld [vmem:[%s6082_s5 + $0xb0] sm:$0xff] }
0x110d   :  { %v2577_v22 = vadd.f32 %v5654_v63, %v2575_v3  ;;  %v4167_v3 = vld [vmem:[%s6082_s5 + $0xa8] sm:$0xff] }
0x110e   :  { %v2582_v21 = vsel %vm74_vm0, %v2578_v42, -inf }
0x110f   :  { %2583 = vmax.xlane.f32.xlu1 %v2582_v21  ;;  %v2579_v5 = vsel %vm74_vm0, %v2577_v22, -inf  ;;  %v4209_v21 = vld [vmem:[%s6084_s7 + $0x38] sm:$0xff] }
0x1110   :  { %2580 = vmax.xlane.f32.xlu0 %v2579_v5  ;;  %v4606_v57 = vpop.f32.mrb[34].mxu1  ;;  %v4208_v5 = vld [vmem:[%s6084_s7 + $0x30] sm:$0xff] }
0x1111   :  { %v2794_v52 = vmul.f32 0.35355338, %v4606_v57  ;;  %v2784_v55 = vpop.f32.mrb[35].mxu1  ;;  %v4215_v57 = vld [vmem:[%s6085_s8 + $0x28] sm:$0xff] }
0x1112   :  { %v2793_v56 = vmul.f32 0.35355338, %v2784_v55  ;;  %v4219_v55 = vld [vmem:[%s6086_s9 + $0x28] sm:$0xff] }
0x1113   :  { %v2796_v58 = vadd.f32 %v5648_v33, %v2794_v52  ;;  %v4214_v52 = vld [vmem:[%s6085_s8 + $0x20] sm:$0xff] }
0x1114   :  { %v2795_v4 = vadd.f32 %v5654_v63, %v2793_v56  ;;  %v4618_v7 = vpop.f32.mrb[36].mxu1  ;;  %v4218_v56 = vld [vmem:[%s6086_s9 + $0x20] sm:$0xff] }
0x1115   :  { %v3012_v16 = vmul.f32 0.35355338, %v4618_v7  ;;  %v3002_v17 = vpop.f32.mrb[37].mxu1  ;;  %v2800_v19 = vsel %vm74_vm0, %v2796_v58, -inf  ;;  %v4221_v7 = vld [vmem:[%s6086_s9 + $0x38] sm:$0xff] }
0x1116   :  { %v3011_v20 = vmul.f32 0.35355338, %v3002_v17  ;;  %2801 = vmax.xlane.f32.xlu1 %v2800_v19  ;;  %v2797_v23 = vsel %vm74_vm0, %v2795_v4, -inf  ;;  %v4231_v17 = vld [vmem:[%s6088_s11 + $0x48] sm:$0xff]  ;;  %v4230_v19 = vld [vmem:[%s6088_s11 + $0x40] sm:$0xff] }
0x1117   :  { %2798 = vmax.xlane.f32.xlu0 %v2797_v23  ;;  %v3014_v24 = vadd.f32 %v5648_v33, %v3012_v16  ;;  %v4220_v16 = vld [vmem:[%s6086_s9 + $0x30] sm:$0xff]  ;;  %s4090_s9 = sshll.u32 %s4971_s0, 4  ;;  %s4091_s9 = int_to_ptr.vmem [resolvable:$true] %s4090_s9 }
0x1118   :  { %v3013_v25 = vadd.f32 %v5654_v63, %v3011_v20  ;;  %v4233_v20 = vld [vmem:[%s6088_s11 + $0x58] sm:$0xff]  ;;  %v4232_v23 = vld [vmem:[%s6088_s11 + $0x50] sm:$0xff]  ;;  %s4943_s4 = scalar_lea.vmem %s4091_s9, 32  ;;  %p4948_p1 = scmp.lt.s32.totalorder %s4091_s9, %s4091_s9 }
0x1119   :  { %v3018_v1 = vsel %vm74_vm0, %v3014_v24, -inf  ;;  %p4944_p0 = scmp.ne.s32.totalorder %s4091_s9, %s4943_s4  ;;  %p4949_p2 = scmp.lt.s32.totalorder %s4943_s4, %s4943_s4 }
0x111a   :  { %3019 = vmax.xlane.f32.xlu1 %v3018_v1  ;;  %v3015_v26 = vsel %vm74_vm0, %v3013_v25, -inf  ;;  %v4237_v1 = vld [vmem:[%s6088_s11 + $0x78] sm:$0xff] }
0x111b   :  { %3016 = vmax.xlane.f32.xlu0 %v3015_v26  ;;  %v4236_v26 = vld [vmem:[%s6088_s11 + $0x70] sm:$0xff]  ;;  %p4950_p3 = por %p4949_p2, %p4948_p1 }
0x111d   :  { %p4951_p4 = pnand %p4950_p3, %p4944_p0 }
0x119c   :  { %v2584_v29 = vpop.xlane.xlu1 %2583 }
0x119d   :  { %v2581_v30 = vpop.xlane.xlu0 %2580  ;;  %v2586_v9 = vsub.f32 %v2578_v42, %v2584_v29  ;;  %v4207_v42 = vld [vmem:[%s6084_s7 + $0x28] sm:$0xff] }
0x119e   :  { %v2585_v10 = vsub.f32 %v2577_v22, %v2581_v30  ;;  %v4206_v22 = vld [vmem:[%s6084_s7 + $0x20] sm:$0xff]  ;;  %v4251_v29 = vld [vmem:[%s6090_s13 + $0x28] sm:$0xff] }
0x119f   :  { %v2589_v37 = vmul.f32 1.442695, %v2586_v9  ;;  %v4250_v30 = vld [vmem:[%s6090_s13 + $0x20] sm:$0xff]  ;;  %v4260_v9 = vld [vmem:[%s6091_s14 + $0x30] sm:$0xff] }
0x11a0   :  { %v2587_v46 = vmul.f32 1.442695, %v2585_v10  ;;  %v4261_v10 = vld [vmem:[%s6091_s14 + $0x38] sm:$0xff] }
0x11a3   :  { %v2802_v32 = vpop.xlane.xlu1 %2801 }
0x11a4   :  { %v2804_v35 = vsub.f32 %v2796_v58, %v2802_v32  ;;  %v2799_v36 = vpop.xlane.xlu0 %2798  ;;  %v4217_v58 = vld [vmem:[%s6085_s8 + $0x38] sm:$0xff] }
0x11a5   :  { %v2803_v38 = vsub.f32 %v2795_v4, %v2799_v36  ;;  %v4216_v4 = vld [vmem:[%s6085_s8 + $0x30] sm:$0xff]  ;;  %v4253_v32 = vld [vmem:[%s6090_s13 + $0x38] sm:$0xff]  ;;  %v4259_v36 = vld [vmem:[%s6091_s14 + $0x28] sm:$0xff] }
0x11a6   :  { %v2807_v13 = vmul.f32 1.442695, %v2804_v35  ;;  %v4252_v35 = vld [vmem:[%s6090_s13 + $0x30] sm:$0xff] }
0x11a7   :  { %v2805_v8 = vmul.f32 1.442695, %v2803_v38  ;;  %v3020_v40 = vpop.xlane.xlu1 %3019  ;;  %v4258_v38 = vld [vmem:[%s6091_s14 + $0x20] sm:$0xff] }
0x11a8   :  { %4897 = vpow2.f32 %v2807_v13  ;;  %v3022_v33 = vsub.f32 %v3014_v24, %v3020_v40  ;;  %v3017_v63 = vpop.xlane.xlu0 %3016  ;;  %v4235_v24 = vld [vmem:[%s6088_s11 + $0x68] sm:$0xff]  ;;  %v4262_v13 = vld [vmem:[%s6092_s15 + $0x20] sm:$0xff]  ;;  %v4265_v40 = vld [vmem:[%s6092_s15 + $0x38] sm:$0xff] }
0x11a9   :  { %4899 = vpow2.f32 %v2805_v8  ;;  %v3021_v41 = vsub.f32 %v3013_v25, %v3017_v63  ;;  %v4234_v25 = vld [vmem:[%s6088_s11 + $0x60] sm:$0xff]  ;;  %v4263_v8 = vld [vmem:[%s6092_s15 + $0x28] sm:$0xff] }
0x11aa   :  { %v3025_v34 = vmul.f32 1.442695, %v3022_v33  ;;  %v4264_v33 = vld [vmem:[%s6092_s15 + $0x30] sm:$0xff] }
0x11ab   :  { %v3023_v47 = vmul.f32 1.442695, %v3021_v41 }
0x11ac   :  { %4901 = vpow2.f32 %v3025_v34 }
0x11ad   :  { %4903 = vpow2.f32 %v3023_v47 }
0x11ae   :  { %4905 = vpow2.f32 %v2589_v37 }
0x11af   :  { %4907 = vpow2.f32 %v2587_v46 }
0x11b2   :  { %v5729_v49 = vpop.eup %4897 }
0x11b3   :  { %v5731_v51 = vpop.eup %4899  ;;  %v2812_v44 = vsel %vm74_vm0, %v5729_v49, 0.0 }
0x11b4   :  { %2813 = vadd.xlane.f32.xlu1 %v2812_v44  ;;  %v2809_v45 = vsel %vm74_vm0, %v5731_v51, 0.0 }
0x11b5   :  { %2810 = vadd.xlane.f32.xlu0 %v2809_v45 }
0x11b6   :  { %v5737_v15 = vpop.eup %4901 }
0x11b7   :  { %v5739_v54 = vpop.eup %4903  ;;  %v3030_v43 = vsel %vm74_vm0, %v5737_v15, 0.0 }
0x11b8   :  { %v5743_v14 = vpop.eup %4905  ;;  %3031 = vadd.xlane.f32.xlu1 %v3030_v43  ;;  %v3027_v31 = vsel %vm74_vm0, %v5739_v54, 0.0 }
0x11b9   :  { %v5747_v48 = vpop.eup %4907  ;;  %3028 = vadd.xlane.f32.xlu0 %v3027_v31  ;;  %v2594_v0 = vsel %vm74_vm0, %v5743_v14, 0.0 }
0x11ba   :  { %v2591_v53 = vsel %vm74_vm0, %v5747_v48, 0.0 }
0x11bc   :  { %2595 = vadd.xlane.f32.xlu1 %v2594_v0 }
0x11bd   :  { %2592 = vadd.xlane.f32.xlu0 %v2591_v53 }
0x11cd   :  { %2075 = vperm.xlu1 %4834, %v4168_v39  }
0x11d1   :  { %2080 = vperm.xlu1 %4834, %v4169_v2  }
0x11d3   :  { %2070 = vperm.xlu0 %4833, %v4167_v3  }
0x11d5   :  { %3133 = vperm.xlu1 %4834, %v4207_v42  }
0x11d7   :  { %3128 = vperm.xlu0 %4833, %v4206_v22  }
0x11d9   :  { %3143 = vperm.xlu1 %4834, %v4209_v21  }
0x11db   :  { %3138 = vperm.xlu0 %4833, %v4208_v5  }
0x11dd   :  { %3306 = vperm.xlu1 %4834, %v4215_v57  }
0x11df   :  { %3301 = vperm.xlu0 %4833, %v4214_v52  }
0x11e1   :  { %3330 = vperm.xlu1 %4834, %v4219_v55  }
0x11e3   :  { %3325 = vperm.xlu0 %4833, %v4218_v56  }
0x11e5   :  { %3316 = vperm.xlu1 %4834, %v4217_v58  }
0x11e7   :  { %3311 = vperm.xlu0 %4833, %v4216_v4  }
0x11e9   :  { %3340 = vperm.xlu1 %4834, %v4221_v7  }
0x11eb   :  { %3335 = vperm.xlu0 %4833, %v4220_v16  }
0x11ed   :  { %3372 = vperm.xlu1 %4834, %v4231_v17   ;;  %v4204_v17 = vld [vmem:[%s6083_s6 + $0x30] sm:$0xff] }
0x11ef   :  { %3367 = vperm.xlu0 %4833, %v4230_v19   ;;  %v4222_v19 = vld [vmem:[%s6087_s10 + $0x40] sm:$0xff] }
0x11f1   :  { %3382 = vperm.xlu1 %4834, %v4233_v20  }
0x11f3   :  { %3377 = vperm.xlu0 %4833, %v4232_v23  }
0x11f5   :  { %3392 = vperm.xlu1 %4834, %v4235_v24  }
0x11f7   :  { %3387 = vperm.xlu0 %4833, %v4234_v25  }
0x11f9   :  { %3402 = vperm.xlu1 %4834, %v4237_v1  }
0x11fb   :  { %3397 = vperm.xlu0 %4833, %v4236_v26  }
0x11fd   :  { %3623 = vperm.xlu1 %4834, %v4251_v29  }
0x11ff   :  { %3618 = vperm.xlu0 %4833, %v4250_v30  }
0x1201   :  { %3633 = vperm.xlu1 %4834, %v4253_v32  }
0x1203   :  { %3628 = vperm.xlu0 %4833, %v4252_v35  }
0x1205   :  { %3796 = vperm.xlu1 %4834, %v4259_v36  }
0x1207   :  { %3791 = vperm.xlu0 %4833, %v4258_v38  }
0x1209   :  { %3801 = vperm.xlu1 %4834, %v4260_v9  }
0x120b   :  { %3815 = vperm.xlu0 %4833, %v4262_v13  }
0x120d   :  { %3806 = vperm.xlu1 %4834, %v4261_v10  }
0x120f   :  { %3820 = vperm.xlu0 %4833, %v4263_v8  }
0x1211   :  { %3830 = vperm.xlu1 %4834, %v4265_v40  }
0x1213   :  { %3825 = vperm.xlu0 %4833, %v4264_v33  }
0x1241   :  { %v2814_v63 = vpop.xlane.xlu1 %2813 }
0x1242   :  { %v2811_v41 = vpop.xlane.xlu0 %2810 }
0x1245   :  { %v3032_v37 = vpop.xlane.xlu1 %3031 }
0x1246   :  { %4909 = vrcp.f32 %v3032_v37  ;;  %v3029_v34 = vpop.xlane.xlu0 %3028 }
0x1247   :  { %4911 = vrcp.f32 %v3029_v34 }
0x1249   :  { %v2596_v46 = vpop.xlane.xlu1 %2595 }
0x124a   :  { %4913 = vrcp.f32 %v2596_v46  ;;  %v2593_v47 = vpop.xlane.xlu0 %2592 }
0x124b   :  { %4915 = vrcp.f32 %v2593_v47 }
0x124c   :  { %4917 = vrcp.f32 %v2814_v63 }
0x124d   :  { %4919 = vrcp.f32 %v2811_v41  ;;  %v2076_v0 = vpop.permute.xlu1 %2075 }
0x1250   :  { %v4910_v44 = vpop.eup %4909 }
0x1251   :  { %v4912_v45 = vpop.eup %4911  ;;  %v3036_v43 = vmul.f32 %v4910_v44, %v5737_v15  ;;  %v2081_v21 = vpop.permute.xlu1 %2080 }
0x1252   :  { %v3035_v31 = vmul.f32 %v4912_v45, %v5739_v54  ;;  %v2241_v15 = vadd.f32 %v5711_v50, %v2081_v21  ;;  %v2071_v52 = vpop.permute.xlu0 %2070  ;;  %v2236_v50 = vadd.f32 %v5713_v59, %v2076_v0  ;;  %v4203_v59 = vld [vmem:[%s6083_s6 + $0x28] sm:$0xff] }
0x1254   :  { %v4914_v53 = vpop.eup %4913  ;;  %v4781_v39 = vpack.c.bf16 %v3036_v43, %v3035_v31 }
0x1255   :  { %v4916_v2 = vpop.eup %4915  ;;  %v2600_v3 = vmul.f32 %v4914_v53, %v5743_v14  ;;  %v3134_v20 = vpop.permute.xlu1 %3133 }
0x1256   :  { %v2599_v42 = vmul.f32 %v4916_v2, %v5747_v48  ;;  %4783 = vmatpush3.bf16.xpose.msk.msra.mxu1 %vm5217_vm4, %v4781_v39  ;;  %v4918_v22 = vpop.eup %4917  ;;  %v2231_v48 = vadd.f32 %v5674_v6, %v2071_v52  ;;  %v3129_v23 = vpop.permute.xlu0 %3128 }
0x1257   :  { %v4920_v57 = vpop.eup %4919  ;;  %v2818_v54 = vmul.f32 %v4918_v22, %v5729_v49  ;;  %v4202_v49 = vld [vmem:[%s6083_s6 + $0x20] sm:$0xff] }
0x1258   :  { %v4773_v5 = vpack.c.bf16 %v2600_v3, %v2599_v42  ;;  %v2817_v14 = vmul.f32 %v4920_v57, %v5731_v51 }
0x1259   :  { %v3144_v30 = vpop.permute.xlu1 %3143 }
0x125a   :  { %4775 = vmatpush3.bf16.xpose.msk.msra.mxu0 %vm5217_vm4, %v4773_v5  ;;  %v4777_v55 = vpack.c.bf16 %v2818_v54, %v2817_v14  ;;  %v3139_v36 = vpop.permute.xlu0 %3138 }
0x125b   :  { %4776 = vmatprep.subr.bf16.mxu0 %v4968_v60 }
0x125d   :  { %4624 = vmatmul.mubr.msk.f32.vlgmr.msra.gmra.mrb[38].mxu1 %vm74_vm0, %v2241_v15 }
0x125e   :  { %4648 = vmatprep.mubr.msk.f32.mxu1 %vm250_vm1, %v4222_v19 }
0x1261   :  { %4600 = vmatmul.mubr.msk.f32.vlgmr.msra.gmra.mrb[28].mxu0 %vm74_vm0, %v2231_v48 }
0x1262   :  { %4779 = vmatpush3.bf16.xpose.msk.msra.mxu0 %vm5217_vm4, %v4777_v55  ;;  %4611 = vmatprep.mubr.msk.f32.mxu0 %vm4969_vm3, %v4970_v61 }
0x1269   :  { %4612 = vmatmul.mubr.msk.f32.vlgmr.msra.gmra.mrb[30].mxu0 %vm74_vm0, %v2236_v50 }
0x126a   :  { %4634 = vmatprep.mubr.msk.f32.mxu0 %vm250_vm1, %v4202_v49 }
0x1330   :  { %v3112_v6 = vpop.f32.mrb[38].mxu1 }
0x1331   :  { %v4625_v51 = vpop.f32.mrb[39].mxu1 }
0x1332   :  { %v3307_v51 = vpop.permute.xlu1 %3306 }
0x1334   :  { %v2676_v56 = vpop.f32.mrb[28].mxu0 }
0x1335   :  { %v4784_v58 = vpack.c.bf16 %v2676_v56, %v5715_v12  ;;  %v4601_v11 = vpop.f32.mrb[29].mxu0  ;;  %v4205_v12 = vld [vmem:[%s6083_s6 + $0x38] sm:$0xff]  ;;  %v3302_v56 = vpop.permute.xlu0 %3301 }
0x1337   :  { %4785 = vmatprep.subr.bf16.mxu0 %v4784_v58 }
0x1338   :  { %4787 = vmatpush3.bf16.msra.mxu0 %v4784_v58 }
0x133c   :  { %v2894_v4 = vpop.f32.mrb[30].mxu0 }
0x133d   :  { %v4788_v7 = vpack.c.bf16 %v3112_v6, %v2894_v4  ;;  %v4613_v16 = vpop.f32.mrb[31].mxu0  ;;  %v3331_v4 = vpop.permute.xlu1 %3330 }
0x133f   :  { %4789 = vmatprep.subr.bf16.mxu0 %v4788_v7 }
0x1340   :  { %4791 = vmatpush3.bf16.msra.mxu0 %v4788_v7  ;;  %v3326_v7 = vpop.permute.xlu0 %3325 }
0x1341   :  { %v3317_v16 = vpop.permute.xlu1 %3316 }
0x1343   :  { %4635 = vmatmul.mubr.msk.f32.vlgmr.msra.gmra.mrb[32].mxu0 %vm250_vm1, %v4203_v59 }
0x1344   :  { %4637 = vmatprep.mubr.msk.f32.mxu0 %vm250_vm1, %v4204_v17  ;;  %v3312_v59 = vpop.permute.xlu0 %3311 }
0x1347   :  { %4638 = vmatmul.mubr.msk.f32.gmra.mrb[34].mxu0 %vm250_vm1, %v4205_v12 }
0x1416   :  { %v4636_v24 = vpop.f32.mrb[32].mxu0 }
0x1417   :  { %v3230_v25 = vadd.f32 %v4636_v24, %v3134_v20  ;;  %v3224_v1 = vpop.f32.mrb[33].mxu0 }
0x1418   :  { %v3225_v26 = vadd.f32 %v3224_v1, %v3129_v23 }
0x1419   :  { %v3244_v29 = vadd.f32 %v3230_v25, %v5586_v27 }
0x141a   :  { %v3243_v32 = vadd.f32 %v3225_v26, %v5584_v62  ;;  %v4639_v35 = vpop.f32.mrb[34].mxu0 }
0x141b   :  { %v3258_v38 = vsel %vm74_vm0, %v3244_v29, 0.0  ;;  %v3240_v9 = vadd.f32 %v4639_v35, %v3144_v30  ;;  %v3234_v13 = vpop.f32.mrb[35].mxu0  ;;  %v3336_v30 = vpop.permute.xlu0 %3335 }
0x141c   :  { %v3257_v10 = vsel %vm74_vm0, %v3243_v32, 0.0  ;;  %v3235_v8 = vadd.f32 %v3234_v13, %v3139_v36 }
0x141d   :  { %v3259_v40 = vadd.f32 %v3258_v38, %v3257_v10  ;;  %v3246_v33 = vadd.f32 %v3240_v9, %v5590_v28  ;;  %v4223_v10 = vld [vmem:[%s6087_s10 + $0x48] sm:$0xff] }
0x141e   :  { %v3245_v63 = vadd.f32 %v3235_v8, %v5588_v18  ;;  %v4224_v8 = vld [vmem:[%s6087_s10 + $0x50] sm:$0xff] }
0x141f   :  { %v3262_v37 = vsel %vm74_vm0, %v3246_v33, 0.0 }
0x1420   :  { %v3260_v41 = vsel %vm74_vm0, %v3245_v63, 0.0 }
0x1421   :  { %v3261_v27 = vadd.f32 %v3260_v41, %v3259_v40  ;;  %v4225_v40 = vld [vmem:[%s6087_s10 + $0x58] sm:$0xff]  ;;  %v4228_v41 = vld [vmem:[%s6087_s10 + $0x70] sm:$0xff] }
0x1423   :  { %v3263_v62 = vadd.f32 %v3262_v37, %v3261_v27  ;;  %v4229_v27 = vld [vmem:[%s6087_s10 + $0x78] sm:$0xff]  ;;  %v4246_v37 = vld [vmem:[%s6089_s12 + $0x20] sm:$0xff] }
0x1424   :  { %4676 = vmatprep.mubr.msk.f32.mxu0 %vm1797_vm5, %v4246_v37 }
0x1425   :  { %v3264_v34 = vrot.slane %v3263_v62, 4 }
0x1427   :  { %v3265_v46 = vadd.f32 %v3264_v34, %v3263_v62  ;;  %v3368_v34 = vpop.permute.xlu0 %3367 }
0x1429   :  { %v3266_v47 = vrot.slane %v3265_v46, 2 }
0x142b   :  { %v3267_v44 = vadd.f32 %v3266_v47, %v3265_v46 }
0x142d   :  { %v3268_v45 = vrot.slane %v3267_v44, 1 }
0x142f   :  { %v3269_v43 = vadd.f32 %v3268_v45, %v3267_v44  ;;  %v3378_v44 = vpop.permute.xlu0 %3377 }
0x1431   :  { %v3270_v31 = vmul.f32 0.03125, %v3269_v43 }
0x1433   :  { %v3271_v0 = vsub.f32 %v3243_v32, %v3270_v31  ;;  %v3272_v53 = vsub.f32 %v3244_v29, %v3270_v31  ;;  %v3273_v39 = vsub.f32 %v3245_v63, %v3270_v31  ;;  %v3274_v2 = vsub.f32 %v3246_v33, %v3270_v31  ;;  %v3341_v29 = vpop.permute.xlu1 %3340  ;;  %v4226_v33 = vld [vmem:[%s6087_s10 + $0x60] sm:$0xff]  ;;  %v4227_v63 = vld [vmem:[%s6087_s10 + $0x68] sm:$0xff] }
0x1435   :  { %v3275_v28 = vmul.f32 %v3271_v0, %v3271_v0  ;;  %v3276_v3 = vmul.f32 %v3272_v53, %v3272_v53  ;;  %v3277_v18 = vmul.f32 %v3273_v39, %v3273_v39  ;;  %v3278_v42 = vmul.f32 %v3274_v2, %v3274_v2 }
0x1437   :  { %v3279_v22 = vsel %vm74_vm0, %v3275_v28, 0.0  ;;  %v3280_v21 = vsel %vm74_vm0, %v3276_v3, 0.0  ;;  %v3282_v57 = vsel %vm74_vm0, %v3277_v18, 0.0  ;;  %v3284_v54 = vsel %vm74_vm0, %v3278_v42, 0.0  ;;  %v3373_v62 = vpop.permute.xlu1 %3372 }
0x1438   :  { %v3281_v5 = vadd.f32 %v3280_v21, %v3279_v22  ;;  %v3388_v21 = vpop.permute.xlu0 %3387 }
0x143a   :  { %v3283_v15 = vadd.f32 %v3282_v57, %v3281_v5 }
0x143b   :  { %v3383_v46 = vpop.permute.xlu1 %3382 }
0x143c   :  { %v3285_v14 = vadd.f32 %v3284_v54, %v3283_v15 }
0x143e   :  { %v3286_v52 = vrot.slane %v3285_v14, 4 }
0x143f   :  { %v3393_v18 = vpop.permute.xlu1 %3392 }
0x1440   :  { %v3287_v48 = vadd.f32 %v3286_v52, %v3285_v14 }
0x1442   :  { %v3288_v55 = vrot.slane %v3287_v48, 2 }
0x1444   :  { %v3289_v50 = vadd.f32 %v3288_v55, %v3287_v48 }
0x1446   :  { %v3290_v49 = vrot.slane %v3289_v50, 1 }
0x1448   :  { %v3291_v6 = vadd.f32 %v3290_v49, %v3289_v50 }
0x144a   :  { %v3292_v58 = vmul.f32 0.03125, %v3291_v6 }
0x144c   :  { %v3293_v11 = vadd.f32 1e-12, %v3292_v58 }
0x144e   :  { %4921 = vrsqrt.f32 %v3293_v11 }
0x1458   :  { %v4922_v17 = vpop.eup %4921 }
0x1459   :  { %v3297_v12 = vmul.f32 %v4922_v17, %v3273_v39  ;;  %v3295_v19 = vmul.f32 %v4922_v17, %v3271_v0  ;;  %v3296_v20 = vmul.f32 %v4922_v17, %v3272_v53  ;;  %v3298_v23 = vmul.f32 %v4922_v17, %v3274_v2 }
0x145b   :  { %v3319_v24 = vmul.f32 %v3302_v56, %v3295_v19  ;;  %v3320_v25 = vmul.f32 %v3307_v51, %v3296_v20  ;;  %v3321_v1 = vmul.f32 %v3312_v59, %v3297_v12  ;;  %v3322_v26 = vmul.f32 %v3317_v16, %v3298_v23  ;;  %v3398_v12 = vpop.permute.xlu0 %3397 }
0x145d   :  { %v5912_v32 = vadd.f32 %v3326_v7, %v3319_v24  ;;  %v5914_v35 = vadd.f32 %v3331_v4, %v3320_v25  ;;  %v5916_v36 = vadd.f32 %v3336_v30, %v3321_v1  ;;  %v5918_v38 = vadd.f32 %v3341_v29, %v3322_v26  ;;  %v3403_v4 = vpop.permute.xlu1 %3402 }
0x145f   :  { %v4792_v9 = vpack.c.bf16 %v5914_v35, %v5912_v32  ;;  %v4796_v13 = vpack.c.bf16 %v5918_v38, %v5916_v36 }
0x1461   :  { %4793 = vmatprep.subr.bf16.mxu1 %v4792_v9 }
0x1462   :  { %4795 = vmatpush3.bf16.msra.mxu1 %v4792_v9 }
0x1463   :  { %4797 = vmatprep.subr.bf16.mxu1 %v4796_v13 }
0x1466   :  { %4799 = vmatpush3.bf16.msra.mxu1 %v4796_v13 }
0x1467   :  { %4816 = vmatprep.subr.bf16.mxu1 %v4968_v60 }
0x1469   :  { %4649 = vmatmul.mubr.msk.f32.vlgmr.msra.gmra.mrb[40].mxu1 %vm250_vm1, %v4223_v10 }
0x146a   :  { %4651 = vmatprep.mubr.msk.f32.mxu1 %vm250_vm1, %v4224_v8 }
0x146d   :  { %4652 = vmatmul.mubr.msk.f32.gmra.mrb[42].mxu1 %vm250_vm1, %v4225_v40 }
0x146e   :  { %4654 = vmatprep.mubr.msk.f32.mxu1 %vm250_vm1, %v4226_v33 }
0x1471   :  { %4655 = vmatmul.mubr.msk.f32.gmra.mrb[44].mxu1 %vm250_vm1, %v4227_v63 }
0x1472   :  { %4657 = vmatprep.mubr.msk.f32.mxu1 %vm250_vm1, %v4228_v41 }
0x1475   :  { %4658 = vmatmul.mubr.msk.f32.gmra.mrb[46].mxu1 %vm250_vm1, %v4229_v27 }
0x1476   :  { %4690 = vmatprep.mubr.msk.f32.mxu1 %vm4969_vm3, %v4970_v61 }
0x153c   :  { %v4650_v47 = vpop.f32.mrb[40].mxu1 }
0x153d   :  { %v5959_v45 = vadd.f32 %v4650_v47, %v3373_v62  ;;  %v3495_v43 = vpop.f32.mrb[41].mxu1 }
0x153e   :  { %v5961_v31 = vadd.f32 %v3495_v43, %v3368_v34 }
0x153f   :  { %v3543_v0 = vmul.f32 0.044715, %v5959_v45 }
0x1540   :  { %v3542_v53 = vmul.f32 0.044715, %v5961_v31  ;;  %v4653_v39 = vpop.f32.mrb[42].mxu1 }
0x1541   :  { %v3551_v2 = vmul.f32 %v3543_v0, %v5959_v45  ;;  %v5966_v28 = vadd.f32 %v4653_v39, %v3383_v46  ;;  %v3505_v3 = vpop.f32.mrb[43].mxu1 }
0x1542   :  { %v3550_v42 = vmul.f32 %v3542_v53, %v5961_v31  ;;  %v5969_v22 = vadd.f32 %v3505_v3, %v3378_v44  ;;  %v3535_v53 = vmul.f32 0.5, %v5959_v45  ;;  %v3534_v3 = vmul.f32 0.5, %v5961_v31 }
0x1543   :  { %v3559_v5 = vmul.f32 %v3551_v2, %v5959_v45  ;;  %v3545_v57 = vmul.f32 0.044715, %v5966_v28 }
0x1544   :  { %v3558_v15 = vmul.f32 %v3550_v42, %v5961_v31  ;;  %v3544_v54 = vmul.f32 0.044715, %v5969_v22  ;;  %v4656_v14 = vpop.f32.mrb[44].mxu1 }
0x1545   :  { %v3553_v52 = vmul.f32 %v3545_v57, %v5966_v28  ;;  %v5976_v48 = vadd.f32 %v4656_v14, %v3393_v18  ;;  %v3515_v55 = vpop.f32.mrb[45].mxu1  ;;  %v3567_v50 = vadd.f32 %v3559_v5, %v5959_v45 }
0x1546   :  { %v3552_v49 = vmul.f32 %v3544_v54, %v5969_v22  ;;  %v5980_v6 = vadd.f32 %v3515_v55, %v3388_v21  ;;  %v3566_v51 = vadd.f32 %v3558_v15, %v5961_v31  ;;  %v3537_v15 = vmul.f32 0.5, %v5966_v28 }
0x1547   :  { %v3561_v56 = vmul.f32 %v3553_v52, %v5966_v28  ;;  %v3547_v58 = vmul.f32 0.044715, %v5976_v48  ;;  %v3575_v11 = vmul.f32 0.7978846, %v3567_v50  ;;  %v3536_v52 = vmul.f32 0.5, %v5969_v22 }
0x1548   :  { %v3560_v7 = vmul.f32 %v3552_v49, %v5969_v22  ;;  %v3546_v16 = vmul.f32 0.044715, %v5980_v6  ;;  %v4659_v59 = vpop.f32.mrb[46].mxu1  ;;  %v3574_v17 = vmul.f32 0.7978846, %v3566_v51  ;;  %v3539_v31 = vmul.f32 0.5, %v5976_v48 }
0x1549   :  { %v3555_v19 = vmul.f32 %v3547_v58, %v5976_v48  ;;  %v5988_v20 = vadd.f32 %v4659_v59, %v3403_v4  ;;  %v3525_v23 = vpop.f32.mrb[47].mxu1  ;;  %4923 = vtanh.f32 %v3575_v11  ;;  %v3569_v24 = vadd.f32 %v3561_v56, %v5966_v28 }
0x154a   :  { %v3554_v25 = vmul.f32 %v3546_v16, %v5980_v6  ;;  %v3526_v1 = vadd.f32 %v3525_v23, %v3398_v12  ;;  %4925 = vtanh.f32 %v3574_v17  ;;  %v3568_v26 = vadd.f32 %v3560_v7, %v5969_v22 }
0x154b   :  { %v3563_v29 = vmul.f32 %v3555_v19, %v5976_v48  ;;  %v3549_v30 = vmul.f32 0.044715, %v5988_v20  ;;  %v3577_v9 = vmul.f32 0.7978846, %v3569_v24  ;;  %v3538_v11 = vmul.f32 0.5, %v5980_v6 }
0x154c   :  { %v3562_v13 = vmul.f32 %v3554_v25, %v5980_v6  ;;  %v3548_v10 = vmul.f32 0.044715, %v3526_v1  ;;  %v3576_v8 = vmul.f32 0.7978846, %v3568_v26  ;;  %v3541_v22 = vmul.f32 0.5, %v5988_v20  ;;  %v4248_v26 = vld [vmem:[%s6089_s12 + $0x30] sm:$0xff] }
0x154d   :  { %v3557_v40 = vmul.f32 %v3549_v30, %v5988_v20  ;;  %4927 = vtanh.f32 %v3577_v9  ;;  %v3571_v33 = vadd.f32 %v3563_v29, %v5976_v48  ;;  %v3540_v19 = vmul.f32 0.5, %v3526_v1  ;;  %v3619_v29 = vpop.permute.xlu0 %3618 }
0x154e   :  { %v3556_v63 = vmul.f32 %v3548_v10, %v3526_v1  ;;  %4929 = vtanh.f32 %v3576_v8  ;;  %v3570_v41 = vadd.f32 %v3562_v13, %v5980_v6  ;;  %v4247_v6 = vld [vmem:[%s6089_s12 + $0x28] sm:$0xff] }
0x154f   :  { %v3565_v27 = vmul.f32 %v3557_v40, %v5988_v20  ;;  %v3579_v37 = vmul.f32 0.7978846, %v3571_v33 }
0x1550   :  { %v3564_v62 = vmul.f32 %v3556_v63, %v3526_v1  ;;  %v3578_v34 = vmul.f32 0.7978846, %v3570_v41 }
0x1551   :  { %4931 = vtanh.f32 %v3579_v37  ;;  %v3573_v46 = vadd.f32 %v3565_v27, %v5988_v20  ;;  %v4249_v20 = vld [vmem:[%s6089_s12 + $0x38] sm:$0xff]  ;;  %v3629_v41 = vpop.permute.xlu0 %3628 }
0x1552   :  { %4933 = vtanh.f32 %v3578_v34  ;;  %v3572_v47 = vadd.f32 %v3564_v62, %v3526_v1  ;;  %v3624_v1 = vpop.permute.xlu1 %3623 }
0x1553   :  { %v4924_v44 = vpop.eup %4923  ;;  %v3581_v43 = vmul.f32 0.7978846, %v3573_v46 }
0x1554   :  { %v4926_v0 = vpop.eup %4925  ;;  %v3591_v39 = vadd.f32 1.0, %v4924_v44  ;;  %v3580_v2 = vmul.f32 0.7978846, %v3572_v47 }
0x1555   :  { %v3590_v18 = vadd.f32 1.0, %v4926_v0  ;;  %4935 = vtanh.f32 %v3581_v43 }
0x1556   :  { %v3599_v42 = vmul.f32 %v3591_v39, %v3535_v53  ;;  %4937 = vtanh.f32 %v3580_v2  ;;  %v3634_v40 = vpop.permute.xlu1 %3633 }
0x1557   :  { %v4928_v21 = vpop.eup %4927  ;;  %v3598_v5 = vmul.f32 %v3590_v18, %v3534_v3 }
0x1558   :  { %v4930_v57 = vpop.eup %4929  ;;  %v3593_v54 = vadd.f32 1.0, %v4928_v21 }
0x1559   :  { %v4800_v14 = vpack.c.bf16 %v3599_v42, %v3598_v5  ;;  %v3592_v55 = vadd.f32 1.0, %v4930_v57 }
0x155a   :  { %v3601_v50 = vmul.f32 %v3593_v54, %v3537_v15 }
0x155b   :  { %v4932_v45 = vpop.eup %4931  ;;  %4801 = vmatprep.subr.bf16.mxu0 %v4800_v14  ;;  %v3600_v49 = vmul.f32 %v3592_v55, %v3536_v52 }
0x155c   :  { %v4934_v51 = vpop.eup %4933  ;;  %4803 = vmatpush3.bf16.msra.mxu0 %v4800_v14  ;;  %v3595_v56 = vadd.f32 1.0, %v4932_v45 }
0x155d   :  { %v4804_v58 = vpack.c.bf16 %v3601_v50, %v3600_v49  ;;  %v3594_v4 = vadd.f32 1.0, %v4934_v51 }
0x155e   :  { %v3603_v7 = vmul.f32 %v3595_v56, %v3539_v31 }
0x155f   :  { %v4936_v28 = vpop.eup %4935  ;;  %4805 = vmatprep.subr.bf16.mxu0 %v4804_v58  ;;  %v3602_v16 = vmul.f32 %v3594_v4, %v3538_v11 }
0x1560   :  { %v4938_v59 = vpop.eup %4937  ;;  %4807 = vmatpush3.bf16.msra.mxu0 %v4804_v58  ;;  %v3597_v17 = vadd.f32 1.0, %v4936_v28 }
0x1561   :  { %v4808_v12 = vpack.c.bf16 %v3603_v7, %v3602_v16  ;;  %v3596_v23 = vadd.f32 1.0, %v4938_v59 }
0x1562   :  { %v3605_v24 = vmul.f32 %v3597_v17, %v3541_v22  ;;  %v3792_v22 = vpop.permute.xlu0 %3791 }
0x1563   :  { %4809 = vmatprep.subr.bf16.mxu0 %v4808_v12  ;;  %v3604_v48 = vmul.f32 %v3596_v23, %v3540_v19 }
0x1564   :  { %4811 = vmatpush3.bf16.msra.mxu0 %v4808_v12  ;;  %v3797_v12 = vpop.permute.xlu1 %3796 }
0x1565   :  { %v4812_v25 = vpack.c.bf16 %v3605_v24, %v3604_v48 }
0x1566   :  { %v3816_v19 = vpop.permute.xlu0 %3815 }
0x1567   :  { %4813 = vmatprep.subr.bf16.mxu0 %v4812_v25 }
0x1568   :  { %4815 = vmatpush3.bf16.msra.mxu0 %v4812_v25  ;;  %v3802_v23 = vpop.permute.xlu1 %3801 }
0x1569   :  { %4822 = vmatprep.subr.bf16.mxu0 %v4968_v60 }
0x156a   :  { %v3821_v48 = vpop.permute.xlu0 %3820 }
0x156b   :  { %4677 = vmatmul.mubr.msk.f32.vlgmr.msra.gmra.mrb[36].mxu0 %vm1797_vm5, %v4247_v6 }
0x156c   :  { %4679 = vmatprep.mubr.msk.f32.mxu0 %vm1797_vm5, %v4248_v26 }
0x156f   :  { %4680 = vmatmul.mubr.msk.f32.gmra.mrb[38].mxu0 %vm1797_vm5, %v4249_v20 }
0x1570   :  { %4701 = vmatprep.mubr.msk.f32.mxu0 %vm4969_vm3, %v4970_v61 }
0x163e   :  { %v4678_v30 = vpop.f32.mrb[36].mxu0 }
0x163f   :  { %v3720_v9 = vadd.f32 %v4678_v30, %v3624_v1  ;;  %v3714_v13 = vpop.f32.mrb[37].mxu0 }
0x1640   :  { %v3715_v10 = vadd.f32 %v3714_v13, %v3619_v29 }
0x1641   :  { %v3734_v8 = vadd.f32 %v3720_v9, %v5914_v35  ;;  %v3807_v9 = vpop.permute.xlu1 %3806 }
0x1642   :  { %v3733_v33 = vadd.f32 %v3715_v10, %v5912_v32  ;;  %v4681_v63 = vpop.f32.mrb[38].mxu0  ;;  %v3826_v10 = vpop.permute.xlu0 %3825 }
0x1643   :  { %v3748_v27 = vsel %vm74_vm0, %v3734_v8, 0.0  ;;  %v3730_v37 = vadd.f32 %v4681_v63, %v3634_v40  ;;  %v3724_v62 = vpop.f32.mrb[39].mxu0 }
0x1644   :  { %v3747_v34 = vsel %vm74_vm0, %v3733_v33, 0.0  ;;  %v3725_v61 = vadd.f32 %v3724_v62, %v3629_v41 }
0x1645   :  { %v3749_v46 = vadd.f32 %v3748_v27, %v3747_v34  ;;  %v3736_v47 = vadd.f32 %v3730_v37, %v5918_v38  ;;  %v3831_v27 = vpop.permute.xlu1 %3830 }
0x1646   :  { %v3735_v44 = vadd.f32 %v3725_v61, %v5916_v36 }
0x1647   :  { %v3752_v0 = vsel %vm74_vm0, %v3736_v47, 0.0 }
0x1648   :  { %v3750_v43 = vsel %vm74_vm0, %v3735_v44, 0.0 }
0x1649   :  { %v3751_v35 = vadd.f32 %v3750_v43, %v3749_v46  ;;  %v3849_v43 = vld [vmem:[%s6093_s16] sm:$0xff] }
0x164b   :  { %v3753_v32 = vadd.f32 %v3752_v0, %v3751_v35  ;;  %v3850_v35 = vld [vmem:[%s6093_s16 + $0x8] sm:$0xff]  ;;  %v3851_v0 = vld [vmem:[%s6093_s16 + $0x10] sm:$0xff] }
0x164d   :  { %v3754_v53 = vrot.slane %v3753_v32, 4 }
0x164f   :  { %v3755_v39 = vadd.f32 %v3754_v53, %v3753_v32  ;;  %v4817_v32 = vpack.c.bf16 %v3850_v35, %v3849_v43  ;;  %v3852_v53 = vld [vmem:[%s6093_s16 + $0x18] sm:$0xff] }
0x1651   :  { %v3756_v2 = vrot.slane %v3755_v39, 2  ;;  %4818 = vmatpush3.bf16.msra.mxu1 %v4817_v32  ;;  %4824 = vmatpush3.bf16.msra.mxu0 %v4817_v32 }
0x1652   :  { %4819 = vmatprep.subr.bf16.mxu1 %v4968_v60  ;;  %4825 = vmatprep.subr.bf16.mxu0 %v4968_v60 }
0x1653   :  { %v3757_v3 = vadd.f32 %v3756_v2, %v3755_v39  ;;  %v4820_v39 = vpack.c.bf16 %v3852_v53, %v3851_v0 }
0x1655   :  { %v3758_v18 = vrot.slane %v3757_v3, 1  ;;  %4821 = vmatpush3.bf16.msra.mxu1 %v4820_v39  ;;  %4827 = vmatpush3.bf16.msra.mxu0 %v4820_v39 }
0x1657   :  { %v3759_v42 = vadd.f32 %v3758_v18, %v3757_v3 }
0x1659   :  { %v3760_v21 = vmul.f32 0.03125, %v3759_v42 }
0x165b   :  { %v3761_v5 = vsub.f32 %v3733_v33, %v3760_v21  ;;  %v3762_v57 = vsub.f32 %v3734_v8, %v3760_v21  ;;  %v3763_v15 = vsub.f32 %v3735_v44, %v3760_v21  ;;  %v3764_v54 = vsub.f32 %v3736_v47, %v3760_v21 }
0x165d   :  { %v3765_v38 = vmul.f32 %v3761_v5, %v3761_v5  ;;  %v3766_v14 = vmul.f32 %v3762_v57, %v3762_v57  ;;  %v3767_v36 = vmul.f32 %v3763_v15, %v3763_v15  ;;  %v3768_v52 = vmul.f32 %v3764_v54, %v3764_v54 }
0x165f   :  { %v3769_v55 = vsel %vm74_vm0, %v3765_v38, 0.0  ;;  %v3770_v50 = vsel %vm74_vm0, %v3766_v14, 0.0  ;;  %v3772_v49 = vsel %vm74_vm0, %v3767_v36, 0.0  ;;  %v3774_v31 = vsel %vm74_vm0, %v3768_v52, 0.0  ;;  %v3853_v38 = vld [vmem:[%s6094_s17] sm:$0x1] }
0x1660   :  { %v3771_v45 = vadd.f32 %v3770_v50, %v3769_v55  ;;  %v3977_v55 = vld [vmem:[%s6094_s17] sm:$0x1] }
0x1662   :  { %v3773_v51 = vadd.f32 %v3772_v49, %v3771_v45 }
0x1664   :  { %v3775_v56 = vadd.f32 %v3774_v31, %v3773_v51 }
0x1666   :  { %v3776_v58 = vrot.slane %v3775_v56, 4 }
0x1668   :  { %v3777_v11 = vadd.f32 %v3776_v58, %v3775_v56 }
0x166a   :  { %v3778_v4 = vrot.slane %v3777_v11, 2 }
0x166c   :  { %v3779_v7 = vadd.f32 %v3778_v4, %v3777_v11 }
0x166e   :  { %v3780_v28 = vrot.slane %v3779_v7, 1 }
0x1670   :  { %v3781_v16 = vadd.f32 %v3780_v28, %v3779_v7 }
0x1672   :  { %v3782_v59 = vmul.f32 0.03125, %v3781_v16 }
0x1674   :  { %v3783_v17 = vadd.f32 1e-12, %v3782_v59 }
0x1676   :  { %4939 = vrsqrt.f32 %v3783_v17 }
0x1680   :  { %v4940_v24 = vpop.eup %4939 }
0x1681   :  { %v3787_v25 = vmul.f32 %v4940_v24, %v3763_v15  ;;  %v3785_v6 = vmul.f32 %v4940_v24, %v3761_v5  ;;  %v3786_v26 = vmul.f32 %v4940_v24, %v3762_v57  ;;  %v3788_v20 = vmul.f32 %v4940_v24, %v3764_v54 }
0x1683   :  { %v3809_v1 = vmul.f32 %v3792_v22, %v3785_v6  ;;  %v3810_v29 = vmul.f32 %v3797_v12, %v3786_v26  ;;  %v3811_v30 = vmul.f32 %v3802_v23, %v3787_v25  ;;  %v3812_v8 = vmul.f32 %v3807_v9, %v3788_v20 }
0x1685   :  { %v3833_v13 = vadd.f32 %v3816_v19, %v3809_v1  ;;  %v3834_v63 = vadd.f32 %v3821_v48, %v3810_v29  ;;  %v3835_v41 = vadd.f32 %v3826_v10, %v3811_v30  ;;  %v3836_v34 = vadd.f32 %v3831_v27, %v3812_v8 }
0x1687   :  { %v3961_v40 = vsel %vm3960_vm6, %v3833_v13, -inf  ;;  %v3837_v33 = vsel %vm444_vm2, %v3833_v13, -inf  ;;  %v3840_v37 = vsel %vm444_vm2, %v3834_v63, -inf  ;;  %v3843_v62 = vsel %vm444_vm2, %v3835_v41, -inf }
0x1688   :  { %3962 = vmax.xlane.f32.xlu1 %v3961_v40  ;;  %3838 = vmax.xlane.f32.xlu0 %v3837_v33  ;;  %v3964_v61 = vsel %vm3960_vm6, %v3834_v63, -inf  ;;  %v3846_v46 = vsel %vm444_vm2, %v3836_v34, -inf  ;;  %v3967_v47 = vsel %vm3960_vm6, %v3835_v41, -inf  ;;  %v3970_v44 = vsel %vm3960_vm6, %v3836_v34, -inf }
0x168c   :  { %3841 = vmax.xlane.f32.xlu0 %v3840_v37  ;;  %3844 = vmax.xlane.f32.xlu1 %v3843_v62 }
0x1690   :  { %3965 = vmax.xlane.f32.xlu0 %v3964_v61  ;;  %3847 = vmax.xlane.f32.xlu1 %v3846_v46 }
0x1694   :  { %3968 = vmax.xlane.f32.xlu0 %v3967_v47 }
0x1698   :  { %3971 = vmax.xlane.f32.xlu0 %v3970_v44 }
0x1715   :  { %v3839_v2 = vpop.xlane.xlu0 %3838  ;;  %v3963_v3 = vpop.xlane.xlu1 %3962 }
0x1716   :  { %3854 = vxpose.xlu1.b32.start [1/4] (short) (narrow) %v3839_v2, 8  ;;  %3978 = vxpose.xlu0.b32.start [1/4] (short) (narrow) %v3963_v3, 8 }
0x1719   :  { %v3842_v18 = vpop.xlane.xlu0 %3841  ;;  %v3845_v42 = vpop.xlane.xlu1 %3844 }
0x171a   :  { %3855 = vxpose.xlu1.b32.cont [2/4] (short) (narrow) %v3842_v18, 8 }
0x171d   :  { %v3966_v21 = vpop.xlane.xlu0 %3965  ;;  %v3848_v5 = vpop.xlane.xlu1 %3847 }
0x171e   :  { %3979 = vxpose.xlu0.b32.cont [2/4] (short) (narrow) %v3966_v21, 8  ;;  %3856 = vxpose.xlu1.b32.cont [3/4] (short) (narrow) %v3845_v42, 8 }
0x1721   :  { %v3969_v57 = vpop.xlane.xlu0 %3968 }
0x1722   :  { %3980 = vxpose.xlu0.b32.cont [3/4] (short) (narrow) %v3969_v57, 8  ;;  %3857 = vxpose.xlu1.b32.end [4/4] (short) (narrow) %v3848_v5, 8 }
0x1725   :  { %v3972_v15 = vpop.xlane.xlu0 %3971 }
0x1726   :  { %3981 = vxpose.xlu0.b32.end [4/4] (short) (narrow) %v3972_v15, 8 }
0x1796   :  { %v3870_v54 = vpop.trf.xlu1 }
0x1797   :  { %4691 = vmatmul.mubr.msk.f32.vlgmr.msra.gmra.mrb[48].mxu1 %vm250_vm1, %v3870_v54 }
0x179a   :  { %v3994_v60 = vpop.trf.xlu0 }
0x179b   :  { %4702 = vmatmul.mubr.msk.f32.vlgmr.msra.gmra.mrb[40].mxu0 %vm250_vm1, %v3994_v60 }
0x186a   :  { %v3955_v14 = vpop.f32.mrb[48].mxu1 }
0x186b   :  { %v3956_v36 = vadd.f32 %v3955_v14, %v3853_v38  ;;  %v4692_v52 = vpop.f32.mrb[49].mxu1 }
0x186d   :  { %3959 = vst [vmem:[#allocation2] sm:$0x1] %v3956_v36 }
0x186e   :  { %v4079_v50 = vpop.f32.mrb[40].mxu0 }
0x186f   :  { %v4080_v45 = vadd.f32 %v4079_v50, %v3977_v55  ;;  %v4703_v49 = vpop.f32.mrb[41].mxu0 }
0x1871   :  { %4083 = vst [vmem:[#allocation2 + $0x1] sm:$0x1] %v4080_v45 }
0x1872   :  { %4954 = shalt.err (!%p4951_p4)
}
0x1873   :  { %s4955_s22 = scalar_lea.hbm %s6095_s18, 32 }
0x1874   :  { %p4956_p5 = scmp.ne.s32.totalorder %s6095_s18, %s4955_s22  ;;  %p4959_p6 = scmp.lt.u32.totalorder %s4955_s22, %s6095_s18 }
0x1876   :  { %p4961_p7 = pnand %p4959_p6, %p4956_p5 }
0x1878   :  { %4964 = shalt.err (!%p4961_p7)
}
0x1879   :  { %4093 = dma.vmem_to_hbm [thread:$0]  %s4091_s9, 32, %s6095_s18, [#allocation3]  }
0x187a   :  { %4965 = dma.done.wait [#allocation3], 32  }
0x187b   :  { %4966 = vsyncadd [#allocation3], 4294967264 }
0x187c   :  { %4097 = vsyncpa [#allocation3], 1 }

</bundles_post_ra>
